<compile_context>
chip_gen: v7x
topology: tpu7x:2x2x1
jax: 0.10.0
libtpu: 0.0.40
codegen_flags: <defaults>
</compile_context>

<pallas_src>
import functools

import jax
import jax.numpy as jnp
from jax import lax
from jax.experimental import pallas as pl
from jax.experimental.pallas import tpu as pltpu


# -----------------------------------------------------------------------------
# Fused kernel (one grid step == one block of B batch elements)
# -----------------------------------------------------------------------------
def _simple_cnn_kernel(p1_ref, w1_ref, b1_ref, w2_ref, b2_ref,
                       wf1_ref, bf1_ref, wf2_ref, bf2_ref,
                       out_ref, pad_ref, *, B, H, W):
    C1 = w1_ref.shape[-1]                 # 32
    C2 = w2_ref.shape[-1]                 # 64
    n_hid = wf1_ref.shape[-1]             # 128
    H2, W2 = H // 2, W // 2               # 8, 8
    H4, W4 = H2 // 2, W2 // 2             # 4, 4
    f32 = jnp.float32

    # ---- conv1: one (B*H*W, 9) x (9, C1) im2col matmul + bias + relu ----
    y1 = jnp.dot(p1_ref[...], w1_ref[...], preferred_element_type=f32)
    a1 = jnp.maximum(y1 + b1_ref[...], 0.0)              # (B*H*W, C1)

    # ---- 2x2 / stride-2 max pool (reshape + max over the size-2 axes) ----
    a1 = a1.reshape(B, H2, 2, W, C1).max(axis=2)          # pool H
    pooled1 = a1.reshape(B, H2, W2, 2, C1).max(axis=3)    # pool W -> (B,H2,W2,C1)

    # ---- conv2 halo scratch: zero only the border strips (interior is fully
    #      overwritten every step; correct under megacore/parallel sharding) ----
    pad_ref[:, 0:1, :, :] = jnp.zeros((B, 1, W2 + 2, C1), f32)
    pad_ref[:, H2 + 1:H2 + 2, :, :] = jnp.zeros((B, 1, W2 + 2, C1), f32)
    pad_ref[:, :, 0:1, :] = jnp.zeros((B, H2 + 2, 1, C1), f32)
    pad_ref[:, :, W2 + 1:W2 + 2, :] = jnp.zeros((B, H2 + 2, 1, C1), f32)
    pad_ref[:, 1:H2 + 1, 1:W2 + 1, :] = pooled1

    # ---- conv2: 9 MXU-accumulated tap matmuls (no lane-axis im2col concat) ----
    y2 = jnp.broadcast_to(b2_ref[...], (B * H2 * W2, C2))
    for t in range(9):                                    # unrolled, static taps
        ky, kx = t // 3, t % 3
        tap = pad_ref[:, ky:ky + H2, kx:kx + W2, :].reshape(B * H2 * W2, C1)
        y2 = y2 + jnp.dot(tap, w2_ref[t], preferred_element_type=f32)

    # ---- relu + 2x2 / stride-2 max pool ----
    a2 = jnp.maximum(y2, 0.0)
    a2 = a2.reshape(B, H4, 2, W2, C2).max(axis=2)         # pool H
    pooled2 = a2.reshape(B, H4, W4, 2, C2).max(axis=3)    # pool W -> (B,H4,W4,C2)

    # ---- fc1: torch NCHW flatten folded into per-position weight blocks,
    #      h = sum_p pooled2[:, ph, pw, :] @ wf1[p]   (MXU accumulation,
    #      no 16-way lane concat / flatten relayout) ----
    h = jnp.broadcast_to(bf1_ref[...], (B, n_hid))
    for p in range(H4 * W4):                              # unrolled, 16 taps
        ph, pw = p // W4, p % W4
        h = h + jnp.dot(pooled2[:, ph, pw, :], wf1_ref[p],
                        preferred_element_type=f32)
    h = jnp.maximum(h, 0.0)

    # ---- fc2 (class dim zero-padded to 128 lanes -> dense unmasked stores) ----
    out_ref[...] = (jnp.dot(h, wf2_ref[...], preferred_element_type=f32)
                    + bf2_ref[...])


# -----------------------------------------------------------------------------
# Wrapper: tiny XLA prologue (conv1 im2col + weight prep) + one pallas_call
# -----------------------------------------------------------------------------
def simple_cnn_forward(x_nchw, params, *, block_b=64):
    (wc1, bc1, wc2, bc2, w1, b1, w2, b2) = params
    N, Cin, H, W = x_nchw.shape
    assert Cin == 1
    C1 = wc1.shape[-1]                    # 32
    C2 = wc2.shape[-1]                    # 64
    H2, W2 = H // 2, W // 2
    H4, W4 = H2 // 2, W2 // 2
    n_hid = w1.shape[-1]                  # 128
    n_cls = w2.shape[-1]                  # 10
    n_out = 128                           # class dim padded to a full lane width

    # ---- batch blocking: B samples per grid step ----
    # block_b should stay a multiple of 8 (sublane) whenever it does not cover N
    # (default 64 keeps per-step VMEM well under v7x's 64 MiB; raise it on
    #  v5e/v6e together with vmem_limit_bytes if desired).
    B = N if N <= block_b else block_b
    n_pad = (-N) % B
    if n_pad:
        x_nchw = jnp.pad(x_nchw, ((0, n_pad), (0, 0), (0, 0), (0, 0)))
    Np = N + n_pad
    grid_n = Np // B

    # conv1 im2col prologue in plain JAX: the raw input is tiny and Cin == 1,
    # so building (Np*H*W, 9) patches here keeps the kernel lane-dense.
    # TODO(synk): pass raw images and do conv1 as tap-accumulated matmuls to
    # shave the 9x patch DMA once batches get very large.
    xp = jnp.pad(x_nchw[:, 0], ((0, 0), (1, 1), (1, 1)))
    taps = [xp[:, ky:ky + H, kx:kx + W] for ky in range(3) for kx in range(3)]
    patches1 = jnp.stack(taps, axis=-1).reshape(Np * H * W, 9)

    # one-time weight prep (reshapes / permutation on weights only)
    w1c = wc1.reshape(9, C1)                              # row = ky*3 + kx
    b1c = bc1.reshape(1, C1)
    w2c = wc2.reshape(9, C1, C2)                          # [tap, cin, cout]
    b2c = bc2.reshape(1, C2)
    # Fold torch's NCHW flatten order into fc1's rows: wf1[p, c, :] is the
    # fc1 row for flat index c*H4*W4 + p.
    wf1 = (w1.reshape(C2, H4, W4, n_hid)
             .transpose(1, 2, 0, 3)
             .reshape(H4 * W4, C2, n_hid))
    bf1 = b1.reshape(1, n_hid)
    wf2 = jnp.zeros((n_hid, n_out), w2.dtype).at[:, :n_cls].set(w2)
    bf2 = jnp.zeros((1, n_out), b2.dtype).at[:, :n_cls].set(b2)

    kern = functools.partial(_simple_cnn_kernel, B=B, H=H, W=W)

    flops = 2 * Np * (H * W * 9 * C1 + H2 * W2 * 9 * C1 * C2
                      + H4 * W4 * C2 * n_hid + n_hid * n_out)
    bytes_accessed = 4 * (patches1.size + w1c.size + b1c.size + w2c.size
                          + b2c.size + wf1.size + bf1.size + wf2.size
                          + bf2.size + Np * n_out)

    out = pl.pallas_call(
        kern,
        out_shape=jax.ShapeDtypeStruct((Np, n_out), jnp.float32),
        grid=(grid_n,),
        in_specs=[
            pl.BlockSpec((B * H * W, 9), lambda n: (n, 0)),
            pl.BlockSpec(w1c.shape, lambda n: (0, 0)),
            pl.BlockSpec(b1c.shape, lambda n: (0, 0)),
            pl.BlockSpec(w2c.shape, lambda n: (0, 0, 0)),
            pl.BlockSpec(b2c.shape, lambda n: (0, 0)),
            pl.BlockSpec(wf1.shape, lambda n: (0, 0, 0)),
            pl.BlockSpec(bf1.shape, lambda n: (0, 0)),
            pl.BlockSpec(wf2.shape, lambda n: (0, 0)),
            pl.BlockSpec(bf2.shape, lambda n: (0, 0)),
        ],
        out_specs=pl.BlockSpec((B, n_out), lambda n: (n, 0)),
        scratch_shapes=[
            pltpu.VMEM((B, H2 + 2, W2 + 2, C1), jnp.float32),   # conv2 halo
        ],
        compiler_params=pltpu.CompilerParams(
            dimension_semantics=("parallel",),
            vmem_limit_bytes=48 * 1024 * 1024),
        cost_estimate=pl.CostEstimate(flops=int(flops), transcendentals=0,
                                      bytes_accessed=int(bytes_accessed)),
    )(patches1, w1c, b1c, w2c, b2c, wf1, bf1, wf2, bf2)
    return out[:N, :n_cls]


# -----------------------------------------------------------------------------
# Pure-JAX reference (correctness check only)
# -----------------------------------------------------------------------------
def reference_forward(x_nchw, params):
    (wc1, bc1, wc2, bc2, w1, b1, w2, b2) = params
    dn = ('NCHW', 'HWIO', 'NCHW')

    def conv(x, w, b):
        y = lax.conv_general_dilated(x, w, (1, 1), 'SAME',
                                     dimension_numbers=dn,
                                     precision=lax.Precision.HIGHEST)
        return y + b.reshape(1, -1, 1, 1)

    def pool(x):
        return lax.reduce_window(x, -jnp.inf, lax.max,
                                 (1, 1, 2, 2), (1, 1, 2, 2), 'VALID')

    y = pool(jax.nn.relu(conv(x_nchw, wc1, bc1)))
    y = pool(jax.nn.relu(conv(y, wc2, bc2)))
    y = y.reshape(y.shape[0], -1)
    y = jax.nn.relu(jnp.dot(y, w1, precision=lax.Precision.HIGHEST) + b1)
    return jnp.dot(y, w2, precision=lax.Precision.HIGHEST) + b2


if __name__ == "__main__":
    key = jax.random.PRNGKey(0)
    ks = jax.random.split(key, 9)

    N, input_size = 2, 16
    out_sz = input_size
    for _ in range(2):
        out_sz = (out_sz - 2 + 2 * 1) // 2          # 16 -> 8 -> 4
    fc1_in = 64 * out_sz * out_sz                    # 1024

    x = jax.random.normal(ks[0], (N, 1, input_size, input_size), jnp.float32)

    params = (
        0.1 * jax.random.normal(ks[1], (3, 3, 1, 32), jnp.float32),   # conv1 w (HWIO)
        0.1 * jax.random.normal(ks[2], (32,), jnp.float32),           # conv1 b
        0.1 * jax.random.normal(ks[3], (3, 3, 32, 64), jnp.float32),  # conv2 w (HWIO)
        0.1 * jax.random.normal(ks[4], (64,), jnp.float32),           # conv2 b
        0.1 * jax.random.normal(ks[5], (fc1_in, 128), jnp.float32),   # fc1 w (in,out)
        0.1 * jax.random.normal(ks[6], (128,), jnp.float32),          # fc1 b
        0.1 * jax.random.normal(ks[7], (128, 10), jnp.float32),       # fc2 w (in,out)
        0.1 * jax.random.normal(ks[8], (10,), jnp.float32),           # fc2 b
    )

    fwd = jax.jit(simple_cnn_forward)
    out = jax.block_until_ready(fwd(x, params))
    assert out.shape == (N, 10), out.shape

    ref = reference_forward(x, params)
    max_err = float(jnp.max(jnp.abs(out - ref)))
    assert bool(jnp.allclose(out, ref, atol=2e-2, rtol=2e-2)), max_err

    print("KERNEL_OK")
</pallas_src>

<mosaic_0001>
module attributes {stable_mosaic.version = 11 : i64} {
  func.func @_simple_cnn_kernel(%arg0: i32, %arg1: memref<512x9xf32, #tpu.memory_space<vmem>>, %arg2: memref<9x32xf32, #tpu.memory_space<vmem>>, %arg3: memref<1x32xf32, #tpu.memory_space<vmem>>, %arg4: memref<9x32x64xf32, #tpu.memory_space<vmem>>, %arg5: memref<1x64xf32, #tpu.memory_space<vmem>>, %arg6: memref<16x64x128xf32, #tpu.memory_space<vmem>>, %arg7: memref<1x128xf32, #tpu.memory_space<vmem>>, %arg8: memref<128x128xf32, #tpu.memory_space<vmem>>, %arg9: memref<1x128xf32, #tpu.memory_space<vmem>>, %arg10: memref<2x128xf32, #tpu.memory_space<vmem>>, %arg11: memref<2x10x10x32xf32, #tpu.memory_space<vmem>>) attributes {dimension_semantics = [#tpu.dimension_semantics<parallel>], iteration_bounds = array<i64: 1>, scalar_prefetch = 0 : i64, scratch_operands = 1 : i64, tpu.core_type = #tpu.core_type<tc>, window_params = [{transform_indices = @transform_0, window_bounds = array<i64: 512, 9>}, {pipeline_mode = #tpu.pipeline_mode<synchronous>, transform_indices = @transform_1, window_bounds = array<i64: 9, 32>}, {pipeline_mode = #tpu.pipeline_mode<synchronous>, transform_indices = @transform_2, window_bounds = array<i64: 1, 32>}, {pipeline_mode = #tpu.pipeline_mode<synchronous>, transform_indices = @transform_3, window_bounds = array<i64: 9, 32, 64>}, {pipeline_mode = #tpu.pipeline_mode<synchronous>, transform_indices = @transform_4, window_bounds = array<i64: 1, 64>}, {pipeline_mode = #tpu.pipeline_mode<synchronous>, transform_indices = @transform_5, window_bounds = array<i64: 16, 64, 128>}, {pipeline_mode = #tpu.pipeline_mode<synchronous>, transform_indices = @transform_6, window_bounds = array<i64: 1, 128>}, {pipeline_mode = #tpu.pipeline_mode<synchronous>, transform_indices = @transform_7, window_bounds = array<i64: 128, 128>}, {pipeline_mode = #tpu.pipeline_mode<synchronous>, transform_indices = @transform_8, window_bounds = array<i64: 1, 128>}, {transform_indices = @transform_9, window_bounds = array<i64: 2, 128>}]} {
    %c0 = arith.constant 0 : index
    %c0_0 = arith.constant 0 : index
    %0 = vector.load %arg1[%c0, %c0_0] : memref<512x9xf32, #tpu.memory_space<vmem>>, vector<512x9xf32>
    %c0_1 = arith.constant 0 : index
    %c0_2 = arith.constant 0 : index
    %1 = vector.load %arg2[%c0_1, %c0_2] : memref<9x32xf32, #tpu.memory_space<vmem>>, vector<9x32xf32>
    %cst = arith.constant dense<0.000000e+00> : vector<512x32xf32>
    %2 = tpu.matmul %0, %1, %cst {dimension_numbers = #tpu.dot_dimension_numbers<[1], [0], [0], [1], [0, 0, 1, 1], [], []>} : vector<512x9xf32>, vector<9x32xf32>, vector<512x32xf32> -> vector<512x32xf32>
    %c0_3 = arith.constant 0 : index
    %c0_4 = arith.constant 0 : index
    %3 = vector.load %arg3[%c0_3, %c0_4] : memref<1x32xf32, #tpu.memory_space<vmem>>, vector<1x32xf32>
    %4 = vector.broadcast %3 : vector<1x32xf32> to vector<512x32xf32>
    %5 = arith.addf %2, %4 : vector<512x32xf32>
    %cst_5 = arith.constant 0.000000e+00 : f32
    %6 = vector.broadcast %cst_5 : f32 to vector<512x32xf32>
    %7 = arith.maximumf %5, %6 : vector<512x32xf32>
    %8 = vector.shape_cast %7 : vector<512x32xf32> to vector<2x8x2x16x32xf32>
    %cst_6 = arith.constant dense<0xFF800000> : vector<2x8x16x32xf32>
    %9 = vector.multi_reduction <maximumf>, %8, %cst_6 [2] : vector<2x8x2x16x32xf32> to vector<2x8x16x32xf32>
    %10 = vector.shape_cast %9 : vector<2x8x16x32xf32> to vector<2x8x8x2x32xf32>
    %cst_7 = arith.constant dense<0xFF800000> : vector<2x8x8x32xf32>
    %11 = vector.multi_reduction <maximumf>, %10, %cst_7 [3] : vector<2x8x8x2x32xf32> to vector<2x8x8x32xf32>
    %cst_8 = arith.constant 0.000000e+00 : f32
    %12 = vector.broadcast %cst_8 : f32 to vector<2x1x10x32xf32>
    %c0_9 = arith.constant 0 : index
    %c0_10 = arith.constant 0 : index
    %c0_11 = arith.constant 0 : index
    %c0_12 = arith.constant 0 : index
    %13 = vector.load %arg11[%c0_9, %c0_10, %c0_11, %c0_12] : memref<2x10x10x32xf32, #tpu.memory_space<vmem>>, vector<2x1x10x32xf32>
    tpu.vector_store %arg11[%c0_9, %c0_10, %c0_11, %c0_12], %12 {strides = array<i32>} : memref<2x10x10x32xf32, #tpu.memory_space<vmem>>, vector<2x1x10x32xf32>,
    %cst_13 = arith.constant 0.000000e+00 : f32
    %14 = vector.broadcast %cst_13 : f32 to vector<2x1x10x32xf32>
    %c0_14 = arith.constant 0 : index
    %c9 = arith.constant 9 : index
    %c0_15 = arith.constant 0 : index
    %c0_16 = arith.constant 0 : index
    %15 = vector.load %arg11[%c0_14, %c9, %c0_15, %c0_16] : memref<2x10x10x32xf32, #tpu.memory_space<vmem>>, vector<2x1x10x32xf32>
    tpu.vector_store %arg11[%c0_14, %c9, %c0_15, %c0_16], %14 {strides = array<i32>} : memref<2x10x10x32xf32, #tpu.memory_space<vmem>>, vector<2x1x10x32xf32>,
    %cst_17 = arith.constant 0.000000e+00 : f32
    %16 = vector.broadcast %cst_17 : f32 to vector<2x10x1x32xf32>
    %c0_18 = arith.constant 0 : index
    %c0_19 = arith.constant 0 : index
    %c0_20 = arith.constant 0 : index
    %c0_21 = arith.constant 0 : index
    %17 = vector.load %arg11[%c0_18, %c0_19, %c0_20, %c0_21] : memref<2x10x10x32xf32, #tpu.memory_space<vmem>>, vector<2x10x1x32xf32>
    tpu.vector_store %arg11[%c0_18, %c0_19, %c0_20, %c0_21], %16 {strides = array<i32>} : memref<2x10x10x32xf32, #tpu.memory_space<vmem>>, vector<2x10x1x32xf32>,
    %cst_22 = arith.constant 0.000000e+00 : f32
    %18 = vector.broadcast %cst_22 : f32 to vector<2x10x1x32xf32>
    %c0_23 = arith.constant 0 : index
    %c0_24 = arith.constant 0 : index
    %c9_25 = arith.constant 9 : index
    %c0_26 = arith.constant 0 : index
    %19 = vector.load %arg11[%c0_23, %c0_24, %c9_25, %c0_26] : memref<2x10x10x32xf32, #tpu.memory_space<vmem>>, vector<2x10x1x32xf32>
    tpu.vector_store %arg11[%c0_23, %c0_24, %c9_25, %c0_26], %18 {strides = array<i32>} : memref<2x10x10x32xf32, #tpu.memory_space<vmem>>, vector<2x10x1x32xf32>,
    %c0_27 = arith.constant 0 : index
    %c1 = arith.constant 1 : index
    %c1_28 = arith.constant 1 : index
    %c0_29 = arith.constant 0 : index
    %20 = vector.load %arg11[%c0_27, %c1, %c1_28, %c0_29] : memref<2x10x10x32xf32, #tpu.memory_space<vmem>>, vector<2x8x8x32xf32>
    tpu.vector_store %arg11[%c0_27, %c1, %c1_28, %c0_29], %11 {strides = array<i32>} : memref<2x10x10x32xf32, #tpu.memory_space<vmem>>, vector<2x8x8x32xf32>,
    %c0_30 = arith.constant 0 : index
    %c0_31 = arith.constant 0 : index
    %21 = vector.load %arg5[%c0_30, %c0_31] : memref<1x64xf32, #tpu.memory_space<vmem>>, vector<1x64xf32>
    %22 = vector.shape_cast %21 : vector<1x64xf32> to vector<1x64xf32>
    %23 = vector.broadcast %22 : vector<1x64xf32> to vector<128x64xf32>
    %c0_32 = arith.constant 0 : index
    %c0_33 = arith.constant 0 : index
    %c0_34 = arith.constant 0 : index
    %c0_35 = arith.constant 0 : index
    %24 = vector.load %arg11[%c0_32, %c0_33, %c0_34, %c0_35] : memref<2x10x10x32xf32, #tpu.memory_space<vmem>>, vector<2x8x8x32xf32>
    %25 = vector.shape_cast %24 : vector<2x8x8x32xf32> to vector<128x32xf32>
    %c0_36 = arith.constant 0 : index
    %c0_37 = arith.constant 0 : index
    %c0_38 = arith.constant 0 : index
    %26 = vector.load %arg4[%c0_36, %c0_37, %c0_38] : memref<9x32x64xf32, #tpu.memory_space<vmem>>, vector<1x32x64xf32>
    %27 = vector.shape_cast %26 : vector<1x32x64xf32> to vector<32x64xf32>
    %cst_39 = arith.constant dense<0.000000e+00> : vector<128x64xf32>
    %28 = tpu.matmul %25, %27, %cst_39 {dimension_numbers = #tpu.dot_dimension_numbers<[1], [0], [0], [1], [0, 0, 1, 1], [], []>} : vector<128x32xf32>, vector<32x64xf32>, vector<128x64xf32> -> vector<128x64xf32>
    %29 = arith.addf %23, %28 : vector<128x64xf32>
    %c0_40 = arith.constant 0 : index
    %c0_41 = arith.constant 0 : index
    %c1_42 = arith.constant 1 : index
    %c0_43 = arith.constant 0 : index
    %30 = vector.load %arg11[%c0_40, %c0_41, %c1_42, %c0_43] : memref<2x10x10x32xf32, #tpu.memory_space<vmem>>, vector<2x8x8x32xf32>
    %31 = vector.shape_cast %30 : vector<2x8x8x32xf32> to vector<128x32xf32>
    %c1_44 = arith.constant 1 : index
    %c0_45 = arith.constant 0 : index
    %c0_46 = arith.constant 0 : index
    %32 = vector.load %arg4[%c1_44, %c0_45, %c0_46] : memref<9x32x64xf32, #tpu.memory_space<vmem>>, vector<1x32x64xf32>
    %33 = vector.shape_cast %32 : vector<1x32x64xf32> to vector<32x64xf32>
    %cst_47 = arith.constant dense<0.000000e+00> : vector<128x64xf32>
    %34 = tpu.matmul %31, %33, %cst_47 {dimension_numbers = #tpu.dot_dimension_numbers<[1], [0], [0], [1], [0, 0, 1, 1], [], []>} : vector<128x32xf32>, vector<32x64xf32>, vector<128x64xf32> -> vector<128x64xf32>
    %35 = arith.addf %29, %34 : vector<128x64xf32>
    %c0_48 = arith.constant 0 : index
    %c0_49 = arith.constant 0 : index
    %c2 = arith.constant 2 : index
    %c0_50 = arith.constant 0 : index
    %36 = vector.load %arg11[%c0_48, %c0_49, %c2, %c0_50] : memref<2x10x10x32xf32, #tpu.memory_space<vmem>>, vector<2x8x8x32xf32>
    %37 = vector.shape_cast %36 : vector<2x8x8x32xf32> to vector<128x32xf32>
    %c2_51 = arith.constant 2 : index
    %c0_52 = arith.constant 0 : index
    %c0_53 = arith.constant 0 : index
    %38 = vector.load %arg4[%c2_51, %c0_52, %c0_53] : memref<9x32x64xf32, #tpu.memory_space<vmem>>, vector<1x32x64xf32>
    %39 = vector.shape_cast %38 : vector<1x32x64xf32> to vector<32x64xf32>
    %cst_54 = arith.constant dense<0.000000e+00> : vector<128x64xf32>
    %40 = tpu.matmul %37, %39, %cst_54 {dimension_numbers = #tpu.dot_dimension_numbers<[1], [0], [0], [1], [0, 0, 1, 1], [], []>} : vector<128x32xf32>, vector<32x64xf32>, vector<128x64xf32> -> vector<128x64xf32>
    %41 = arith.addf %35, %40 : vector<128x64xf32>
    %c0_55 = arith.constant 0 : index
    %c1_56 = arith.constant 1 : index
    %c0_57 = arith.constant 0 : index
    %c0_58 = arith.constant 0 : index
    %42 = vector.load %arg11[%c0_55, %c1_56, %c0_57, %c0_58] : memref<2x10x10x32xf32, #tpu.memory_space<vmem>>, vector<2x8x8x32xf32>
    %43 = vector.shape_cast %42 : vector<2x8x8x32xf32> to vector<128x32xf32>
    %c3 = arith.constant 3 : index
    %c0_59 = arith.constant 0 : index
    %c0_60 = arith.constant 0 : index
    %44 = vector.load %arg4[%c3, %c0_59, %c0_60] : memref<9x32x64xf32, #tpu.memory_space<vmem>>, vector<1x32x64xf32>
    %45 = vector.shape_cast %44 : vector<1x32x64xf32> to vector<32x64xf32>
    %cst_61 = arith.constant dense<0.000000e+00> : vector<128x64xf32>
    %46 = tpu.matmul %43, %45, %cst_61 {dimension_numbers = #tpu.dot_dimension_numbers<[1], [0], [0], [1], [0, 0, 1, 1], [], []>} : vector<128x32xf32>, vector<32x64xf32>, vector<128x64xf32> -> vector<128x64xf32>
    %47 = arith.addf %41, %46 : vector<128x64xf32>
    %c0_62 = arith.constant 0 : index
    %c1_63 = arith.constant 1 : index
    %c1_64 = arith.constant 1 : index
    %c0_65 = arith.constant 0 : index
    %48 = vector.load %arg11[%c0_62, %c1_63, %c1_64, %c0_65] : memref<2x10x10x32xf32, #tpu.memory_space<vmem>>, vector<2x8x8x32xf32>
    %49 = vector.shape_cast %48 : vector<2x8x8x32xf32> to vector<128x32xf32>
    %c4 = arith.constant 4 : index
    %c0_66 = arith.constant 0 : index
    %c0_67 = arith.constant 0 : index
    %50 = vector.load %arg4[%c4, %c0_66, %c0_67] : memref<9x32x64xf32, #tpu.memory_space<vmem>>, vector<1x32x64xf32>
    %51 = vector.shape_cast %50 : vector<1x32x64xf32> to vector<32x64xf32>
    %cst_68 = arith.constant dense<0.000000e+00> : vector<128x64xf32>
    %52 = tpu.matmul %49, %51, %cst_68 {dimension_numbers = #tpu.dot_dimension_numbers<[1], [0], [0], [1], [0, 0, 1, 1], [], []>} : vector<128x32xf32>, vector<32x64xf32>, vector<128x64xf32> -> vector<128x64xf32>
    %53 = arith.addf %47, %52 : vector<128x64xf32>
    %c0_69 = arith.constant 0 : index
    %c1_70 = arith.constant 1 : index
    %c2_71 = arith.constant 2 : index
    %c0_72 = arith.constant 0 : index
    %54 = vector.load %arg11[%c0_69, %c1_70, %c2_71, %c0_72] : memref<2x10x10x32xf32, #tpu.memory_space<vmem>>, vector<2x8x8x32xf32>
    %55 = vector.shape_cast %54 : vector<2x8x8x32xf32> to vector<128x32xf32>
    %c5 = arith.constant 5 : index
    %c0_73 = arith.constant 0 : index
    %c0_74 = arith.constant 0 : index
    %56 = vector.load %arg4[%c5, %c0_73, %c0_74] : memref<9x32x64xf32, #tpu.memory_space<vmem>>, vector<1x32x64xf32>
    %57 = vector.shape_cast %56 : vector<1x32x64xf32> to vector<32x64xf32>
    %cst_75 = arith.constant dense<0.000000e+00> : vector<128x64xf32>
    %58 = tpu.matmul %55, %57, %cst_75 {dimension_numbers = #tpu.dot_dimension_numbers<[1], [0], [0], [1], [0, 0, 1, 1], [], []>} : vector<128x32xf32>, vector<32x64xf32>, vector<128x64xf32> -> vector<128x64xf32>
    %59 = arith.addf %53, %58 : vector<128x64xf32>
    %c0_76 = arith.constant 0 : index
    %c2_77 = arith.constant 2 : index
    %c0_78 = arith.constant 0 : index
    %c0_79 = arith.constant 0 : index
    %60 = vector.load %arg11[%c0_76, %c2_77, %c0_78, %c0_79] : memref<2x10x10x32xf32, #tpu.memory_space<vmem>>, vector<2x8x8x32xf32>
    %61 = vector.shape_cast %60 : vector<2x8x8x32xf32> to vector<128x32xf32>
    %c6 = arith.constant 6 : index
    %c0_80 = arith.constant 0 : index
    %c0_81 = arith.constant 0 : index
    %62 = vector.load %arg4[%c6, %c0_80, %c0_81] : memref<9x32x64xf32, #tpu.memory_space<vmem>>, vector<1x32x64xf32>
    %63 = vector.shape_cast %62 : vector<1x32x64xf32> to vector<32x64xf32>
    %cst_82 = arith.constant dense<0.000000e+00> : vector<128x64xf32>
    %64 = tpu.matmul %61, %63, %cst_82 {dimension_numbers = #tpu.dot_dimension_numbers<[1], [0], [0], [1], [0, 0, 1, 1], [], []>} : vector<128x32xf32>, vector<32x64xf32>, vector<128x64xf32> -> vector<128x64xf32>
    %65 = arith.addf %59, %64 : vector<128x64xf32>
    %c0_83 = arith.constant 0 : index
    %c2_84 = arith.constant 2 : index
    %c1_85 = arith.constant 1 : index
    %c0_86 = arith.constant 0 : index
    %66 = vector.load %arg11[%c0_83, %c2_84, %c1_85, %c0_86] : memref<2x10x10x32xf32, #tpu.memory_space<vmem>>, vector<2x8x8x32xf32>
    %67 = vector.shape_cast %66 : vector<2x8x8x32xf32> to vector<128x32xf32>
    %c7 = arith.constant 7 : index
    %c0_87 = arith.constant 0 : index
    %c0_88 = arith.constant 0 : index
    %68 = vector.load %arg4[%c7, %c0_87, %c0_88] : memref<9x32x64xf32, #tpu.memory_space<vmem>>, vector<1x32x64xf32>
    %69 = vector.shape_cast %68 : vector<1x32x64xf32> to vector<32x64xf32>
    %cst_89 = arith.constant dense<0.000000e+00> : vector<128x64xf32>
    %70 = tpu.matmul %67, %69, %cst_89 {dimension_numbers = #tpu.dot_dimension_numbers<[1], [0], [0], [1], [0, 0, 1, 1], [], []>} : vector<128x32xf32>, vector<32x64xf32>, vector<128x64xf32> -> vector<128x64xf32>
    %71 = arith.addf %65, %70 : vector<128x64xf32>
    %c0_90 = arith.constant 0 : index
    %c2_91 = arith.constant 2 : index
    %c2_92 = arith.constant 2 : index
    %c0_93 = arith.constant 0 : index
    %72 = vector.load %arg11[%c0_90, %c2_91, %c2_92, %c0_93] : memref<2x10x10x32xf32, #tpu.memory_space<vmem>>, vector<2x8x8x32xf32>
    %73 = vector.shape_cast %72 : vector<2x8x8x32xf32> to vector<128x32xf32>
    %c8 = arith.constant 8 : index
    %c0_94 = arith.constant 0 : index
    %c0_95 = arith.constant 0 : index
    %74 = vector.load %arg4[%c8, %c0_94, %c0_95] : memref<9x32x64xf32, #tpu.memory_space<vmem>>, vector<1x32x64xf32>
    %75 = vector.shape_cast %74 : vector<1x32x64xf32> to vector<32x64xf32>
    %cst_96 = arith.constant dense<0.000000e+00> : vector<128x64xf32>
    %76 = tpu.matmul %73, %75, %cst_96 {dimension_numbers = #tpu.dot_dimension_numbers<[1], [0], [0], [1], [0, 0, 1, 1], [], []>} : vector<128x32xf32>, vector<32x64xf32>, vector<128x64xf32> -> vector<128x64xf32>
    %77 = arith.addf %71, %76 : vector<128x64xf32>
    %cst_97 = arith.constant 0.000000e+00 : f32
    %78 = vector.broadcast %cst_97 : f32 to vector<128x64xf32>
    %79 = arith.maximumf %77, %78 : vector<128x64xf32>
    %80 = vector.shape_cast %79 : vector<128x64xf32> to vector<2x4x2x8x64xf32>
    %cst_98 = arith.constant dense<0xFF800000> : vector<2x4x8x64xf32>
    %81 = vector.multi_reduction <maximumf>, %80, %cst_98 [2] : vector<2x4x2x8x64xf32> to vector<2x4x8x64xf32>
    %82 = vector.shape_cast %81 : vector<2x4x8x64xf32> to vector<2x4x4x2x64xf32>
    %cst_99 = arith.constant dense<0xFF800000> : vector<2x4x4x64xf32>
    %83 = vector.multi_reduction <maximumf>, %82, %cst_99 [3] : vector<2x4x4x2x64xf32> to vector<2x4x4x64xf32>
    %c0_100 = arith.constant 0 : index
    %c0_101 = arith.constant 0 : index
    %84 = vector.load %arg7[%c0_100, %c0_101] : memref<1x128xf32, #tpu.memory_space<vmem>>, vector<1x128xf32>
    %85 = vector.shape_cast %84 : vector<1x128xf32> to vector<1x128xf32>
    %86 = vector.broadcast %85 : vector<1x128xf32> to vector<2x128xf32>
    %87 = vector.extract_strided_slice %83 {offsets = [0, 0, 0, 0], sizes = [2, 1, 1, 64], strides = [1, 1, 1, 1]} : vector<2x4x4x64xf32> to vector<2x1x1x64xf32>
    %88 = vector.shape_cast %87 : vector<2x1x1x64xf32> to vector<2x64xf32>
    %c0_102 = arith.constant 0 : index
    %c0_103 = arith.constant 0 : index
    %c0_104 = arith.constant 0 : index
    %89 = vector.load %arg6[%c0_102, %c0_103, %c0_104] : memref<16x64x128xf32, #tpu.memory_space<vmem>>, vector<1x64x128xf32>
    %90 = vector.shape_cast %89 : vector<1x64x128xf32> to vector<64x128xf32>
    %cst_105 = arith.constant dense<0.000000e+00> : vector<2x128xf32>
    %91 = tpu.matmul %88, %90, %cst_105 {dimension_numbers = #tpu.dot_dimension_numbers<[1], [0], [0], [1], [0, 0, 1, 1], [], []>} : vector<2x64xf32>, vector<64x128xf32>, vector<2x128xf32> -> vector<2x128xf32>
    %92 = arith.addf %86, %91 : vector<2x128xf32>
    %93 = vector.extract_strided_slice %83 {offsets = [0, 0, 1, 0], sizes = [2, 1, 1, 64], strides = [1, 1, 1, 1]} : vector<2x4x4x64xf32> to vector<2x1x1x64xf32>
    %94 = vector.shape_cast %93 : vector<2x1x1x64xf32> to vector<2x64xf32>
    %c1_106 = arith.constant 1 : index
    %c0_107 = arith.constant 0 : index
    %c0_108 = arith.constant 0 : index
    %95 = vector.load %arg6[%c1_106, %c0_107, %c0_108] : memref<16x64x128xf32, #tpu.memory_space<vmem>>, vector<1x64x128xf32>
    %96 = vector.shape_cast %95 : vector<1x64x128xf32> to vector<64x128xf32>
    %cst_109 = arith.constant dense<0.000000e+00> : vector<2x128xf32>
    %97 = tpu.matmul %94, %96, %cst_109 {dimension_numbers = #tpu.dot_dimension_numbers<[1], [0], [0], [1], [0, 0, 1, 1], [], []>} : vector<2x64xf32>, vector<64x128xf32>, vector<2x128xf32> -> vector<2x128xf32>
    %98 = arith.addf %92, %97 : vector<2x128xf32>
    %99 = vector.extract_strided_slice %83 {offsets = [0, 0, 2, 0], sizes = [2, 1, 1, 64], strides = [1, 1, 1, 1]} : vector<2x4x4x64xf32> to vector<2x1x1x64xf32>
    %100 = vector.shape_cast %99 : vector<2x1x1x64xf32> to vector<2x64xf32>
    %c2_110 = arith.constant 2 : index
    %c0_111 = arith.constant 0 : index
    %c0_112 = arith.constant 0 : index
    %101 = vector.load %arg6[%c2_110, %c0_111, %c0_112] : memref<16x64x128xf32, #tpu.memory_space<vmem>>, vector<1x64x128xf32>
    %102 = vector.shape_cast %101 : vector<1x64x128xf32> to vector<64x128xf32>
    %cst_113 = arith.constant dense<0.000000e+00> : vector<2x128xf32>
    %103 = tpu.matmul %100, %102, %cst_113 {dimension_numbers = #tpu.dot_dimension_numbers<[1], [0], [0], [1], [0, 0, 1, 1], [], []>} : vector<2x64xf32>, vector<64x128xf32>, vector<2x128xf32> -> vector<2x128xf32>
    %104 = arith.addf %98, %103 : vector<2x128xf32>
    %105 = vector.extract_strided_slice %83 {offsets = [0, 0, 3, 0], sizes = [2, 1, 1, 64], strides = [1, 1, 1, 1]} : vector<2x4x4x64xf32> to vector<2x1x1x64xf32>
    %106 = vector.shape_cast %105 : vector<2x1x1x64xf32> to vector<2x64xf32>
    %c3_114 = arith.constant 3 : index
    %c0_115 = arith.constant 0 : index
    %c0_116 = arith.constant 0 : index
    %107 = vector.load %arg6[%c3_114, %c0_115, %c0_116] : memref<16x64x128xf32, #tpu.memory_space<vmem>>, vector<1x64x128xf32>
    %108 = vector.shape_cast %107 : vector<1x64x128xf32> to vector<64x128xf32>
    %cst_117 = arith.constant dense<0.000000e+00> : vector<2x128xf32>
    %109 = tpu.matmul %106, %108, %cst_117 {dimension_numbers = #tpu.dot_dimension_numbers<[1], [0], [0], [1], [0, 0, 1, 1], [], []>} : vector<2x64xf32>, vector<64x128xf32>, vector<2x128xf32> -> vector<2x128xf32>
    %110 = arith.addf %104, %109 : vector<2x128xf32>
    %111 = vector.extract_strided_slice %83 {offsets = [0, 1, 0, 0], sizes = [2, 1, 1, 64], strides = [1, 1, 1, 1]} : vector<2x4x4x64xf32> to vector<2x1x1x64xf32>
    %112 = vector.shape_cast %111 : vector<2x1x1x64xf32> to vector<2x64xf32>
    %c4_118 = arith.constant 4 : index
    %c0_119 = arith.constant 0 : index
    %c0_120 = arith.constant 0 : index
    %113 = vector.load %arg6[%c4_118, %c0_119, %c0_120] : memref<16x64x128xf32, #tpu.memory_space<vmem>>, vector<1x64x128xf32>
    %114 = vector.shape_cast %113 : vector<1x64x128xf32> to vector<64x128xf32>
    %cst_121 = arith.constant dense<0.000000e+00> : vector<2x128xf32>
    %115 = tpu.matmul %112, %114, %cst_121 {dimension_numbers = #tpu.dot_dimension_numbers<[1], [0], [0], [1], [0, 0, 1, 1], [], []>} : vector<2x64xf32>, vector<64x128xf32>, vector<2x128xf32> -> vector<2x128xf32>
    %116 = arith.addf %110, %115 : vector<2x128xf32>
    %117 = vector.extract_strided_slice %83 {offsets = [0, 1, 1, 0], sizes = [2, 1, 1, 64], strides = [1, 1, 1, 1]} : vector<2x4x4x64xf32> to vector<2x1x1x64xf32>
    %118 = vector.shape_cast %117 : vector<2x1x1x64xf32> to vector<2x64xf32>
    %c5_122 = arith.constant 5 : index
    %c0_123 = arith.constant 0 : index
    %c0_124 = arith.constant 0 : index
    %119 = vector.load %arg6[%c5_122, %c0_123, %c0_124] : memref<16x64x128xf32, #tpu.memory_space<vmem>>, vector<1x64x128xf32>
    %120 = vector.shape_cast %119 : vector<1x64x128xf32> to vector<64x128xf32>
    %cst_125 = arith.constant dense<0.000000e+00> : vector<2x128xf32>
    %121 = tpu.matmul %118, %120, %cst_125 {dimension_numbers = #tpu.dot_dimension_numbers<[1], [0], [0], [1], [0, 0, 1, 1], [], []>} : vector<2x64xf32>, vector<64x128xf32>, vector<2x128xf32> -> vector<2x128xf32>
    %122 = arith.addf %116, %121 : vector<2x128xf32>
    %123 = vector.extract_strided_slice %83 {offsets = [0, 1, 2, 0], sizes = [2, 1, 1, 64], strides = [1, 1, 1, 1]} : vector<2x4x4x64xf32> to vector<2x1x1x64xf32>
    %124 = vector.shape_cast %123 : vector<2x1x1x64xf32> to vector<2x64xf32>
    %c6_126 = arith.constant 6 : index
    %c0_127 = arith.constant 0 : index
    %c0_128 = arith.constant 0 : index
    %125 = vector.load %arg6[%c6_126, %c0_127, %c0_128] : memref<16x64x128xf32, #tpu.memory_space<vmem>>, vector<1x64x128xf32>
    %126 = vector.shape_cast %125 : vector<1x64x128xf32> to vector<64x128xf32>
    %cst_129 = arith.constant dense<0.000000e+00> : vector<2x128xf32>
    %127 = tpu.matmul %124, %126, %cst_129 {dimension_numbers = #tpu.dot_dimension_numbers<[1], [0], [0], [1], [0, 0, 1, 1], [], []>} : vector<2x64xf32>, vector<64x128xf32>, vector<2x128xf32> -> vector<2x128xf32>
    %128 = arith.addf %122, %127 : vector<2x128xf32>
    %129 = vector.extract_strided_slice %83 {offsets = [0, 1, 3, 0], sizes = [2, 1, 1, 64], strides = [1, 1, 1, 1]} : vector<2x4x4x64xf32> to vector<2x1x1x64xf32>
    %130 = vector.shape_cast %129 : vector<2x1x1x64xf32> to vector<2x64xf32>
    %c7_130 = arith.constant 7 : index
    %c0_131 = arith.constant 0 : index
    %c0_132 = arith.constant 0 : index
    %131 = vector.load %arg6[%c7_130, %c0_131, %c0_132] : memref<16x64x128xf32, #tpu.memory_space<vmem>>, vector<1x64x128xf32>
    %132 = vector.shape_cast %131 : vector<1x64x128xf32> to vector<64x128xf32>
    %cst_133 = arith.constant dense<0.000000e+00> : vector<2x128xf32>
    %133 = tpu.matmul %130, %132, %cst_133 {dimension_numbers = #tpu.dot_dimension_numbers<[1], [0], [0], [1], [0, 0, 1, 1], [], []>} : vector<2x64xf32>, vector<64x128xf32>, vector<2x128xf32> -> vector<2x128xf32>
    %134 = arith.addf %128, %133 : vector<2x128xf32>
    %135 = vector.extract_strided_slice %83 {offsets = [0, 2, 0, 0], sizes = [2, 1, 1, 64], strides = [1, 1, 1, 1]} : vector<2x4x4x64xf32> to vector<2x1x1x64xf32>
    %136 = vector.shape_cast %135 : vector<2x1x1x64xf32> to vector<2x64xf32>
    %c8_134 = arith.constant 8 : index
    %c0_135 = arith.constant 0 : index
    %c0_136 = arith.constant 0 : index
    %137 = vector.load %arg6[%c8_134, %c0_135, %c0_136] : memref<16x64x128xf32, #tpu.memory_space<vmem>>, vector<1x64x128xf32>
    %138 = vector.shape_cast %137 : vector<1x64x128xf32> to vector<64x128xf32>
    %cst_137 = arith.constant dense<0.000000e+00> : vector<2x128xf32>
    %139 = tpu.matmul %136, %138, %cst_137 {dimension_numbers = #tpu.dot_dimension_numbers<[1], [0], [0], [1], [0, 0, 1, 1], [], []>} : vector<2x64xf32>, vector<64x128xf32>, vector<2x128xf32> -> vector<2x128xf32>
    %140 = arith.addf %134, %139 : vector<2x128xf32>
    %141 = vector.extract_strided_slice %83 {offsets = [0, 2, 1, 0], sizes = [2, 1, 1, 64], strides = [1, 1, 1, 1]} : vector<2x4x4x64xf32> to vector<2x1x1x64xf32>
    %142 = vector.shape_cast %141 : vector<2x1x1x64xf32> to vector<2x64xf32>
    %c9_138 = arith.constant 9 : index
    %c0_139 = arith.constant 0 : index
    %c0_140 = arith.constant 0 : index
    %143 = vector.load %arg6[%c9_138, %c0_139, %c0_140] : memref<16x64x128xf32, #tpu.memory_space<vmem>>, vector<1x64x128xf32>
    %144 = vector.shape_cast %143 : vector<1x64x128xf32> to vector<64x128xf32>
    %cst_141 = arith.constant dense<0.000000e+00> : vector<2x128xf32>
    %145 = tpu.matmul %142, %144, %cst_141 {dimension_numbers = #tpu.dot_dimension_numbers<[1], [0], [0], [1], [0, 0, 1, 1], [], []>} : vector<2x64xf32>, vector<64x128xf32>, vector<2x128xf32> -> vector<2x128xf32>
    %146 = arith.addf %140, %145 : vector<2x128xf32>
    %147 = vector.extract_strided_slice %83 {offsets = [0, 2, 2, 0], sizes = [2, 1, 1, 64], strides = [1, 1, 1, 1]} : vector<2x4x4x64xf32> to vector<2x1x1x64xf32>
    %148 = vector.shape_cast %147 : vector<2x1x1x64xf32> to vector<2x64xf32>
    %c10 = arith.constant 10 : index
    %c0_142 = arith.constant 0 : index
    %c0_143 = arith.constant 0 : index
    %149 = vector.load %arg6[%c10, %c0_142, %c0_143] : memref<16x64x128xf32, #tpu.memory_space<vmem>>, vector<1x64x128xf32>
    %150 = vector.shape_cast %149 : vector<1x64x128xf32> to vector<64x128xf32>
    %cst_144 = arith.constant dense<0.000000e+00> : vector<2x128xf32>
    %151 = tpu.matmul %148, %150, %cst_144 {dimension_numbers = #tpu.dot_dimension_numbers<[1], [0], [0], [1], [0, 0, 1, 1], [], []>} : vector<2x64xf32>, vector<64x128xf32>, vector<2x128xf32> -> vector<2x128xf32>
    %152 = arith.addf %146, %151 : vector<2x128xf32>
    %153 = vector.extract_strided_slice %83 {offsets = [0, 2, 3, 0], sizes = [2, 1, 1, 64], strides = [1, 1, 1, 1]} : vector<2x4x4x64xf32> to vector<2x1x1x64xf32>
    %154 = vector.shape_cast %153 : vector<2x1x1x64xf32> to vector<2x64xf32>
    %c11 = arith.constant 11 : index
    %c0_145 = arith.constant 0 : index
    %c0_146 = arith.constant 0 : index
    %155 = vector.load %arg6[%c11, %c0_145, %c0_146] : memref<16x64x128xf32, #tpu.memory_space<vmem>>, vector<1x64x128xf32>
    %156 = vector.shape_cast %155 : vector<1x64x128xf32> to vector<64x128xf32>
    %cst_147 = arith.constant dense<0.000000e+00> : vector<2x128xf32>
    %157 = tpu.matmul %154, %156, %cst_147 {dimension_numbers = #tpu.dot_dimension_numbers<[1], [0], [0], [1], [0, 0, 1, 1], [], []>} : vector<2x64xf32>, vector<64x128xf32>, vector<2x128xf32> -> vector<2x128xf32>
    %158 = arith.addf %152, %157 : vector<2x128xf32>
    %159 = vector.extract_strided_slice %83 {offsets = [0, 3, 0, 0], sizes = [2, 1, 1, 64], strides = [1, 1, 1, 1]} : vector<2x4x4x64xf32> to vector<2x1x1x64xf32>
    %160 = vector.shape_cast %159 : vector<2x1x1x64xf32> to vector<2x64xf32>
    %c12 = arith.constant 12 : index
    %c0_148 = arith.constant 0 : index
    %c0_149 = arith.constant 0 : index
    %161 = vector.load %arg6[%c12, %c0_148, %c0_149] : memref<16x64x128xf32, #tpu.memory_space<vmem>>, vector<1x64x128xf32>
    %162 = vector.shape_cast %161 : vector<1x64x128xf32> to vector<64x128xf32>
    %cst_150 = arith.constant dense<0.000000e+00> : vector<2x128xf32>
    %163 = tpu.matmul %160, %162, %cst_150 {dimension_numbers = #tpu.dot_dimension_numbers<[1], [0], [0], [1], [0, 0, 1, 1], [], []>} : vector<2x64xf32>, vector<64x128xf32>, vector<2x128xf32> -> vector<2x128xf32>
    %164 = arith.addf %158, %163 : vector<2x128xf32>
    %165 = vector.extract_strided_slice %83 {offsets = [0, 3, 1, 0], sizes = [2, 1, 1, 64], strides = [1, 1, 1, 1]} : vector<2x4x4x64xf32> to vector<2x1x1x64xf32>
    %166 = vector.shape_cast %165 : vector<2x1x1x64xf32> to vector<2x64xf32>
    %c13 = arith.constant 13 : index
    %c0_151 = arith.constant 0 : index
    %c0_152 = arith.constant 0 : index
    %167 = vector.load %arg6[%c13, %c0_151, %c0_152] : memref<16x64x128xf32, #tpu.memory_space<vmem>>, vector<1x64x128xf32>
    %168 = vector.shape_cast %167 : vector<1x64x128xf32> to vector<64x128xf32>
    %cst_153 = arith.constant dense<0.000000e+00> : vector<2x128xf32>
    %169 = tpu.matmul %166, %168, %cst_153 {dimension_numbers = #tpu.dot_dimension_numbers<[1], [0], [0], [1], [0, 0, 1, 1], [], []>} : vector<2x64xf32>, vector<64x128xf32>, vector<2x128xf32> -> vector<2x128xf32>
    %170 = arith.addf %164, %169 : vector<2x128xf32>
    %171 = vector.extract_strided_slice %83 {offsets = [0, 3, 2, 0], sizes = [2, 1, 1, 64], strides = [1, 1, 1, 1]} : vector<2x4x4x64xf32> to vector<2x1x1x64xf32>
    %172 = vector.shape_cast %171 : vector<2x1x1x64xf32> to vector<2x64xf32>
    %c14 = arith.constant 14 : index
    %c0_154 = arith.constant 0 : index
    %c0_155 = arith.constant 0 : index
    %173 = vector.load %arg6[%c14, %c0_154, %c0_155] : memref<16x64x128xf32, #tpu.memory_space<vmem>>, vector<1x64x128xf32>
    %174 = vector.shape_cast %173 : vector<1x64x128xf32> to vector<64x128xf32>
    %cst_156 = arith.constant dense<0.000000e+00> : vector<2x128xf32>
    %175 = tpu.matmul %172, %174, %cst_156 {dimension_numbers = #tpu.dot_dimension_numbers<[1], [0], [0], [1], [0, 0, 1, 1], [], []>} : vector<2x64xf32>, vector<64x128xf32>, vector<2x128xf32> -> vector<2x128xf32>
    %176 = arith.addf %170, %175 : vector<2x128xf32>
    %177 = vector.extract_strided_slice %83 {offsets = [0, 3, 3, 0], sizes = [2, 1, 1, 64], strides = [1, 1, 1, 1]} : vector<2x4x4x64xf32> to vector<2x1x1x64xf32>
    %178 = vector.shape_cast %177 : vector<2x1x1x64xf32> to vector<2x64xf32>
    %c15 = arith.constant 15 : index
    %c0_157 = arith.constant 0 : index
    %c0_158 = arith.constant 0 : index
    %179 = vector.load %arg6[%c15, %c0_157, %c0_158] : memref<16x64x128xf32, #tpu.memory_space<vmem>>, vector<1x64x128xf32>
    %180 = vector.shape_cast %179 : vector<1x64x128xf32> to vector<64x128xf32>
    %cst_159 = arith.constant dense<0.000000e+00> : vector<2x128xf32>
    %181 = tpu.matmul %178, %180, %cst_159 {dimension_numbers = #tpu.dot_dimension_numbers<[1], [0], [0], [1], [0, 0, 1, 1], [], []>} : vector<2x64xf32>, vector<64x128xf32>, vector<2x128xf32> -> vector<2x128xf32>
    %182 = arith.addf %176, %181 : vector<2x128xf32>
    %cst_160 = arith.constant 0.000000e+00 : f32
    %183 = vector.broadcast %cst_160 : f32 to vector<2x128xf32>
    %184 = arith.maximumf %182, %183 : vector<2x128xf32>
    %c0_161 = arith.constant 0 : index
    %c0_162 = arith.constant 0 : index
    %185 = vector.load %arg8[%c0_161, %c0_162] : memref<128x128xf32, #tpu.memory_space<vmem>>, vector<128x128xf32>
    %cst_163 = arith.constant dense<0.000000e+00> : vector<2x128xf32>
    %186 = tpu.matmul %184, %185, %cst_163 {dimension_numbers = #tpu.dot_dimension_numbers<[1], [0], [0], [1], [0, 0, 1, 1], [], []>} : vector<2x128xf32>, vector<128x128xf32>, vector<2x128xf32> -> vector<2x128xf32>
    %c0_164 = arith.constant 0 : index
    %c0_165 = arith.constant 0 : index
    %187 = vector.load %arg9[%c0_164, %c0_165] : memref<1x128xf32, #tpu.memory_space<vmem>>, vector<1x128xf32>
    %188 = vector.broadcast %187 : vector<1x128xf32> to vector<2x128xf32>
    %189 = arith.addf %186, %188 : vector<2x128xf32>
    %c0_166 = arith.constant 0 : index
    %c0_167 = arith.constant 0 : index
    %190 = vector.load %arg10[%c0_166, %c0_167] : memref<2x128xf32, #tpu.memory_space<vmem>>, vector<2x128xf32>
    tpu.vector_store %arg10[%c0_166, %c0_167], %189 {strides = array<i32>} : memref<2x128xf32, #tpu.memory_space<vmem>>, vector<2x128xf32>,
    return
  }
  func.func @transform_0(%arg0: i32) -> (i32, i32) {
    %c0_i32 = arith.constant 0 : i32
    %c0_i32_0 = arith.constant 0 : i32
    return %arg0, %c0_i32 : i32, i32
  }
  func.func @transform_1(%arg0: i32) -> (i32, i32) {
    %c0_i32 = arith.constant 0 : i32
    %c0_i32_0 = arith.constant 0 : i32
    %c0_i32_1 = arith.constant 0 : i32
    return %c0_i32, %c0_i32_0 : i32, i32
  }
  func.func @transform_2(%arg0: i32) -> (i32, i32) {
    %c0_i32 = arith.constant 0 : i32
    %c0_i32_0 = arith.constant 0 : i32
    %c0_i32_1 = arith.constant 0 : i32
    return %c0_i32, %c0_i32_0 : i32, i32
  }
  func.func @transform_3(%arg0: i32) -> (i32, i32, i32) {
    %c0_i32 = arith.constant 0 : i32
    %c0_i32_0 = arith.constant 0 : i32
    %c0_i32_1 = arith.constant 0 : i32
    %c0_i32_2 = arith.constant 0 : i32
    return %c0_i32, %c0_i32_0, %c0_i32_1 : i32, i32, i32
  }
  func.func @transform_4(%arg0: i32) -> (i32, i32) {
    %c0_i32 = arith.constant 0 : i32
    %c0_i32_0 = arith.constant 0 : i32
    %c0_i32_1 = arith.constant 0 : i32
    return %c0_i32, %c0_i32_0 : i32, i32
  }
  func.func @transform_5(%arg0: i32) -> (i32, i32, i32) {
    %c0_i32 = arith.constant 0 : i32
    %c0_i32_0 = arith.constant 0 : i32
    %c0_i32_1 = arith.constant 0 : i32
    %c0_i32_2 = arith.constant 0 : i32
    return %c0_i32, %c0_i32_0, %c0_i32_1 : i32, i32, i32
  }
  func.func @transform_6(%arg0: i32) -> (i32, i32) {
    %c0_i32 = arith.constant 0 : i32
    %c0_i32_0 = arith.constant 0 : i32
    %c0_i32_1 = arith.constant 0 : i32
    return %c0_i32, %c0_i32_0 : i32, i32
  }
  func.func @transform_7(%arg0: i32) -> (i32, i32) {
    %c0_i32 = arith.constant 0 : i32
    %c0_i32_0 = arith.constant 0 : i32
    %c0_i32_1 = arith.constant 0 : i32
    return %c0_i32, %c0_i32_0 : i32, i32
  }
  func.func @transform_8(%arg0: i32) -> (i32, i32) {
    %c0_i32 = arith.constant 0 : i32
    %c0_i32_0 = arith.constant 0 : i32
    %c0_i32_1 = arith.constant 0 : i32
    return %c0_i32, %c0_i32_0 : i32, i32
  }
  func.func @transform_9(%arg0: i32) -> (i32, i32) {
    %c0_i32 = arith.constant 0 : i32
    %c0_i32_0 = arith.constant 0 : i32
    return %arg0, %c0_i32 : i32, i32
  }
}

</mosaic_0001>

<bundles_post_ra>
// kernel: simple_cnn_forward.1
= control target key start
LH: loop header
LB: loop body
LE: loop exit
PB: predicated region body
PF: predicated region fallthrough
CT: control target
= control target key end

     0   :  { %vm299_vm0 = vcmask 1040384   ;;  %vm8796_vm1 = vmmov 1   ;;  %vm106_vm3 = vcmask 72704   ;;  %s11494_s0 = inlined_call_operand.vmem [shape: f32[512,9], index: 0, kind: input, shape index: {}]   ;;  %s11495_s1 = inlined_call_operand.vmem [shape: f32[9,32], index: 1, kind: input, shape index: {}]   ;;  %s11496_s2 = inlined_call_operand.vmem [shape: f32[1,32], index: 2, kind: input, shape index: {}]   ;;  %s11497_s3 = inlined_call_operand.vmem [shape: f32[9,32,64], index: 3, kind: input, shape index: {}]   ;;  %s11498_s4 = inlined_call_operand.vmem [shape: f32[1,64], index: 4, kind: input, shape index: {}]   ;;  %s11499_s5 = inlined_call_operand.vmem [shape: f32[16,64,128], index: 5, kind: input, shape index: {}]   ;;  %s11500_s6 = inlined_call_operand.vmem [shape: f32[1,128], index: 6, kind: input, shape index: {}]   ;;  %s11501_s7 = inlined_call_operand.vmem [shape: f32[128,128], index: 7, kind: input, shape index: {}]   ;;  %s11502_s8 = inlined_call_operand.vmem [shape: f32[1,128], index: 8, kind: input, shape index: {}]   ;;  %s11503_s9 = inlined_call_operand.hbm [shape: f32[2,128], index: 9, kind: output, shape index: {}]  }
   0x1   :  { %v97_v0 = vld [vmem:[%s11495_s1] sm:$0xff]  ;;  %v98_v1 = vld [vmem:[%s11495_s1 + $0x8] sm:$0x1]  ;;  %vm8290_vm2 = vmpackc.low %vm299_vm0, %vm8796_vm1 }
   0x2   :  { %v33_v2 = vld [vmem:[%s11494_s0] sm:$0xff]  ;;  %v8289_v3 = vpack.c.bf16 %v98_v1, %v97_v0  ;;  %v34_v4 = vld [vmem:[%s11494_s0 + $0x8] sm:$0xff]  ;;  %v35_v5 = vld [vmem:[%s11494_s0 + $0x10] sm:$0xff] }
   0x3   :  { %7566 = vmatprep.mubr.msk.f32.mxu0 %vm106_vm3, %v33_v2  ;;  %v36_v6 = vld [vmem:[%s11494_s0 + $0x18] sm:$0xff]  ;;  %v37_v7 = vld [vmem:[%s11494_s0 + $0x20] sm:$0xff]  ;;  %v78_v9 = vld [vmem:[%s11494_s0 + $0x168] sm:$0xff] }
   0x4   :  { %8291 = vmatprep.subr.msk.bf16.mxu0 %vm8290_vm2, %v8289_v3  ;;  %8583 = vmatprep.subr.msk.bf16.mxu1 %vm8290_vm2, %v8289_v3  ;;  %v77_v8 = vld [vmem:[%s11494_s0 + $0x160] sm:$0xff]  ;;  %v79_v10 = vld [vmem:[%s11494_s0 + $0x170] sm:$0xff]  ;;  %v38_v11 = vld [vmem:[%s11494_s0 + $0x28] sm:$0xff] }
   0x5   :  { %8294 = vmatpush3.bf16.msk.msra.mxu0 %vm8290_vm2, %v8289_v3  ;;  %8584 = vmatpush3.bf16.msk.msra.mxu1 %vm8290_vm2, %v8289_v3  ;;  %v80_v12 = vld [vmem:[%s11494_s0 + $0x178] sm:$0xff]  ;;  %v39_v13 = vld [vmem:[%s11494_s0 + $0x30] sm:$0xff]  ;;  %v81_v14 = vld [vmem:[%s11494_s0 + $0x180] sm:$0xff] }
   0x6   :  { %7632 = vmatprep.mubr.msk.f32.mxu1 %vm106_vm3, %v77_v8  ;;  %v40_v15 = vld [vmem:[%s11494_s0 + $0x38] sm:$0xff]  ;;  %v82_v16 = vld [vmem:[%s11494_s0 + $0x188] sm:$0xff]  ;;  %v41_v17 = vld [vmem:[%s11494_s0 + $0x40] sm:$0xff] }
   0x7   :  { %v83_v18 = vld [vmem:[%s11494_s0 + $0x190] sm:$0xff]  ;;  %v42_v19 = vld [vmem:[%s11494_s0 + $0x48] sm:$0xff]  ;;  %v84_v20 = vld [vmem:[%s11494_s0 + $0x198] sm:$0xff] }
   0x8   :  { %7567 = vmatmul.mubr.msk.f32.vlgmr.msra.gmra.mrb[0].mxu0 %vm106_vm3, %v34_v4  ;;  %7633 = vmatmul.mubr.msk.f32.vlgmr.msra.gmra.mrb[0].mxu1 %vm106_vm3, %v78_v9  ;;  %v43_v21 = vld [vmem:[%s11494_s0 + $0x50] sm:$0xff]  ;;  %v85_v22 = vld [vmem:[%s11494_s0 + $0x1a0] sm:$0xff] }
   0x9   :  { %7569 = vmatprep.mubr.msk.f32.mxu0 %vm106_vm3, %v35_v5  ;;  %7635 = vmatprep.mubr.msk.f32.mxu1 %vm106_vm3, %v79_v10 }
   0xc   :  { %7570 = vmatmul.mubr.msk.f32.gmra.mrb[2].mxu0 %vm106_vm3, %v36_v6  ;;  %7636 = vmatmul.mubr.msk.f32.gmra.mrb[2].mxu1 %vm106_vm3, %v80_v12 }
   0xd   :  { %7572 = vmatprep.mubr.msk.f32.mxu0 %vm106_vm3, %v37_v7  ;;  %7638 = vmatprep.mubr.msk.f32.mxu1 %vm106_vm3, %v81_v14 }
  0x10   :  { %7573 = vmatmul.mubr.msk.f32.gmra.mrb[4].mxu0 %vm106_vm3, %v38_v11  ;;  %7639 = vmatmul.mubr.msk.f32.gmra.mrb[4].mxu1 %vm106_vm3, %v82_v16 }
  0x11   :  { %7575 = vmatprep.mubr.msk.f32.mxu0 %vm106_vm3, %v39_v13  ;;  %7641 = vmatprep.mubr.msk.f32.mxu1 %vm106_vm3, %v83_v18 }
  0x14   :  { %7576 = vmatmul.mubr.msk.f32.gmra.mrb[6].mxu0 %vm106_vm3, %v40_v15 }
  0x15   :  { %7578 = vmatprep.mubr.msk.f32.mxu0 %vm106_vm3, %v41_v17 }
  0x16   :  { %14 = vsyncpa [#allocation4], 0  ;;  %7642 = vmatmul.mubr.msk.f32.gmra.mrb[6].mxu1 %vm106_vm3, %v84_v20  ;;  %v44_v23 = vld [vmem:[%s11494_s0 + $0x58] sm:$0xff]  ;;  %v86_v24 = vld [vmem:[%s11494_s0 + $0x1a8] sm:$0xff]  ;;  %vm752_vm4 = vcmask 261120   ;;  %vm1553_vm5 = vcmask 254976   ;;  %v885_v15 = vlaneseq }
  0x17   :  { %7644 = vmatprep.mubr.msk.f32.mxu1 %vm106_vm3, %v85_v22  ;;  %v45_v25 = vld [vmem:[%s11494_s0 + $0x60] sm:$0xff]  ;;  %v87_v26 = vld [vmem:[%s11494_s0 + $0x1b0] sm:$0xff]  ;;  %v46_v27 = vld [vmem:[%s11494_s0 + $0x68] sm:$0xff]  ;;  %v11504_v9 = vmov 0.0   ;;  %vm2459_vm6 = vcmask 253952   ;;  %vm2628_vm7 = vcmask 1041409  }
  0x18   :  { %7579 = vmatmul.mubr.msk.f32.gmra.mrb[8].mxu0 %vm106_vm3, %v42_v19  ;;  %v88_v28 = vld [vmem:[%s11494_s0 + $0x1b8] sm:$0xff]  ;;  %v47_v29 = vld [vmem:[%s11494_s0 + $0x70] sm:$0xff]  ;;  %v89_v30 = vld [vmem:[%s11494_s0 + $0x1c0] sm:$0xff]  ;;  %2450 = vst.msk [vmem:[#allocation2] sm:$0xff] %vm752_vm4, %v11504_v9  ;;  %v8798_v13 = vmov 1983009808  }
  0x19   :  { %7581 = vmatprep.mubr.msk.f32.mxu0 %vm106_vm3, %v43_v21  ;;  %v48_v31 = vld [vmem:[%s11494_s0 + $0x78] sm:$0xff]  ;;  %v90_v32 = vld [vmem:[%s11494_s0 + $0x1c8] sm:$0xff]  ;;  %v49_v33 = vld [vmem:[%s11494_s0 + $0x80] sm:$0xff]  ;;  %2451 = vst.msk [vmem:[#allocation2 + $0x8] sm:$0x3] %vm1553_vm5, %v11504_v9  ;;  %v883_v14 = vunpack.c.l.s4 %v8798_v13  ;;  %v886_v21 = vshrl.u32 %v885_v15, 7 }
  0x1a   :  { %7645 = vmatmul.mubr.msk.f32.gmra.mrb[8].mxu1 %vm106_vm3, %v86_v24  ;;  %v91_v34 = vld [vmem:[%s11494_s0 + $0x1d0] sm:$0xff]  ;;  %v50_v35 = vld [vmem:[%s11494_s0 + $0x88] sm:$0xff]  ;;  %v92_v36 = vld [vmem:[%s11494_s0 + $0x1d8] sm:$0xff]  ;;  %2452 = vst.msk [vmem:[#allocation2 + $0xa0] sm:$0xff] %vm752_vm4, %v11504_v9  ;;  %vm2630_vm8 = vcmask 1042434   ;;  %vm2632_vm9 = vcmask 1043459  }
  0x1b   :  { %7647 = vmatprep.mubr.msk.f32.mxu1 %vm106_vm3, %v87_v26  ;;  %v51_v37 = vld [vmem:[%s11494_s0 + $0x90] sm:$0xff]  ;;  %v93_v38 = vld [vmem:[%s11494_s0 + $0x1e0] sm:$0xff]  ;;  %v52_v39 = vld [vmem:[%s11494_s0 + $0x98] sm:$0xff]  ;;  %2453 = vst.msk [vmem:[#allocation2 + $0xa8] sm:$0x3] %vm1553_vm5, %v11504_v9  ;;  %v884_v20 = vunpack.c.0.s8 %v883_v14  ;;  %vm2634_vm10 = vcmask 1044484  }
  0x1c   :  { %7582 = vmatmul.mubr.msk.f32.gmra.mrb[10].mxu0 %vm106_vm3, %v44_v23  ;;  %v94_v40 = vld [vmem:[%s11494_s0 + $0x1e8] sm:$0xff]  ;;  %v53_v41 = vld [vmem:[%s11494_s0 + $0xa0] sm:$0xff]  ;;  %v95_v42 = vld [vmem:[%s11494_s0 + $0x1f0] sm:$0xff]  ;;  %2455 = vst.msk [vmem:[#allocation2 + $0x90] sm:$0xff] %vm752_vm4, %v11504_v9  ;;  %vm2636_vm11 = vcmask 1045509   ;;  %vm2638_vm12 = vcmask 1046534  }
  0x1d   :  { %7584 = vmatprep.mubr.msk.f32.mxu0 %vm106_vm3, %v45_v25  ;;  %v54_v43 = vld [vmem:[%s11494_s0 + $0xa8] sm:$0xff]  ;;  %v96_v44 = vld [vmem:[%s11494_s0 + $0x1f8] sm:$0xff]  ;;  %v55_v45 = vld [vmem:[%s11494_s0 + $0xb0] sm:$0xff]  ;;  %2456 = vst.msk [vmem:[#allocation2 + $0x98] sm:$0x3] %vm1553_vm5, %v11504_v9  ;;  %vm2640_vm13 = vcmask 1047559  }
  0x1e   :  { %7648 = vmatmul.mubr.msk.f32.gmra.mrb[10].mxu1 %vm106_vm3, %v88_v28  ;;  %v56_v46 = vld [vmem:[%s11494_s0 + $0xb8] sm:$0xff]  ;;  %v57_v47 = vld [vmem:[%s11494_s0 + $0xc0] sm:$0xff]  ;;  %v58_v48 = vld [vmem:[%s11494_s0 + $0xc8] sm:$0xff]  ;;  %2457 = vst.msk [vmem:[#allocation2 + $0x130] sm:$0xff] %vm752_vm4, %v11504_v9  ;;  %vm8800_vm14 = vmmov 0   ;;  %vm4873_vm15 = vcmask 523264  }
  0x1f   :  { %7650 = vmatprep.mubr.msk.f32.mxu1 %vm106_vm3, %v89_v30  ;;  %v59_v49 = vld [vmem:[%s11494_s0 + $0xd0] sm:$0xff]  ;;  %v60_v50 = vld [vmem:[%s11494_s0 + $0xd8] sm:$0xff]  ;;  %v61_v51 = vld [vmem:[%s11494_s0 + $0xe0] sm:$0xff]  ;;  %2458 = vst.msk [vmem:[#allocation2 + $0x138] sm:$0x3] %vm1553_vm5, %v11504_v9  ;;  %vm5074_vm0 = vcmask 517120  }
  0x20   :  { %7585 = vmatmul.mubr.msk.f32.gmra.mrb[12].mxu0 %vm106_vm3, %v46_v27  ;;  %v62_v52 = vld [vmem:[%s11494_s0 + $0xe8] sm:$0xff]  ;;  %v63_v53 = vld [vmem:[%s11494_s0 + $0xf0] sm:$0xff]  ;;  %v64_v54 = vld [vmem:[%s11494_s0 + $0xf8] sm:$0xff]  ;;  %2460 = vst.msk [vmem:[#allocation2] sm:$0x1] %vm2459_vm6, %v11504_v9  ;;  %s8801_s20 = smov [#allocation3]  }
  0x21   :  { %7587 = vmatprep.mubr.msk.f32.mxu0 %vm106_vm3, %v47_v29  ;;  %v65_v55 = vld [vmem:[%s11494_s0 + $0x100] sm:$0xff]  ;;  %v66_v56 = vld [vmem:[%s11494_s0 + $0x108] sm:$0xff]  ;;  %v67_v57 = vld [vmem:[%s11494_s0 + $0x110] sm:$0xff]  ;;  %2461 = vst.msk [vmem:[#allocation2 + $0x10] sm:$0x1] %vm2459_vm6, %v11504_v9 }
  0x22   :  { %7651 = vmatmul.mubr.msk.f32.gmra.mrb[12].mxu1 %vm106_vm3, %v90_v32  ;;  %v68_v58 = vld [vmem:[%s11494_s0 + $0x118] sm:$0xff]  ;;  %v69_v59 = vld [vmem:[%s11494_s0 + $0x120] sm:$0xff]  ;;  %v70_v60 = vld [vmem:[%s11494_s0 + $0x128] sm:$0xff]  ;;  %2462 = vst.msk [vmem:[#allocation2 + $0x20] sm:$0x1] %vm2459_vm6, %v11504_v9 }
  0x23   :  { %7653 = vmatprep.mubr.msk.f32.mxu1 %vm106_vm3, %v91_v34  ;;  %v71_v61 = vld [vmem:[%s11494_s0 + $0x130] sm:$0xff]  ;;  %v72_v62 = vld [vmem:[%s11494_s0 + $0x138] sm:$0xff]  ;;  %v73_v63 = vld [vmem:[%s11494_s0 + $0x140] sm:$0xff]  ;;  %2463 = vst.msk [vmem:[#allocation2 + $0x30] sm:$0x1] %vm2459_vm6, %v11504_v9 }
  0x24   :  { %7588 = vmatmul.mubr.msk.f32.gmra.mrb[14].mxu0 %vm106_vm3, %v48_v31  ;;  %v74_v0 = vld [vmem:[%s11494_s0 + $0x148] sm:$0xff]  ;;  %v75_v1 = vld [vmem:[%s11494_s0 + $0x150] sm:$0xff]  ;;  %v76_v2 = vld [vmem:[%s11494_s0 + $0x158] sm:$0xff]  ;;  %2464 = vst.msk [vmem:[#allocation2 + $0x40] sm:$0x1] %vm2459_vm6, %v11504_v9  ;;  %v9233_v31 = vsub.s32 %v884_v20, %v886_v21 }
  0x25   :  { %7590 = vmatprep.mubr.msk.f32.mxu0 %vm106_vm3, %v49_v33  ;;  %v2803_v3 = vld [vmem:[%s11497_s3] sm:$0xff]  ;;  %v2804_v4 = vld [vmem:[%s11497_s3 + $0x8] sm:$0xff]  ;;  %v2805_v6 = vld [vmem:[%s11497_s3 + $0x10] sm:$0xff]  ;;  %2465 = vst.msk [vmem:[#allocation2 + $0x50] sm:$0x1] %vm2459_vm6, %v11504_v9 }
  0x26   :  { %7654 = vmatmul.mubr.msk.f32.gmra.mrb[14].mxu1 %vm106_vm3, %v92_v36  ;;  %v8295_v5 = vpack.c.bf16 %v2804_v4, %v2803_v3  ;;  %v2806_v7 = vld [vmem:[%s11497_s3 + $0x18] sm:$0xff]  ;;  %2466 = vst.msk [vmem:[#allocation2 + $0x60] sm:$0x1] %vm2459_vm6, %v11504_v9  ;;  %2467 = vst.msk [vmem:[#allocation2 + $0x70] sm:$0x1] %vm2459_vm6, %v11504_v9 }
  0x27   :  { %7656 = vmatprep.mubr.msk.f32.mxu1 %vm106_vm3, %v93_v38  ;;  %v8299_v8 = vpack.c.bf16 %v2806_v7, %v2805_v6  ;;  %2468 = vst.msk [vmem:[#allocation2 + $0x80] sm:$0x1] %vm2459_vm6, %v11504_v9  ;;  %2471 = vst.msk [vmem:[#allocation2 + $0xb0] sm:$0x1] %vm2459_vm6, %v11504_v9  ;;  %v2787_v10 = vld [vmem:[#allocation2] sm:$0xff] }
  0x28   :  { %7591 = vmatmul.mubr.msk.f32.gmra.mrb[16].mxu0 %vm106_vm3, %v50_v35  ;;  %8296 = vmatprep.subr.bf16.mxu1 %v8295_v5  ;;  %2472 = vst.msk [vmem:[#allocation2 + $0xc0] sm:$0x1] %vm2459_vm6, %v11504_v9  ;;  %2473 = vst.msk [vmem:[#allocation2 + $0xd0] sm:$0x1] %vm2459_vm6, %v11504_v9  ;;  %v9226_v11 = vld [vmem:[%s11496_s2] ss:$0 sm:$0xff] }
  0x29   :  { %7593 = vmatprep.mubr.msk.f32.mxu0 %vm106_vm3, %v51_v37  ;;  %8298 = vmatpush3.bf16.msra.mxu1 %v8295_v5  ;;  %2474 = vst.msk [vmem:[#allocation2 + $0xe0] sm:$0x1] %vm2459_vm6, %v11504_v9  ;;  %2475 = vst.msk [vmem:[#allocation2 + $0xf0] sm:$0x1] %vm2459_vm6, %v11504_v9 }
  0x2a   :  { %7657 = vmatmul.mubr.msk.f32.gmra.mrb[16].mxu1 %vm106_vm3, %v94_v40  ;;  %8300 = vmatprep.subr.bf16.mxu1 %v8299_v8  ;;  %2476 = vst.msk [vmem:[#allocation2 + $0x100] sm:$0x1] %vm2459_vm6, %v11504_v9  ;;  %2477 = vst.msk [vmem:[#allocation2 + $0x110] sm:$0x1] %vm2459_vm6, %v11504_v9 }
  0x2b   :  { %7659 = vmatprep.mubr.msk.f32.mxu1 %vm106_vm3, %v95_v42  ;;  %2478 = vst.msk [vmem:[#allocation2 + $0x120] sm:$0x1] %vm2459_vm6, %v11504_v9  ;;  %2481 = vst.msk [vmem:[#allocation2 + $0x19] sm:$0x1] %vm2459_vm6, %v11504_v9 }
  0x2c   :  { %7594 = vmatmul.mubr.msk.f32.gmra.mrb[18].mxu0 %vm106_vm3, %v52_v39  ;;  %2482 = vst.msk [vmem:[#allocation2 + $0x29] sm:$0x1] %vm2459_vm6, %v11504_v9  ;;  %2483 = vst.msk [vmem:[#allocation2 + $0x39] sm:$0x1] %vm2459_vm6, %v11504_v9 }
  0x2d   :  { %7596 = vmatprep.mubr.msk.f32.mxu0 %vm106_vm3, %v53_v41  ;;  %8302 = vmatpush3.bf16.msra.mxu1 %v8299_v8  ;;  %2484 = vst.msk [vmem:[#allocation2 + $0x49] sm:$0x1] %vm2459_vm6, %v11504_v9  ;;  %2485 = vst.msk [vmem:[#allocation2 + $0x59] sm:$0x1] %vm2459_vm6, %v11504_v9 }
  0x2e   :  { %7660 = vmatmul.mubr.msk.f32.gmra.mrb[18].mxu1 %vm106_vm3, %v96_v44  ;;  %2486 = vst.msk [vmem:[#allocation2 + $0x69] sm:$0x1] %vm2459_vm6, %v11504_v9  ;;  %2487 = vst.msk [vmem:[#allocation2 + $0x79] sm:$0x1] %vm2459_vm6, %v11504_v9 }
  0x2f   :  { %2488 = vst.msk [vmem:[#allocation2 + $0x89] sm:$0x1] %vm2459_vm6, %v11504_v9  ;;  %2491 = vst.msk [vmem:[#allocation2 + $0xb9] sm:$0x1] %vm2459_vm6, %v11504_v9  ;;  %7670 = vmatprep.mubr.msk.f32.mxu1 %vm752_vm4, %v2787_v10 }
  0x30   :  { %7597 = vmatmul.mubr.msk.f32.gmra.mrb[20].mxu0 %vm106_vm3, %v54_v43  ;;  %2492 = vst.msk [vmem:[#allocation2 + $0xc9] sm:$0x1] %vm2459_vm6, %v11504_v9  ;;  %2493 = vst.msk [vmem:[#allocation2 + $0xd9] sm:$0x1] %vm2459_vm6, %v11504_v9 }
  0x31   :  { %7599 = vmatprep.mubr.msk.f32.mxu0 %vm106_vm3, %v55_v45  ;;  %2494 = vst.msk [vmem:[#allocation2 + $0xe9] sm:$0x1] %vm2459_vm6, %v11504_v9  ;;  %2495 = vst.msk [vmem:[#allocation2 + $0xf9] sm:$0x1] %vm2459_vm6, %v11504_v9 }
  0x32   :  { %2496 = vst.msk [vmem:[#allocation2 + $0x109] sm:$0x1] %vm2459_vm6, %v11504_v9  ;;  %2497 = vst.msk [vmem:[#allocation2 + $0x119] sm:$0x1] %vm2459_vm6, %v11504_v9 }
  0x33   :  { %2498 = vst.msk [vmem:[#allocation2 + $0x129] sm:$0x1] %vm2459_vm6, %v11504_v9  ;;  %2469 = vst.msk [vmem:[#allocation2 + $0x90] sm:$0x1] %vm2459_vm6, %v11504_v9 }
  0x34   :  { %7600 = vmatmul.mubr.msk.f32.gmra.mrb[22].mxu0 %vm106_vm3, %v56_v46  ;;  %2470 = vst.msk [vmem:[#allocation2 + $0xa0] sm:$0x1] %vm2459_vm6, %v11504_v9  ;;  %2479 = vst.msk [vmem:[#allocation2 + $0x130] sm:$0x1] %vm2459_vm6, %v11504_v9 }
  0x35   :  { %7602 = vmatprep.mubr.msk.f32.mxu0 %vm106_vm3, %v57_v47  ;;  %2480 = vst.msk [vmem:[#allocation2 + $0x9] sm:$0x1] %vm2459_vm6, %v11504_v9  ;;  %2489 = vst.msk [vmem:[#allocation2 + $0x99] sm:$0x1] %vm2459_vm6, %v11504_v9 }
  0x36   :  { %2490 = vst.msk [vmem:[#allocation2 + $0xa9] sm:$0x1] %vm2459_vm6, %v11504_v9  ;;  %2499 = vst.msk [vmem:[#allocation2 + $0x139] sm:$0x1] %vm2459_vm6, %v11504_v9 }
  0x38   :  { %7603 = vmatmul.mubr.msk.f32.gmra.mrb[24].mxu0 %vm106_vm3, %v58_v48 }
  0x39   :  { %7605 = vmatprep.mubr.msk.f32.mxu0 %vm106_vm3, %v59_v49 }
  0x3c   :  { %7606 = vmatmul.mubr.msk.f32.gmra.mrb[26].mxu0 %vm106_vm3, %v60_v50 }
  0x3d   :  { %7608 = vmatprep.mubr.msk.f32.mxu0 %vm106_vm3, %v61_v51 }
  0x40   :  { %7609 = vmatmul.mubr.msk.f32.gmra.mrb[28].mxu0 %vm106_vm3, %v62_v52 }
  0x41   :  { %7611 = vmatprep.mubr.msk.f32.mxu0 %vm106_vm3, %v63_v53 }
  0x44   :  { %7612 = vmatmul.mubr.msk.f32.gmra.mrb[30].mxu0 %vm106_vm3, %v64_v54 }
  0x45   :  { %7614 = vmatprep.mubr.msk.f32.mxu0 %vm106_vm3, %v65_v55 }
  0x48   :  { %7615 = vmatmul.mubr.msk.f32.gmra.mrb[32].mxu0 %vm106_vm3, %v66_v56 }
  0x49   :  { %7617 = vmatprep.mubr.msk.f32.mxu0 %vm106_vm3, %v67_v57 }
  0x4c   :  { %7618 = vmatmul.mubr.msk.f32.gmra.mrb[34].mxu0 %vm106_vm3, %v68_v58 }
  0x4d   :  { %7620 = vmatprep.mubr.msk.f32.mxu0 %vm106_vm3, %v69_v59 }
  0x50   :  { %7621 = vmatmul.mubr.msk.f32.gmra.mrb[36].mxu0 %vm106_vm3, %v70_v60 }
  0x51   :  { %7623 = vmatprep.mubr.msk.f32.mxu0 %vm106_vm3, %v71_v61 }
  0x54   :  { %7624 = vmatmul.mubr.msk.f32.gmra.mrb[38].mxu0 %vm106_vm3, %v72_v62 }
  0x55   :  { %7626 = vmatprep.mubr.msk.f32.mxu0 %vm106_vm3, %v73_v63 }
  0x58   :  { %7627 = vmatmul.mubr.msk.f32.gmra.mrb[40].mxu0 %vm106_vm3, %v74_v0 }
  0x59   :  { %7629 = vmatprep.mubr.msk.f32.mxu0 %vm106_vm3, %v75_v1 }
  0x5c   :  { %7630 = vmatmul.mubr.msk.f32.gmra.mrb[42].mxu0 %vm106_vm3, %v76_v2 }
  0xdb   :  { %v7568_v12 = vpop.f32.mrb[0].mxu0  ;;  %v7634_v22 = vpop.f32.mrb[0].mxu1 }
  0xdc   :  { %v375_v16 = vadd.f32 %v7568_v12, %v9226_v11  ;;  %v369_v17 = vpop.f32.mrb[1].mxu0  ;;  %v589_v27 = vpop.f32.mrb[1].mxu1  ;;  %v9244_v44 = vadd.f32 %v7634_v22, %v9226_v11 }
  0xdd   :  { %v370_v18 = vadd.f32 %v9226_v11, %v369_v17  ;;  %v590_v29 = vadd.f32 %v9226_v11, %v589_v27 }
  0xde   :  { %v689_v23 = vmax.f32 %v375_v16, 0.0  ;;  %v733_v52 = vmax.f32 %v9244_v44, 0.0 }
  0xdf   :  { %v7571_v19 = vpop.f32.mrb[2].mxu0  ;;  %v688_v24 = vmax.f32 %v370_v18, 0.0  ;;  %v732_v34 = vmax.f32 %v590_v29, 0.0  ;;  %v9235_v35 = vpop.f32.mrb[2].mxu1 }
  0xe0   :  { %v385_v25 = vadd.f32 %v7571_v19, %v9226_v11  ;;  %v379_v26 = vpop.f32.mrb[3].mxu0  ;;  %v756_v36 = vsel %vm752_vm4, %v689_v23, -inf }
  0xe1   :  { %v380_v28 = vadd.f32 %v9226_v11, %v379_v26  ;;  %v753_v37 = vsel %vm752_vm4, %v688_v24, -inf  ;;  %v9247_v47 = vsel %vm752_vm4, %v732_v34, -inf }
  0xe2   :  { %v691_v30 = vmax.f32 %v385_v25, 0.0 }
  0xe3   :  { %v690_v32 = vmax.f32 %v380_v28, 0.0  ;;  %v7574_v33 = vpop.f32.mrb[4].mxu0 }
  0xe4   :  { %v757_v38 = vsel %vm752_vm4, %v691_v30, -inf  ;;  %v395_v39 = vadd.f32 %v7574_v33, %v9226_v11  ;;  %v389_v40 = vpop.f32.mrb[5].mxu0 }
  0xe5   :  { %v758_v41 = vmax.f32 %v756_v36, %v757_v38  ;;  %v754_v42 = vsel %vm752_vm4, %v690_v32, -inf  ;;  %v390_v43 = vadd.f32 %v9226_v11, %v389_v40 }
  0xe6   :  { %v755_v45 = vmax.f32 %v753_v37, %v754_v42  ;;  %v693_v46 = vmax.f32 %v395_v39, 0.0 }
  0xe7   :  { %v898_v48 = vcombine.high %v758_v41, %v758_v41  ;;  %v905_v49 = vrot.slane %v758_v41, %v9233_v31  ;;  %v692_v50 = vmax.f32 %v390_v43, 0.0  ;;  %v7577_v51 = vpop.f32.mrb[6].mxu0 }
  0xe8   :  { %v881_v53 = vcombine.high %v755_v45, %v755_v45  ;;  %v888_v54 = vrot.slane %v755_v45, %v9233_v31  ;;  %v9253_v55 = vsel %vm752_vm4, %v693_v46, -inf  ;;  %v9256_v56 = vadd.f32 %v7577_v51, %v9226_v11  ;;  %v9258_v57 = vpop.f32.mrb[7].mxu0 }
  0xe9   :  { %v912_v58 = vrot.slane %v898_v48, %v9233_v31  ;;  %v913_v59 = vcombine.high %v905_v49, %v905_v49  ;;  %v1582_v60 = vsel %vm1553_vm5, %v905_v49, -inf  ;;  %v9263_v61 = vsel %vm752_vm4, %v692_v50, -inf  ;;  %v9279_v49 = vpop.f32.mrb[3].mxu1 }
  0xea   :  { %v1583_v62 = vrot.slane %v1582_v60, 4  ;;  %v895_v63 = vrot.slane %v881_v53, %v9233_v31  ;;  %v896_v0 = vcombine.high %v888_v54, %v888_v54  ;;  %v1554_v1 = vsel %vm1553_vm5, %v888_v54, -inf }
  0xeb   :  { %v914_v2 = vcombine.high %v912_v58, %v912_v58  ;;  %v1589_v3 = vsel %vm1553_vm5, %v913_v59, -inf  ;;  %v1596_v4 = vsel %vm1553_vm5, %v912_v58, -inf  ;;  %v1555_v5 = vrot.slane %v1554_v1, 4  ;;  %v9269_v6 = vpop.f32.mrb[8].mxu0 }
  0xec   :  { %v1584_v7 = vmax.f32 %v1582_v60, %v1583_v62  ;;  %v1590_v8 = vrot.slane %v1589_v3, 4  ;;  %v1597_v10 = vrot.slane %v1596_v4, 4  ;;  %v897_v12 = vcombine.high %v895_v63, %v895_v63  ;;  %v409_v13 = vpop.f32.mrb[9].mxu0 }
  0xed   :  { %v1603_v14 = vsel %vm1553_vm5, %v914_v2, -inf  ;;  %v1556_v15 = vmax.f32 %v1554_v1, %v1555_v5  ;;  %v1561_v16 = vsel %vm1553_vm5, %v896_v0, -inf  ;;  %v1568_v17 = vsel %vm1553_vm5, %v895_v63, -inf }
  0xee   :  { %v1585_v18 = vrot.slane %v1584_v7, 2  ;;  %v1591_v19 = vmax.f32 %v1589_v3, %v1590_v8  ;;  %v1598_v20 = vmax.f32 %v1596_v4, %v1597_v10  ;;  %v1604_v21 = vrot.slane %v1603_v14, 4 }
  0xef   :  { %v1557_v22 = vrot.slane %v1556_v15, 2  ;;  %v1562_v23 = vrot.slane %v1561_v16, 4  ;;  %v1569_v24 = vrot.slane %v1568_v17, 4  ;;  %v1575_v25 = vsel %vm1553_vm5, %v897_v12, -inf  ;;  %v7583_v26 = vpop.f32.mrb[10].mxu0 }
  0xf0   :  { %v1586_v27 = vmax.f32 %v1584_v7, %v1585_v18  ;;  %v1592_v28 = vrot.slane %v1591_v19, 2  ;;  %v1599_v29 = vrot.slane %v1598_v20, 2  ;;  %v1605_v30 = vmax.f32 %v1603_v14, %v1604_v21  ;;  %v9275_v32 = vpop.f32.mrb[11].mxu0 }
  0xf1   :  { %v1558_v33 = vmax.f32 %v1556_v15, %v1557_v22  ;;  %v1563_v34 = vmax.f32 %v1561_v16, %v1562_v23  ;;  %v1570_v36 = vmax.f32 %v1568_v17, %v1569_v24  ;;  %v1576_v37 = vrot.slane %v1575_v25, 4 }
  0xf2   :  { %v1587_v38 = vrot.slane %v1586_v27, 1  ;;  %v1593_v39 = vmax.f32 %v1591_v19, %v1592_v28  ;;  %v1600_v40 = vmax.f32 %v1598_v20, %v1599_v29  ;;  %v1606_v41 = vrot.slane %v1605_v30, 2 }
  0xf3   :  { %v1559_v42 = vrot.slane %v1558_v33, 1  ;;  %v1564_v43 = vrot.slane %v1563_v34, 2  ;;  %v1571_v45 = vrot.slane %v1570_v36, 2  ;;  %v1577_v46 = vmax.f32 %v1575_v25, %v1576_v37  ;;  %v9277_v48 = vpop.f32.mrb[12].mxu0 }
  0xf4   :  { %v1588_v50 = vmax.f32 %v1586_v27, %v1587_v38  ;;  %v1594_v51 = vrot.slane %v1593_v39, 1  ;;  %v1601_v53 = vrot.slane %v1600_v40, 1  ;;  %v1607_v54 = vmax.f32 %v1605_v30, %v1606_v41  ;;  %v9281_v58 = vpop.f32.mrb[13].mxu0 }
  0xf5   :  { %v1560_v59 = vmax.f32 %v1558_v33, %v1559_v42  ;;  %v1565_v60 = vmax.f32 %v1563_v34, %v1564_v43  ;;  %v1572_v62 = vmax.f32 %v1570_v36, %v1571_v45  ;;  %v1578_v63 = vrot.slane %v1577_v46, 2 }
  0xf6   :  { %v1595_v0 = vmax.f32 %v1593_v39, %v1594_v51  ;;  %v1602_v1 = vmax.f32 %v1600_v40, %v1601_v53  ;;  %v1608_v2 = vrot.slane %v1607_v54, 1  ;;  %v695_v3 = vmax.f32 %v9256_v56, 0.0 }
  0xf7   :  { %v1566_v4 = vrot.slane %v1565_v60, 1  ;;  %v1573_v5 = vrot.slane %v1572_v62, 1  ;;  %v1579_v7 = vmax.f32 %v1577_v46, %v1578_v63  ;;  %v400_v8 = vadd.f32 %v9226_v11, %v9258_v57  ;;  %v9286_v10 = vpop.f32.mrb[14].mxu0 }
  0xf8   :  { %v1609_v12 = vmax.f32 %v1607_v54, %v1608_v2  ;;  %v763_v14 = vsel %vm752_vm4, %v695_v3, -inf  ;;  %v415_v15 = vadd.f32 %v9269_v6, %v9226_v11  ;;  %v410_v16 = vadd.f32 %v9226_v11, %v409_v13  ;;  %v9292_v17 = vpop.f32.mrb[15].mxu0 }
  0xf9   :  { %v1567_v18 = vmax.f32 %v1565_v60, %v1566_v4  ;;  %v1574_v56 = vmax.f32 %v1572_v62, %v1573_v5  ;;  %v1580_v19 = vrot.slane %v1579_v7, 1  ;;  %v764_v20 = vmax.f32 %v9253_v55, %v763_v14 }
  0xfa   :  { %v694_v21 = vmax.f32 %v400_v8, 0.0  ;;  %v697_v22 = vmax.f32 %v415_v15, 0.0  ;;  %v696_v57 = vmax.f32 %v410_v16, 0.0  ;;  %v425_v23 = vadd.f32 %v7583_v26, %v9226_v11 }
  0xfb   :  { %v1581_v24 = vmax.f32 %v1579_v7, %v1580_v19  ;;  %v2629_v25 = vsel %vm2628_vm7, %v1567_v18, %v1560_v59  ;;  %v932_v27 = vcombine.high %v764_v20, %v764_v20  ;;  %v939_v6 = vrot.slane %v764_v20, %v9233_v31  ;;  %v9298_v28 = vpop.f32.mrb[16].mxu0 }
  0xfc   :  { %v2631_v13 = vsel %vm2630_vm8, %v1574_v56, %v2629_v25  ;;  %v760_v29 = vsel %vm752_vm4, %v694_v21, -inf  ;;  %v9303_v30 = vsel %vm752_vm4, %v697_v22, -inf  ;;  %v9306_v55 = vsel %vm752_vm4, %v696_v57, -inf  ;;  %v9308_v33 = vpop.f32.mrb[17].mxu0 }
  0xfd   :  { %v2633_v26 = vsel %vm2632_vm9, %v1581_v24, %v2631_v13  ;;  %v946_v34 = vrot.slane %v932_v27, %v9233_v31  ;;  %v947_v36 = vcombine.high %v939_v6, %v939_v6  ;;  %v1638_v37 = vsel %vm1553_vm5, %v939_v6, -inf  ;;  %v9336_v6 = vpop.f32.mrb[4].mxu1 }
  0xfe   :  { %v2635_v38 = vsel %vm2634_vm10, %v1588_v50, %v2633_v26  ;;  %v1639_v39 = vrot.slane %v1638_v37, 4  ;;  %v761_v40 = vmax.f32 %v9263_v61, %v760_v29  ;;  %v699_v41 = vmax.f32 %v425_v23, 0.0 }
  0xff   :  { %v2637_v42 = vsel %vm2636_vm11, %v1595_v0, %v2635_v38  ;;  %v948_v43 = vcombine.high %v946_v34, %v946_v34  ;;  %v1645_v45 = vsel %vm1553_vm5, %v947_v36, -inf  ;;  %v1652_v46 = vsel %vm1553_vm5, %v946_v34, -inf  ;;  %v9318_v51 = vpop.f32.mrb[18].mxu0 }
 0x100   :  { %v2639_v53 = vsel %vm2638_vm12, %v1602_v1, %v2637_v42  ;;  %v1640_v54 = vmax.f32 %v1638_v37, %v1639_v39  ;;  %v1646_v59 = vrot.slane %v1645_v45, 4  ;;  %v1653_v60 = vrot.slane %v1652_v46, 4  ;;  %v9321_v62 = vpop.f32.mrb[19].mxu0  ;;  %v9341_v37 = vpop.f32.mrb[5].mxu1 }
 0x101   :  { %v2641_v50 = vsel %vm2640_vm13, %v1609_v12, %v2639_v53  ;;  %v1659_v61 = vsel %vm1553_vm5, %v948_v43, -inf  ;;  %v915_v63 = vcombine.high %v761_v40, %v761_v40  ;;  %v922_v0 = vrot.slane %v761_v40, %v9233_v31 }
 0x102   :  { %2764 = vst.msk [vmem:[#allocation2 + $0x11] sm:$0xff] %vm752_vm4, %v2641_v50  ;;  %v1641_v2 = vrot.slane %v1640_v54, 2  ;;  %v1647_v3 = vmax.f32 %v1645_v45, %v1646_v59  ;;  %v1654_v4 = vmax.f32 %v1652_v46, %v1653_v60  ;;  %v1660_v5 = vrot.slane %v1659_v61, 4 }
 0x103   :  { %v929_v1 = vrot.slane %v915_v63, %v9233_v31  ;;  %v930_v7 = vcombine.high %v922_v0, %v922_v0  ;;  %v1610_v8 = vsel %vm1553_vm5, %v922_v0, -inf  ;;  %v769_v14 = vsel %vm752_vm4, %v699_v41, -inf  ;;  %v9330_v15 = vpop.f32.mrb[20].mxu0 }
 0x104   :  { %v1642_v12 = vmax.f32 %v1640_v54, %v1641_v2  ;;  %v1648_v16 = vrot.slane %v1647_v3, 2  ;;  %v1655_v18 = vrot.slane %v1654_v4, 2  ;;  %v1661_v56 = vmax.f32 %v1659_v61, %v1660_v5  ;;  %v9332_v19 = vpop.f32.mrb[21].mxu0 }
 0x105   :  { %v931_v20 = vcombine.high %v929_v1, %v929_v1  ;;  %v1611_v21 = vrot.slane %v1610_v8, 4  ;;  %v1617_v22 = vsel %vm1553_vm5, %v930_v7, -inf  ;;  %v1624_v57 = vsel %vm1553_vm5, %v929_v1, -inf }
 0x106   :  { %v1643_v23 = vrot.slane %v1642_v12, 1  ;;  %v1649_v24 = vmax.f32 %v1647_v3, %v1648_v16  ;;  %v1656_v25 = vmax.f32 %v1654_v4, %v1655_v18  ;;  %v1662_v27 = vrot.slane %v1661_v56, 2  ;;  %v9358_v16 = vpop.f32.mrb[6].mxu1 }
 0x107   :  { %v1612_v13 = vmax.f32 %v1610_v8, %v1611_v21  ;;  %v1618_v29 = vrot.slane %v1617_v22, 4  ;;  %v1625_v26 = vrot.slane %v1624_v57, 4  ;;  %v1631_v34 = vsel %vm1553_vm5, %v931_v20, -inf  ;;  %v9339_v36 = vpop.f32.mrb[22].mxu0 }
 0x108   :  { %v9343_v38 = vmax.f32 %v1642_v12, %v1643_v23  ;;  %v1650_v39 = vrot.slane %v1649_v24, 1  ;;  %v1657_v40 = vrot.slane %v1656_v25, 1  ;;  %v1663_v41 = vmax.f32 %v1661_v56, %v1662_v27  ;;  %v9345_v42 = vpop.f32.mrb[23].mxu0 }
 0x109   :  { %v1613_v43 = vrot.slane %v1612_v13, 2  ;;  %v1619_v45 = vmax.f32 %v1617_v22, %v1618_v29  ;;  %v1626_v46 = vmax.f32 %v1624_v57, %v1625_v26  ;;  %v1632_v53 = vrot.slane %v1631_v34, 4  ;;  %v2788_v54 = vld [vmem:[#allocation2 + $0x10] sm:$0xff] }
 0x10a   :  { %v1651_v59 = vmax.f32 %v1649_v24, %v1650_v39  ;;  %v9347_v60 = vmax.f32 %v1656_v25, %v1657_v40  ;;  %v1664_v50 = vrot.slane %v1663_v41, 1  ;;  %v770_v61 = vmax.f32 %v9303_v30, %v769_v14  ;;  %7671 = vmatmul.mubr.msk.f32.vlgmr.msra.gmra.mrb[20].mxu1 %vm752_vm4, %v2788_v54 }
 0x10b   :  { %v1614_v63 = vmax.f32 %v1612_v13, %v1613_v43  ;;  %v1620_v0 = vrot.slane %v1619_v45, 2  ;;  %v1627_v2 = vrot.slane %v1626_v46, 2  ;;  %v1633_v3 = vmax.f32 %v1631_v34, %v1632_v53  ;;  %v9351_v4 = vpop.f32.mrb[24].mxu0 }
 0x10c   :  { %v1665_v5 = vmax.f32 %v1663_v41, %v1664_v50  ;;  %v966_v1 = vcombine.high %v770_v61, %v770_v61  ;;  %v973_v7 = vrot.slane %v770_v61, %v9233_v31  ;;  %v420_v8 = vadd.f32 %v9226_v11, %v9275_v32  ;;  %v9356_v12 = vpop.f32.mrb[25].mxu0 }
 0x10d   :  { %v1615_v30 = vrot.slane %v1614_v63, 1  ;;  %v1621_v14 = vmax.f32 %v1619_v45, %v1620_v0  ;;  %v1628_v18 = vmax.f32 %v1626_v46, %v1627_v2  ;;  %v1634_v56 = vrot.slane %v1633_v3, 2 }
 0x10e   :  { %v980_v20 = vrot.slane %v966_v1, %v9233_v31  ;;  %v981_v21 = vcombine.high %v973_v7, %v973_v7  ;;  %v1694_v22 = vsel %vm1553_vm5, %v973_v7, -inf  ;;  %v698_v57 = vmax.f32 %v420_v8, 0.0 }
 0x10f   :  { %v1616_v23 = vmax.f32 %v1614_v63, %v1615_v30  ;;  %v1622_v24 = vrot.slane %v1621_v14, 1  ;;  %v1629_v25 = vrot.slane %v1628_v18, 1  ;;  %v1635_v27 = vmax.f32 %v1633_v3, %v1634_v56  ;;  %v9362_v13 = vpop.f32.mrb[26].mxu0 }
 0x110   :  { %v982_v32 = vcombine.high %v980_v20, %v980_v20  ;;  %v1695_v29 = vrot.slane %v1694_v22, 4  ;;  %v1701_v26 = vsel %vm1553_vm5, %v981_v21, -inf  ;;  %v1708_v34 = vsel %vm1553_vm5, %v980_v20, -inf  ;;  %v9366_v39 = vpop.f32.mrb[27].mxu0 }
 0x111   :  { %v1623_v40 = vmax.f32 %v1621_v14, %v1622_v24  ;;  %v1630_v41 = vmax.f32 %v1628_v18, %v1629_v25  ;;  %v1636_v43 = vrot.slane %v1635_v27, 1  ;;  %v1702_v45 = vrot.slane %v1701_v26, 4 }
 0x112   :  { %v1696_v46 = vmax.f32 %v1694_v22, %v1695_v29  ;;  %v1709_v53 = vrot.slane %v1708_v34, 4  ;;  %v1715_v54 = vsel %vm1553_vm5, %v982_v32, -inf  ;;  %v766_v50 = vsel %vm752_vm4, %v698_v57, -inf }
 0x113   :  { %v1637_v61 = vmax.f32 %v1635_v27, %v1636_v43  ;;  %v2642_v63 = vsel %vm2628_vm7, %v1623_v40, %v1616_v23  ;;  %v1703_v0 = vmax.f32 %v1701_v26, %v1702_v45  ;;  %v1716_v2 = vrot.slane %v1715_v54, 4  ;;  %v9371_v3 = vpop.f32.mrb[28].mxu0 }
 0x114   :  { %v2643_v1 = vsel %vm2630_vm8, %v1630_v41, %v2642_v63  ;;  %v1697_v7 = vrot.slane %v1696_v46, 2  ;;  %v1710_v8 = vmax.f32 %v1708_v34, %v1709_v53  ;;  %v767_v30 = vmax.f32 %v9306_v55, %v766_v50  ;;  %v9375_v14 = vpop.f32.mrb[29].mxu0 }
 0x115   :  { %v2644_v18 = vsel %vm2632_vm9, %v1637_v61, %v2643_v1  ;;  %v1704_v56 = vrot.slane %v1703_v0, 2  ;;  %v1717_v20 = vmax.f32 %v1715_v54, %v1716_v2  ;;  %v435_v21 = vadd.f32 %v9277_v48, %v9226_v11 }
 0x116   :  { %v2645_v22 = vsel %vm2634_vm10, %v9343_v38, %v2644_v18  ;;  %v1698_v57 = vmax.f32 %v1696_v46, %v1697_v7  ;;  %v1711_v23 = vrot.slane %v1710_v8, 2  ;;  %v949_v24 = vcombine.high %v767_v30, %v767_v30 }
 0x117   :  { %v2646_v25 = vsel %vm2636_vm11, %v1651_v59, %v2645_v22  ;;  %v1705_v27 = vmax.f32 %v1703_v0, %v1704_v56  ;;  %v1718_v32 = vrot.slane %v1717_v20, 2  ;;  %v956_v55 = vrot.slane %v767_v30, %v9233_v31  ;;  %v9384_v29 = vpop.f32.mrb[30].mxu0 }
 0x118   :  { %v2647_v26 = vsel %vm2638_vm12, %v9347_v60, %v2646_v25  ;;  %v1699_v34 = vrot.slane %v1698_v57, 1  ;;  %v1712_v40 = vmax.f32 %v1710_v8, %v1711_v23  ;;  %v963_v48 = vrot.slane %v949_v24, %v9233_v31  ;;  %v9389_v41 = vpop.f32.mrb[31].mxu0  ;;  %v9403_v8 = vpop.f32.mrb[7].mxu1 }
 0x119   :  { %v2648_v38 = vsel %vm2640_vm13, %v1665_v5, %v2647_v26  ;;  %v1706_v43 = vrot.slane %v1705_v27, 1  ;;  %v1719_v45 = vmax.f32 %v1717_v20, %v1718_v32  ;;  %v964_v59 = vcombine.high %v956_v55, %v956_v55 }
 0x11a   :  { %2765 = vst.msk [vmem:[#allocation2 + $0x21] sm:$0xff] %vm752_vm4, %v2648_v38  ;;  %v9393_v46 = vmax.f32 %v1698_v57, %v1699_v34  ;;  %v1713_v53 = vrot.slane %v1712_v40, 1  ;;  %v965_v54 = vcombine.high %v963_v48, %v963_v48  ;;  %v1666_v50 = vsel %vm1553_vm5, %v956_v55, -inf }
 0x11b   :  { %v9396_v60 = vmax.f32 %v1705_v27, %v1706_v43  ;;  %v1720_v61 = vrot.slane %v1719_v45, 1  ;;  %v1667_v63 = vrot.slane %v1666_v50, 4  ;;  %v1673_v0 = vsel %vm1553_vm5, %v964_v59, -inf }
 0x11c   :  { %v9399_v2 = vmax.f32 %v1712_v40, %v1713_v53  ;;  %v1674_v5 = vrot.slane %v1673_v0, 4  ;;  %v1680_v1 = vsel %vm1553_vm5, %v963_v48, -inf  ;;  %v1687_v7 = vsel %vm1553_vm5, %v965_v54, -inf }
 0x11d   :  { %v9405_v30 = vmax.f32 %v1719_v45, %v1720_v61  ;;  %v1668_v18 = vmax.f32 %v1666_v50, %v1667_v63  ;;  %v1681_v56 = vrot.slane %v1680_v1, 4  ;;  %v1688_v20 = vrot.slane %v1687_v7, 4 }
 0x11e   :  { %v1675_v22 = vmax.f32 %v1673_v0, %v1674_v5  ;;  %v701_v57 = vmax.f32 %v435_v21, 0.0  ;;  %v430_v23 = vadd.f32 %v9226_v11, %v9281_v58  ;;  %v445_v24 = vadd.f32 %v9286_v10, %v9226_v11 }
 0x11f   :  { %v1669_v25 = vrot.slane %v1668_v18, 2  ;;  %v1682_v27 = vmax.f32 %v1680_v1, %v1681_v56  ;;  %v1689_v32 = vmax.f32 %v1687_v7, %v1688_v20  ;;  %v440_v55 = vadd.f32 %v9226_v11, %v9292_v17 }
 0x120   :  { %v1676_v26 = vrot.slane %v1675_v22, 2  ;;  %v774_v34 = vsel %vm752_vm4, %v701_v57, -inf  ;;  %v700_v40 = vmax.f32 %v430_v23, 0.0  ;;  %v703_v48 = vmax.f32 %v445_v24, 0.0 }
 0x121   :  { %v1670_v38 = vmax.f32 %v1668_v18, %v1669_v25  ;;  %v1683_v43 = vrot.slane %v1682_v27, 2  ;;  %v1690_v21 = vrot.slane %v1689_v32, 2  ;;  %v702_v45 = vmax.f32 %v440_v55, 0.0  ;;  %v2789_v59 = vld [vmem:[#allocation2 + $0x20] sm:$0xff] }
 0x122   :  { %v1677_v58 = vmax.f32 %v1675_v22, %v1676_v26  ;;  %v771_v53 = vsel %vm752_vm4, %v700_v40, -inf  ;;  %v775_v10 = vsel %vm752_vm4, %v703_v48, -inf  ;;  %v455_v54 = vadd.f32 %v9298_v28, %v9226_v11  ;;  %7673 = vmatprep.mubr.msk.f32.mxu1 %vm752_vm4, %v2789_v59 }
 0x123   :  { %v1671_v17 = vrot.slane %v1670_v38, 1  ;;  %v1684_v50 = vmax.f32 %v1682_v27, %v1683_v43  ;;  %v1691_v61 = vmax.f32 %v1689_v32, %v1690_v21  ;;  %v776_v63 = vmax.f32 %v774_v34, %v775_v10 }
 0x124   :  { %v1678_v0 = vrot.slane %v1677_v58, 1  ;;  %v772_v5 = vsel %vm752_vm4, %v702_v45, -inf  ;;  %v705_v1 = vmax.f32 %v455_v54, 0.0  ;;  %v9422_v7 = vadd.f32 %v9226_v11, %v9308_v33  ;;  %v9434_v45 = vpop.f32.mrb[32].mxu0 }
 0x125   :  { %v1672_v18 = vmax.f32 %v1670_v38, %v1671_v17  ;;  %v1685_v56 = vrot.slane %v1684_v50, 1  ;;  %v1692_v20 = vrot.slane %v1691_v61, 1  ;;  %v1000_v22 = vcombine.high %v776_v63, %v776_v63  ;;  %v9439_v54 = vpop.f32.mrb[33].mxu0 }
 0x126   :  { %v1679_v57 = vmax.f32 %v1677_v58, %v1678_v0  ;;  %v1007_v28 = vrot.slane %v776_v63, %v9233_v31  ;;  %v773_v23 = vmax.f32 %v771_v53, %v772_v5  ;;  %v9426_v24 = vsel %vm752_vm4, %v705_v1, -inf  ;;  %v9444_v0 = vpop.f32.mrb[8].mxu1 }
 0x127   :  { %v1686_v25 = vmax.f32 %v1684_v50, %v1685_v56  ;;  %v1693_v27 = vmax.f32 %v1691_v61, %v1692_v20  ;;  %v1014_v32 = vrot.slane %v1000_v22, %v9233_v31  ;;  %v704_v55 = vmax.f32 %v9422_v7, 0.0  ;;  %v9449_v56 = vpop.f32.mrb[9].mxu1 }
 0x128   :  { %v2649_v33 = vsel %vm2628_vm7, %v1679_v57, %v1672_v18  ;;  %v1015_v26 = vcombine.high %v1007_v28, %v1007_v28  ;;  %v1750_v34 = vsel %vm1553_vm5, %v1007_v28, -inf  ;;  %v983_v40 = vcombine.high %v773_v23, %v773_v23 }
 0x129   :  { %v2650_v48 = vsel %vm2630_vm8, %v1686_v25, %v2649_v33  ;;  %v1016_v38 = vcombine.high %v1014_v32, %v1014_v32  ;;  %v1751_v43 = vrot.slane %v1750_v34, 4  ;;  %v1764_v21 = vsel %vm1553_vm5, %v1014_v32, -inf }
 0x12a   :  { %v2651_v59 = vsel %vm2632_vm9, %v1693_v27, %v2650_v48  ;;  %v1757_v58 = vsel %vm1553_vm5, %v1015_v26, -inf  ;;  %v1765_v53 = vrot.slane %v1764_v21, 4  ;;  %v990_v10 = vrot.slane %v773_v23, %v9233_v31 }
 0x12b   :  { %v2652_v17 = vsel %vm2634_vm10, %v9393_v46, %v2651_v59  ;;  %v1752_v50 = vmax.f32 %v1750_v34, %v1751_v43  ;;  %v1758_v61 = vrot.slane %v1757_v58, 4  ;;  %v1771_v63 = vsel %vm1553_vm5, %v1016_v38, -inf }
 0x12c   :  { %v2653_v5 = vsel %vm2636_vm11, %v9396_v60, %v2652_v17  ;;  %v1766_v1 = vmax.f32 %v1764_v21, %v1765_v53  ;;  %v1772_v7 = vrot.slane %v1771_v63, 4  ;;  %v997_v18 = vrot.slane %v983_v40, %v9233_v31 }
 0x12d   :  { %v2654_v20 = vsel %vm2638_vm12, %v9399_v2, %v2653_v5  ;;  %v1753_v22 = vrot.slane %v1752_v50, 2  ;;  %v1759_v46 = vmax.f32 %v1757_v58, %v1758_v61  ;;  %v998_v57 = vcombine.high %v990_v10, %v990_v10  ;;  %v9460_v5 = vpop.f32.mrb[34].mxu0 }
 0x12e   :  { %v2655_v28 = vsel %vm2640_vm13, %v9405_v30, %v2654_v20  ;;  %v1767_v23 = vrot.slane %v1766_v1, 2  ;;  %v1773_v25 = vmax.f32 %v1771_v63, %v1772_v7  ;;  %v999_v27 = vcombine.high %v997_v18, %v997_v18 }
 0x12f   :  { %2766 = vst.msk [vmem:[#allocation2 + $0x31] sm:$0xff] %vm752_vm4, %v2655_v28  ;;  %v1754_v60 = vmax.f32 %v1752_v50, %v1753_v22  ;;  %v1760_v32 = vrot.slane %v1759_v46, 2  ;;  %v1722_v33 = vsel %vm1553_vm5, %v990_v10, -inf  ;;  %v1729_v26 = vsel %vm1553_vm5, %v998_v57, -inf }
 0x130   :  { %v1768_v34 = vmax.f32 %v1766_v1, %v1767_v23  ;;  %v1774_v40 = vrot.slane %v1773_v25, 2  ;;  %v1723_v2 = vrot.slane %v1722_v33, 4  ;;  %v1730_v48 = vrot.slane %v1729_v26, 4 }
 0x131   :  { %v1755_v38 = vrot.slane %v1754_v60, 1  ;;  %v1761_v43 = vmax.f32 %v1759_v46, %v1760_v32  ;;  %v1736_v21 = vsel %vm1553_vm5, %v997_v18, -inf  ;;  %v1743_v30 = vsel %vm1553_vm5, %v999_v27, -inf }
 0x132   :  { %v1769_v59 = vrot.slane %v1768_v34, 1  ;;  %v1775_v58 = vmax.f32 %v1773_v25, %v1774_v40  ;;  %v1724_v53 = vmax.f32 %v1722_v33, %v1723_v2  ;;  %v1731_v17 = vmax.f32 %v1729_v26, %v1730_v48  ;;  %v9472_v2 = vpop.f32.mrb[10].mxu1 }
 0x133   :  { %v1756_v50 = vmax.f32 %v1754_v60, %v1755_v38  ;;  %v1762_v61 = vrot.slane %v1761_v43, 1  ;;  %v1737_v63 = vrot.slane %v1736_v21, 4  ;;  %v1744_v10 = vrot.slane %v1743_v30, 4 }
 0x134   :  { %v9462_v1 = vmax.f32 %v1768_v34, %v1769_v59  ;;  %v1776_v7 = vrot.slane %v1775_v58, 1  ;;  %v1725_v20 = vrot.slane %v1724_v53, 2  ;;  %v1732_v22 = vrot.slane %v1731_v17, 2 }
 0x135   :  { %v1763_v46 = vmax.f32 %v1761_v43, %v1762_v61  ;;  %v1738_v57 = vmax.f32 %v1736_v21, %v1737_v63  ;;  %v1745_v18 = vmax.f32 %v1743_v30, %v1744_v10  ;;  %v777_v28 = vsel %vm752_vm4, %v704_v55, -inf }
 0x136   :  { %v1777_v23 = vmax.f32 %v1775_v58, %v1776_v7  ;;  %v1726_v25 = vmax.f32 %v1724_v53, %v1725_v20  ;;  %v1733_v27 = vmax.f32 %v1731_v17, %v1732_v22  ;;  %v465_v60 = vadd.f32 %v9318_v51, %v9226_v11  ;;  %v2790_v32 = vld [vmem:[#allocation2 + $0x30] sm:$0xff] }
 0x137   :  { %v1739_v33 = vrot.slane %v1738_v57, 2  ;;  %v1746_v26 = vrot.slane %v1745_v18, 2  ;;  %v460_v34 = vadd.f32 %v9226_v11, %v9321_v62  ;;  %v475_v40 = vadd.f32 %v9330_v15, %v9226_v11  ;;  %7674 = vmatmul.mubr.msk.f32.gmra.mrb[22].mxu1 %vm752_vm4, %v2790_v32  ;;  %v9477_v15 = vpop.f32.mrb[35].mxu0 }
 0x138   :  { %v1727_v55 = vrot.slane %v1726_v25, 1  ;;  %v1734_v48 = vrot.slane %v1733_v27, 1  ;;  %v707_v38 = vmax.f32 %v465_v60, 0.0  ;;  %v470_v43 = vadd.f32 %v9226_v11, %v9332_v19 }
 0x139   :  { %v1740_v51 = vmax.f32 %v1738_v57, %v1739_v33  ;;  %v1747_v21 = vmax.f32 %v1745_v18, %v1746_v26  ;;  %v706_v30 = vmax.f32 %v460_v34, 0.0  ;;  %v709_v59 = vmax.f32 %v475_v40, 0.0 }
 0x13a   :  { %v1728_v58 = vmax.f32 %v1726_v25, %v1727_v55  ;;  %v1735_v53 = vmax.f32 %v1733_v27, %v1734_v48  ;;  %v781_v62 = vsel %vm752_vm4, %v707_v38, -inf  ;;  %v708_v17 = vmax.f32 %v470_v43, 0.0 }
 0x13b   :  { %v1741_v61 = vrot.slane %v1740_v51, 1  ;;  %v1748_v63 = vrot.slane %v1747_v21, 1  ;;  %v782_v10 = vmax.f32 %v9426_v24, %v781_v62  ;;  %v778_v7 = vsel %vm752_vm4, %v706_v30, -inf }
 0x13c   :  { %v2656_v20 = vsel %vm2628_vm7, %v1735_v53, %v1728_v58  ;;  %v779_v19 = vmax.f32 %v777_v28, %v778_v7  ;;  %v9483_v22 = vsel %vm752_vm4, %v709_v59, -inf  ;;  %v9486_v57 = vsel %vm752_vm4, %v708_v17, -inf }
 0x13d   :  { %v1742_v18 = vmax.f32 %v1740_v51, %v1741_v61  ;;  %v1749_v25 = vmax.f32 %v1747_v21, %v1748_v63  ;;  %v1034_v27 = vcombine.high %v782_v10, %v782_v10  ;;  %v1041_v60 = vrot.slane %v782_v10, %v9233_v31 }
 0x13e   :  { %v1017_v32 = vcombine.high %v779_v19, %v779_v19  ;;  %v1024_v33 = vrot.slane %v779_v19, %v9233_v31  ;;  %v9492_v24 = vadd.f32 %v9339_v36, %v9226_v11  ;;  %v9496_v28 = vadd.f32 %v9226_v11, %v9345_v42 }
 0x13f   :  { %v2657_v26 = vsel %vm2630_vm8, %v1742_v18, %v2656_v20  ;;  %v1048_v34 = vrot.slane %v1034_v27, %v9233_v31  ;;  %v1049_v40 = vcombine.high %v1041_v60, %v1041_v60  ;;  %v1806_v55 = vsel %vm1553_vm5, %v1041_v60, -inf }
 0x140   :  { %v2658_v48 = vsel %vm2632_vm9, %v1749_v25, %v2657_v26  ;;  %v1807_v38 = vrot.slane %v1806_v55, 4  ;;  %v1031_v43 = vrot.slane %v1017_v32, %v9233_v31  ;;  %v1032_v51 = vcombine.high %v1024_v33, %v1024_v33 }
 0x141   :  { %v2659_v36 = vsel %vm2634_vm10, %v1756_v50, %v2658_v48  ;;  %v1050_v21 = vcombine.high %v1048_v34, %v1048_v34  ;;  %v1813_v30 = vsel %vm1553_vm5, %v1049_v40, -inf  ;;  %v1820_v42 = vsel %vm1553_vm5, %v1048_v34, -inf }
 0x142   :  { %v2660_v59 = vsel %vm2636_vm11, %v1763_v46, %v2659_v36  ;;  %v1808_v58 = vmax.f32 %v1806_v55, %v1807_v38  ;;  %v1814_v53 = vrot.slane %v1813_v30, 4  ;;  %v1821_v62 = vrot.slane %v1820_v42, 4  ;;  %v9516_v55 = vpop.f32.mrb[11].mxu1 }
 0x143   :  { %v2661_v17 = vsel %vm2638_vm12, %v9462_v1, %v2660_v59  ;;  %v1827_v61 = vsel %vm1553_vm5, %v1050_v21, -inf  ;;  %v1033_v63 = vcombine.high %v1031_v43, %v1031_v43  ;;  %v1778_v10 = vsel %vm1553_vm5, %v1024_v33, -inf }
 0x144   :  { %v2662_v50 = vsel %vm2640_vm13, %v1777_v23, %v2661_v17  ;;  %v1809_v7 = vrot.slane %v1808_v58, 2  ;;  %v1815_v20 = vmax.f32 %v1813_v30, %v1814_v53  ;;  %v1822_v19 = vmax.f32 %v1820_v42, %v1821_v62 }
 0x145   :  { %2767 = vst.msk [vmem:[#allocation2 + $0x41] sm:$0xff] %vm752_vm4, %v2662_v50  ;;  %v1828_v18 = vrot.slane %v1827_v61, 4  ;;  %v1779_v46 = vrot.slane %v1778_v10, 4  ;;  %v1785_v25 = vsel %vm1553_vm5, %v1032_v51, -inf  ;;  %v1792_v27 = vsel %vm1553_vm5, %v1031_v43, -inf }
 0x146   :  { %v1810_v60 = vmax.f32 %v1808_v58, %v1809_v7  ;;  %v1816_v1 = vrot.slane %v1815_v20, 2  ;;  %v1823_v32 = vrot.slane %v1822_v19, 2  ;;  %v1786_v26 = vrot.slane %v1785_v25, 4 }
 0x147   :  { %v1829_v34 = vmax.f32 %v1827_v61, %v1828_v18  ;;  %v1780_v40 = vmax.f32 %v1778_v10, %v1779_v46  ;;  %v1793_v33 = vrot.slane %v1792_v27, 4  ;;  %v1799_v23 = vsel %vm1553_vm5, %v1033_v63, -inf }
 0x148   :  { %v1811_v48 = vrot.slane %v1810_v60, 1  ;;  %v1817_v38 = vmax.f32 %v1815_v20, %v1816_v1  ;;  %v1824_v36 = vmax.f32 %v1822_v19, %v1823_v32  ;;  %v1787_v21 = vmax.f32 %v1785_v25, %v1786_v26 }
 0x149   :  { %v1830_v30 = vrot.slane %v1829_v34, 2  ;;  %v1781_v42 = vrot.slane %v1780_v40, 2  ;;  %v1794_v51 = vmax.f32 %v1792_v27, %v1793_v33  ;;  %v1800_v59 = vrot.slane %v1799_v23, 4 }
 0x14a   :  { %v1812_v43 = vmax.f32 %v1810_v60, %v1811_v48  ;;  %v1818_v58 = vrot.slane %v1817_v38, 1  ;;  %v1825_v53 = vrot.slane %v1824_v36, 1  ;;  %v1788_v62 = vrot.slane %v1787_v21, 2 }
 0x14b   :  { %v1831_v17 = vmax.f32 %v1829_v34, %v1830_v30  ;;  %v1782_v61 = vmax.f32 %v1780_v40, %v1781_v42  ;;  %v1795_v10 = vrot.slane %v1794_v51, 2  ;;  %v1801_v50 = vmax.f32 %v1799_v23, %v1800_v59 }
 0x14c   :  { %v1819_v7 = vmax.f32 %v1817_v38, %v1818_v58  ;;  %v1826_v63 = vmax.f32 %v1824_v36, %v1825_v53  ;;  %v1789_v18 = vmax.f32 %v1787_v21, %v1788_v62  ;;  %v711_v46 = vmax.f32 %v9492_v24, 0.0  ;;  %v2791_v21 = vld [vmem:[#allocation2 + $0x40] sm:$0xff] }
 0x14d   :  { %v1832_v20 = vrot.slane %v1831_v17, 1  ;;  %v1783_v19 = vrot.slane %v1782_v61, 1  ;;  %v1796_v25 = vmax.f32 %v1794_v51, %v1795_v10  ;;  %v1802_v1 = vrot.slane %v1801_v50, 2  ;;  %7676 = vmatprep.mubr.msk.f32.mxu1 %vm752_vm4, %v2791_v21 }
 0x14e   :  { %v1790_v32 = vrot.slane %v1789_v18, 1  ;;  %v787_v27 = vsel %vm752_vm4, %v711_v46, -inf  ;;  %v710_v60 = vmax.f32 %v9496_v28, 0.0  ;;  %v495_v26 = vadd.f32 %v9351_v4, %v9226_v11  ;;  %v9529_v28 = vld [vmem:[%s11496_s2] ss:$0 sm:$0xff] }
 0x14f   :  { %v1833_v34 = vmax.f32 %v1831_v17, %v1832_v20  ;;  %v1784_v40 = vmax.f32 %v1782_v61, %v1783_v19  ;;  %v1797_v33 = vrot.slane %v1796_v25, 1  ;;  %v1803_v23 = vmax.f32 %v1801_v50, %v1802_v1 }
 0x150   :  { %v1791_v48 = vmax.f32 %v1789_v18, %v1790_v32  ;;  %v788_v38 = vmax.f32 %v9483_v22, %v787_v27  ;;  %v784_v24 = vsel %vm752_vm4, %v710_v60, -inf  ;;  %v713_v36 = vmax.f32 %v495_v26, 0.0  ;;  %v9546_v18 = vpop.f32.mrb[36].mxu0 }
 0x151   :  { %v1798_v30 = vmax.f32 %v1796_v25, %v1797_v33  ;;  %v1804_v42 = vrot.slane %v1803_v23, 1  ;;  %v785_v51 = vmax.f32 %v9486_v57, %v784_v24  ;;  %v9533_v11 = vadd.f32 %v9529_v28, %v9356_v12  ;;  %v9550_v1 = vpop.f32.mrb[37].mxu0 }
 0x152   :  { %v2663_v4 = vsel %vm2628_vm7, %v1791_v48, %v1784_v40  ;;  %v1068_v22 = vcombine.high %v788_v38, %v788_v38  ;;  %v1075_v59 = vrot.slane %v788_v38, %v9233_v31  ;;  %v9539_v58 = vsel %vm752_vm4, %v713_v36, -inf  ;;  %v9556_v38 = vpop.f32.mrb[12].mxu1 }
 0x153   :  { %v1805_v57 = vmax.f32 %v1803_v23, %v1804_v42  ;;  %v2664_v53 = vsel %vm2630_vm8, %v1798_v30, %v2663_v4  ;;  %v1051_v62 = vcombine.high %v785_v51, %v785_v51  ;;  %v1058_v17 = vrot.slane %v785_v51, %v9233_v31 }
 0x154   :  { %v1082_v61 = vrot.slane %v1068_v22, %v9233_v31  ;;  %v1083_v12 = vcombine.high %v1075_v59, %v1075_v59  ;;  %v1862_v10 = vsel %vm1553_vm5, %v1075_v59, -inf  ;;  %v712_v50 = vmax.f32 %v9533_v11, 0.0 }
 0x155   :  { %v2665_v46 = vsel %vm2632_vm9, %v1805_v57, %v2664_v53  ;;  %v1863_v20 = vrot.slane %v1862_v10, 4  ;;  %v1065_v19 = vrot.slane %v1051_v62, %v9233_v31  ;;  %v1066_v25 = vcombine.high %v1058_v17, %v1058_v17 }
 0x156   :  { %v2666_v32 = vsel %vm2634_vm10, %v1812_v43, %v2665_v46  ;;  %v1084_v27 = vcombine.high %v1082_v61, %v1082_v61  ;;  %v1869_v60 = vsel %vm1553_vm5, %v1083_v12, -inf  ;;  %v1876_v26 = vsel %vm1553_vm5, %v1082_v61, -inf  ;;  %v9561_v43 = vpop.f32.mrb[13].mxu1 }
 0x157   :  { %v2667_v40 = vsel %vm2636_vm11, %v1819_v7, %v2666_v32  ;;  %v1864_v33 = vmax.f32 %v1862_v10, %v1863_v20  ;;  %v1870_v23 = vrot.slane %v1869_v60, 4  ;;  %v1877_v48 = vrot.slane %v1876_v26, 4 }
 0x158   :  { %v2668_v24 = vsel %vm2638_vm12, %v1826_v63, %v2667_v40  ;;  %v1883_v36 = vsel %vm1553_vm5, %v1084_v27, -inf  ;;  %v1067_v21 = vcombine.high %v1065_v19, %v1065_v19  ;;  %v1834_v30 = vsel %vm1553_vm5, %v1058_v17, -inf }
 0x159   :  { %v2669_v42 = vsel %vm2640_vm13, %v1833_v34, %v2668_v24  ;;  %v1865_v51 = vrot.slane %v1864_v33, 2  ;;  %v1871_v11 = vmax.f32 %v1869_v60, %v1870_v23  ;;  %v1878_v4 = vmax.f32 %v1876_v26, %v1877_v48  ;;  %v9568_v24 = vpop.f32.mrb[38].mxu0 }
 0x15a   :  { %2768 = vst.msk [vmem:[#allocation2 + $0x51] sm:$0xff] %vm752_vm4, %v2669_v42  ;;  %v1884_v7 = vrot.slane %v1883_v36, 4  ;;  %v1835_v22 = vrot.slane %v1834_v30, 4  ;;  %v1841_v59 = vsel %vm1553_vm5, %v1066_v25, -inf  ;;  %v1848_v63 = vsel %vm1553_vm5, %v1065_v19, -inf }
 0x15b   :  { %v1866_v57 = vmax.f32 %v1864_v33, %v1865_v51  ;;  %v1872_v53 = vrot.slane %v1871_v11, 2  ;;  %v1879_v62 = vrot.slane %v1878_v4, 2  ;;  %v1842_v61 = vrot.slane %v1841_v59, 4 }
 0x15c   :  { %v1885_v17 = vmax.f32 %v1883_v36, %v1884_v7  ;;  %v1836_v12 = vmax.f32 %v1834_v30, %v1835_v22  ;;  %v1849_v10 = vrot.slane %v1848_v63, 4  ;;  %v1855_v34 = vsel %vm1553_vm5, %v1067_v21, -inf }
 0x15d   :  { %v1867_v46 = vrot.slane %v1866_v57, 1  ;;  %v1873_v20 = vmax.f32 %v1871_v11, %v1872_v53  ;;  %v1880_v32 = vmax.f32 %v1878_v4, %v1879_v62  ;;  %v1843_v27 = vmax.f32 %v1841_v59, %v1842_v61 }
 0x15e   :  { %v1886_v60 = vrot.slane %v1885_v17, 2  ;;  %v1837_v26 = vrot.slane %v1836_v12, 2  ;;  %v1850_v40 = vmax.f32 %v1848_v63, %v1849_v10  ;;  %v1856_v23 = vrot.slane %v1855_v34, 4 }
 0x15f   :  { %v1868_v25 = vmax.f32 %v1866_v57, %v1867_v46  ;;  %v1874_v48 = vrot.slane %v1873_v20, 1  ;;  %v1881_v19 = vrot.slane %v1880_v32, 1  ;;  %v1844_v33 = vrot.slane %v1843_v27, 2 }
 0x160   :  { %v1887_v42 = vmax.f32 %v1885_v17, %v1886_v60  ;;  %v1838_v36 = vmax.f32 %v1836_v12, %v1837_v26  ;;  %v1851_v30 = vrot.slane %v1850_v40, 2  ;;  %v1857_v51 = vmax.f32 %v1855_v34, %v1856_v23  ;;  %v9582_v60 = vpop.f32.mrb[39].mxu0 }
 0x161   :  { %v1875_v7 = vmax.f32 %v1873_v20, %v1874_v48  ;;  %v1882_v21 = vmax.f32 %v1880_v32, %v1881_v19  ;;  %v1845_v22 = vmax.f32 %v1843_v27, %v1844_v33  ;;  %v789_v11 = vsel %vm752_vm4, %v712_v50, -inf  ;;  %v9578_v50 = vpop.f32.mrb[14].mxu1 }
 0x162   :  { %v1888_v4 = vrot.slane %v1887_v42, 1  ;;  %v1839_v59 = vrot.slane %v1838_v36, 1  ;;  %v1852_v53 = vmax.f32 %v1850_v40, %v1851_v30  ;;  %v1858_v63 = vrot.slane %v1857_v51, 2 }
 0x163   :  { %v1846_v62 = vrot.slane %v1845_v22, 1  ;;  %v822_v57 = vsel %vm752_vm4, %v733_v52, -inf  ;;  %v505_v61 = vadd.f32 %v9529_v28, %v9362_v13  ;;  %v605_v17 = vadd.f32 %v9529_v28, %v9235_v35 }
 0x164   :  { %v1889_v12 = vmax.f32 %v1887_v42, %v1888_v4  ;;  %v1840_v10 = vmax.f32 %v1838_v36, %v1839_v59  ;;  %v1853_v34 = vrot.slane %v1852_v53, 1  ;;  %v1859_v46 = vmax.f32 %v1857_v51, %v1858_v63 }
 0x165   :  { %v1847_v20 = vmax.f32 %v1845_v22, %v1846_v62  ;;  %v715_v32 = vmax.f32 %v505_v61, 0.0  ;;  %v735_v27 = vmax.f32 %v605_v17, 0.0  ;;  %v500_v44 = vadd.f32 %v9529_v28, %v9366_v39 }
 0x166   :  { %v1854_v52 = vmax.f32 %v1852_v53, %v1853_v34  ;;  %v1860_v26 = vrot.slane %v1859_v46, 1  ;;  %v600_v13 = vadd.f32 %v9529_v28, %v9279_v49  ;;  %v9588_v35 = vadd.f32 %v9529_v28, %v9371_v3 }
 0x167   :  { %v2670_v40 = vsel %vm2628_vm7, %v1847_v20, %v1840_v10  ;;  %v793_v23 = vsel %vm752_vm4, %v715_v32, -inf  ;;  %v823_v48 = vsel %vm752_vm4, %v735_v27, -inf  ;;  %v714_v19 = vmax.f32 %v500_v44, 0.0 }
 0x168   :  { %v1861_v33 = vmax.f32 %v1859_v46, %v1860_v26  ;;  %v2671_v39 = vsel %vm2630_vm8, %v1854_v52, %v2670_v40  ;;  %v794_v42 = vmax.f32 %v9539_v58, %v793_v23  ;;  %v824_v36 = vmax.f32 %v822_v57, %v823_v48 }
 0x169   :  { %v790_v30 = vsel %vm752_vm4, %v714_v19, -inf  ;;  %v734_v49 = vmax.f32 %v600_v13, 0.0  ;;  %v717_v51 = vmax.f32 %v9588_v35, 0.0  ;;  %v9599_v3 = vadd.f32 %v9529_v28, %v9375_v14 }
 0x16a   :  { %v2672_v22 = vsel %vm2632_vm9, %v1861_v33, %v2671_v39  ;;  %v1102_v4 = vcombine.high %v794_v42, %v794_v42  ;;  %v1109_v59 = vrot.slane %v794_v42, %v9233_v31  ;;  %v1272_v53 = vcombine.high %v824_v36, %v824_v36 }
 0x16b   :  { %v2673_v63 = vsel %vm2634_vm10, %v1868_v25, %v2672_v22  ;;  %v1279_v58 = vrot.slane %v824_v36, %v9233_v31  ;;  %v9605_v62 = vmax.f32 %v789_v11, %v790_v30  ;;  %v9608_v57 = vsel %vm752_vm4, %v734_v49, -inf }
 0x16c   :  { %v2674_v61 = vsel %vm2636_vm11, %v1875_v7, %v2673_v63  ;;  %v1116_v14 = vrot.slane %v1102_v4, %v9233_v31  ;;  %v1117_v17 = vcombine.high %v1109_v59, %v1109_v59  ;;  %v1918_v10 = vsel %vm1553_vm5, %v1109_v59, -inf }
 0x16d   :  { %v2675_v34 = vsel %vm2638_vm12, %v1882_v21, %v2674_v61  ;;  %v1919_v46 = vrot.slane %v1918_v10, 4  ;;  %v1286_v20 = vrot.slane %v1272_v53, %v9233_v31  ;;  %v1287_v25 = vcombine.high %v1279_v58, %v1279_v58 }
 0x16e   :  { %v2676_v32 = vsel %vm2640_vm13, %v1889_v12, %v2675_v34  ;;  %v1118_v11 = vcombine.high %v1116_v14, %v1116_v14  ;;  %v1925_v27 = vsel %vm1553_vm5, %v1117_v17, -inf  ;;  %v1932_v44 = vsel %vm1553_vm5, %v1116_v14, -inf  ;;  %v9624_v17 = vpop.f32.mrb[15].mxu1 }
 0x16f   :  { %2769 = vst.msk [vmem:[#allocation2 + $0x61] sm:$0xff] %vm752_vm4, %v2676_v32  ;;  %v1920_v7 = vmax.f32 %v1918_v10, %v1919_v46  ;;  %v1926_v52 = vrot.slane %v1925_v27, 4  ;;  %v1933_v26 = vrot.slane %v1932_v44, 4  ;;  %v1288_v13 = vcombine.high %v1286_v20, %v1286_v20  ;;  %11512 = vst [vmem:[#allocation6_spill] sm:$0xff] %v9624_v17 }
 0x170   :  { %v1939_v40 = vsel %vm1553_vm5, %v1118_v11, -inf  ;;  %v2198_v21 = vsel %vm1553_vm5, %v1279_v58, -inf  ;;  %v2205_v23 = vsel %vm1553_vm5, %v1287_v25, -inf  ;;  %v2212_v48 = vsel %vm1553_vm5, %v1286_v20, -inf }
 0x171   :  { %v1921_v12 = vrot.slane %v1920_v7, 2  ;;  %v1927_v19 = vmax.f32 %v1925_v27, %v1926_v52  ;;  %v1934_v33 = vmax.f32 %v1932_v44, %v1933_v26  ;;  %v1940_v39 = vrot.slane %v1939_v40, 4 }
 0x172   :  { %v2199_v42 = vrot.slane %v2198_v21, 4  ;;  %v2206_v36 = vrot.slane %v2205_v23, 4  ;;  %v2213_v30 = vrot.slane %v2212_v48, 4  ;;  %v2219_v49 = vsel %vm1553_vm5, %v1288_v13, -inf }
 0x173   :  { %v1922_v22 = vmax.f32 %v1920_v7, %v1921_v12  ;;  %v1928_v4 = vrot.slane %v1927_v19, 2  ;;  %v1935_v59 = vrot.slane %v1934_v33, 2  ;;  %v1941_v53 = vmax.f32 %v1939_v40, %v1940_v39 }
 0x174   :  { %v2200_v63 = vmax.f32 %v2198_v21, %v2199_v42  ;;  %v2207_v61 = vmax.f32 %v2205_v23, %v2206_v36  ;;  %v2214_v58 = vmax.f32 %v2212_v48, %v2213_v30  ;;  %v2220_v14 = vrot.slane %v2219_v49, 4 }
 0x175   :  { %v1923_v10 = vrot.slane %v1922_v22, 1  ;;  %v1929_v34 = vmax.f32 %v1927_v19, %v1928_v4  ;;  %v1936_v46 = vmax.f32 %v1934_v33, %v1935_v59  ;;  %v1942_v20 = vrot.slane %v1941_v53, 2 }
 0x176   :  { %v2201_v25 = vrot.slane %v2200_v63, 2  ;;  %v2208_v32 = vrot.slane %v2207_v61, 2  ;;  %v2215_v11 = vrot.slane %v2214_v58, 2  ;;  %v2221_v27 = vmax.f32 %v2219_v49, %v2220_v14 }
 0x177   :  { %v9626_v44 = vmax.f32 %v1922_v22, %v1923_v10  ;;  %v1930_v7 = vrot.slane %v1929_v34, 1  ;;  %v1937_v52 = vrot.slane %v1936_v46, 1  ;;  %v1943_v26 = vmax.f32 %v1941_v53, %v1942_v20  ;;  %v2792_v53 = vld [vmem:[#allocation2 + $0x50] sm:$0xff] }
 0x178   :  { %v2202_v13 = vmax.f32 %v2200_v63, %v2201_v25  ;;  %v2209_v40 = vmax.f32 %v2207_v61, %v2208_v32  ;;  %v2216_v21 = vmax.f32 %v2214_v58, %v2215_v11  ;;  %v2222_v23 = vrot.slane %v2221_v27, 2  ;;  %7677 = vmatmul.mubr.msk.f32.gmra.mrb[24].mxu1 %vm752_vm4, %v2792_v53 }
 0x179   :  { %v9628_v48 = vmax.f32 %v1929_v34, %v1930_v7  ;;  %v9630_v12 = vmax.f32 %v1936_v46, %v1937_v52  ;;  %v1944_v19 = vrot.slane %v1943_v26, 1  ;;  %v1085_v33 = vcombine.high %v9605_v62, %v9605_v62  ;;  %v9660_v52 = vpop.f32.mrb[40].mxu0 }
 0x17a   :  { %v2203_v39 = vrot.slane %v2202_v13, 1  ;;  %v2210_v42 = vrot.slane %v2209_v40, 1  ;;  %v2217_v36 = vrot.slane %v2216_v21, 1  ;;  %v2223_v30 = vmax.f32 %v2221_v27, %v2222_v23  ;;  %11513 = vst [vmem:[#allocation7_spill] sm:$0xff] %v9660_v52  ;;  %v9662_v23 = vpop.f32.mrb[41].mxu0 }
 0x17b   :  { %v9634_v49 = vmax.f32 %v1943_v26, %v1944_v19  ;;  %v1092_v22 = vrot.slane %v9605_v62, %v9233_v31  ;;  %v1099_v4 = vrot.slane %v1085_v33, %v9233_v31  ;;  %v821_v59 = vmax.f32 %v9247_v47, %v9608_v57  ;;  %11514 = vst [vmem:[#allocation8_spill] sm:$0xff] %v9662_v23 }
 0x17c   :  { %v9641_v63 = vmax.f32 %v2202_v13, %v2203_v39  ;;  %v9643_v61 = vmax.f32 %v2209_v40, %v2210_v42  ;;  %v9645_v58 = vmax.f32 %v2216_v21, %v2217_v36  ;;  %v2224_v14 = vrot.slane %v2223_v30, 1 }
 0x17d   :  { %v1100_v10 = vcombine.high %v1092_v22, %v1092_v22  ;;  %v1101_v34 = vcombine.high %v1099_v4, %v1099_v4  ;;  %v1890_v46 = vsel %vm1553_vm5, %v1092_v22, -inf  ;;  %v1904_v62 = vsel %vm1553_vm5, %v1099_v4, -inf }
 0x17e   :  { %v9650_v20 = vmax.f32 %v2223_v30, %v2224_v14  ;;  %v1891_v25 = vrot.slane %v1890_v46, 4  ;;  %v1905_v47 = vrot.slane %v1904_v62, 4  ;;  %v1255_v57 = vcombine.high %v821_v59, %v821_v59 }
 0x17f   :  { %v1897_v32 = vsel %vm1553_vm5, %v1100_v10, -inf  ;;  %v1911_v11 = vsel %vm1553_vm5, %v1101_v34, -inf  ;;  %v1262_v27 = vrot.slane %v821_v59, %v9233_v31  ;;  %v9658_v7 = vsel %vm752_vm4, %v717_v51, -inf }
 0x180   :  { %v1892_v26 = vmax.f32 %v1890_v46, %v1891_v25  ;;  %v1898_v13 = vrot.slane %v1897_v32, 4  ;;  %v1906_v40 = vmax.f32 %v1904_v62, %v1905_v47  ;;  %v1912_v21 = vrot.slane %v1911_v11, 4  ;;  %v9669_v62 = vpop.f32.mrb[42].mxu0 }
 0x181   :  { %v1269_v19 = vrot.slane %v1255_v57, %v9233_v31  ;;  %v1270_v33 = vcombine.high %v1262_v27, %v1262_v27  ;;  %v2170_v39 = vsel %vm1553_vm5, %v1262_v27, -inf  ;;  %v716_v42 = vmax.f32 %v9599_v3, 0.0  ;;  %11515 = vst [vmem:[#allocation9_spill] sm:$0xff] %v9669_v62 }
 0x182   :  { %v1893_v36 = vrot.slane %v1892_v26, 2  ;;  %v1899_v35 = vmax.f32 %v1897_v32, %v1898_v13  ;;  %v1907_v30 = vrot.slane %v1906_v40, 2  ;;  %v1913_v51 = vmax.f32 %v1911_v11, %v1912_v21 }
 0x183   :  { %v1271_v22 = vcombine.high %v1269_v19, %v1269_v19  ;;  %v2171_v4 = vrot.slane %v2170_v39, 4  ;;  %v2177_v59 = vsel %vm1553_vm5, %v1270_v33, -inf  ;;  %v2184_v53 = vsel %vm1553_vm5, %v1269_v19, -inf }
 0x184   :  { %v1894_v14 = vmax.f32 %v1892_v26, %v1893_v36  ;;  %v1900_v10 = vrot.slane %v1899_v35, 2  ;;  %v1908_v34 = vmax.f32 %v1906_v40, %v1907_v30  ;;  %v1914_v46 = vrot.slane %v1913_v51, 2 }
 0x185   :  { %v2172_v25 = vmax.f32 %v2170_v39, %v2171_v4  ;;  %v2178_v47 = vrot.slane %v2177_v59, 4  ;;  %v2185_v57 = vrot.slane %v2184_v53, 4  ;;  %v2191_v3 = vsel %vm1553_vm5, %v1271_v22, -inf }
 0x186   :  { %v1895_v32 = vrot.slane %v1894_v14, 1  ;;  %v1901_v27 = vmax.f32 %v1899_v35, %v1900_v10  ;;  %v1909_v11 = vrot.slane %v1908_v34, 1  ;;  %v1915_v13 = vmax.f32 %v1913_v51, %v1914_v46 }
 0x187   :  { %v2173_v21 = vrot.slane %v2172_v25, 2  ;;  %v2179_v9 = vmax.f32 %v2177_v59, %v2178_v47  ;;  %v2186_v33 = vmax.f32 %v2184_v53, %v2185_v57  ;;  %v2192_v23 = vrot.slane %v2191_v3, 4 }
 0x188   :  { %v1896_v19 = vmax.f32 %v1894_v14, %v1895_v32  ;;  %v1902_v26 = vrot.slane %v1901_v27, 1  ;;  %v1910_v36 = vmax.f32 %v1908_v34, %v1909_v11  ;;  %v1916_v40 = vrot.slane %v1915_v13, 1 }
 0x189   :  { %v2174_v30 = vmax.f32 %v2172_v25, %v2173_v21  ;;  %v2180_v52 = vrot.slane %v2179_v9, 2  ;;  %v2187_v62 = vrot.slane %v2186_v33, 2  ;;  %v2193_v39 = vmax.f32 %v2191_v3, %v2192_v23  ;;  %v9680_v25 = vpop.f32.mrb[43].mxu0 }
 0x18a   :  { %v1903_v4 = vmax.f32 %v1901_v27, %v1902_v26  ;;  %v1917_v17 = vmax.f32 %v1915_v13, %v1916_v40  ;;  %v795_v22 = vsel %vm752_vm4, %v716_v42, -inf  ;;  %v615_v35 = vadd.f32 %v9529_v28, %v9336_v6 }
 0x18b   :  { %v2175_v51 = vrot.slane %v2174_v30, 1  ;;  %v2181_v10 = vmax.f32 %v2179_v9, %v2180_v52  ;;  %v2188_v59 = vmax.f32 %v2186_v33, %v2187_v62  ;;  %v2194_v53 = vrot.slane %v2193_v39, 2 }
 0x18c   :  { %v2677_v14 = vsel %vm2628_vm7, %v1903_v4, %v1896_v19  ;;  %v737_v46 = vmax.f32 %v615_v35, 0.0  ;;  %v610_v34 = vadd.f32 %v9529_v28, %v9341_v37  ;;  %v525_v23 = vadd.f32 %v9529_v28, %v9384_v29 }
 0x18d   :  { %v2678_v42 = vsel %vm2630_vm8, %v1910_v36, %v2677_v14  ;;  %v2176_v47 = vmax.f32 %v2174_v30, %v2175_v51  ;;  %v2182_v57 = vrot.slane %v2181_v10, 1  ;;  %v2189_v6 = vrot.slane %v2188_v59, 1 }
 0x18e   :  { %v2679_v9 = vsel %vm2632_vm9, %v1917_v17, %v2678_v42  ;;  %v2195_v52 = vmax.f32 %v2193_v39, %v2194_v53  ;;  %v828_v62 = vsel %vm752_vm4, %v737_v46, -inf  ;;  %v736_v3 = vmax.f32 %v610_v34, 0.0  ;;  %v2793_v39 = vld [vmem:[#allocation2 + $0x60] sm:$0xff] }
 0x18f   :  { %v2680_v32 = vsel %vm2634_vm10, %v9626_v44, %v2679_v9  ;;  %v2183_v37 = vmax.f32 %v2181_v10, %v2182_v57  ;;  %v2190_v27 = vmax.f32 %v2188_v59, %v2189_v6  ;;  %v719_v11 = vmax.f32 %v525_v23, 0.0  ;;  %7679 = vmatprep.mubr.msk.f32.mxu1 %vm752_vm4, %v2793_v39 }
 0x190   :  { %v2681_v29 = vsel %vm2636_vm11, %v9628_v48, %v2680_v32  ;;  %v2196_v13 = vrot.slane %v2195_v52, 1  ;;  %v9690_v21 = vsel %vm752_vm4, %v736_v3, -inf  ;;  %v625_v17 = vadd.f32 %v9529_v28, %v9358_v16 }
 0x191   :  { %v2682_v33 = vsel %vm2638_vm12, %v9630_v12, %v2681_v29  ;;  %v2712_v19 = vsel %vm2628_vm7, %v2183_v37, %v2176_v47  ;;  %v799_v44 = vsel %vm752_vm4, %v719_v11, -inf  ;;  %v520_v26 = vadd.f32 %v9529_v28, %v9389_v41 }
 0x192   :  { %v2683_v48 = vsel %vm2640_vm13, %v9634_v49, %v2682_v33  ;;  %v2197_v36 = vmax.f32 %v2195_v52, %v2196_v13  ;;  %v2713_v40 = vsel %vm2630_vm8, %v2190_v27, %v2712_v19  ;;  %v800_v30 = vmax.f32 %v9658_v7, %v799_v44 }
 0x193   :  { %2770 = vst.msk [vmem:[#allocation2 + $0x71] sm:$0xff] %vm752_vm4, %v2683_v48  ;;  %v739_v16 = vmax.f32 %v625_v17, 0.0  ;;  %v718_v12 = vmax.f32 %v520_v26, 0.0  ;;  %v9707_v4 = vadd.f32 %v9529_v28, %v9403_v8  ;;  %v9711_v41 = vadd.f32 %v9529_v28, %v9434_v45 }
 0x194   :  { %v2714_v49 = vsel %vm2632_vm9, %v2197_v36, %v2713_v40  ;;  %v1136_v35 = vcombine.high %v800_v30, %v800_v30  ;;  %v1143_v7 = vrot.slane %v800_v30, %v9233_v31  ;;  %v9718_v51 = vadd.f32 %v9529_v28, %v9439_v54 }
 0x195   :  { %v2715_v10 = vsel %vm2634_vm10, %v9641_v63, %v2714_v49  ;;  %v829_v8 = vsel %vm752_vm4, %v739_v16, -inf  ;;  %v796_v59 = vsel %vm752_vm4, %v718_v12, -inf  ;;  %v738_v45 = vmax.f32 %v9707_v4, 0.0 }
 0x196   :  { %v2716_v53 = vsel %vm2636_vm11, %v9643_v61, %v2715_v10  ;;  %v1150_v14 = vrot.slane %v1136_v35, %v9233_v31  ;;  %v1151_v46 = vcombine.high %v1143_v7, %v1143_v7  ;;  %v1974_v34 = vsel %vm1553_vm5, %v1143_v7, -inf }
 0x197   :  { %v2717_v54 = vsel %vm2638_vm12, %v9645_v58, %v2716_v53  ;;  %v1975_v23 = vrot.slane %v1974_v34, 4  ;;  %v830_v42 = vmax.f32 %v828_v62, %v829_v8  ;;  %v797_v63 = vmax.f32 %v795_v22, %v796_v59 }
 0x198   :  { %v2718_v47 = vsel %vm2640_vm13, %v9650_v20, %v2717_v54  ;;  %v1152_v57 = vcombine.high %v1150_v14, %v1150_v14  ;;  %v1981_v6 = vsel %vm1553_vm5, %v1151_v46, -inf  ;;  %v1988_v9 = vsel %vm1553_vm5, %v1150_v14, -inf }
 0x199   :  { %2775 = vst.msk [vmem:[#allocation2 + $0xe1] sm:$0xff] %vm752_vm4, %v2718_v47  ;;  %v1976_v61 = vmax.f32 %v1974_v34, %v1975_v23  ;;  %v1982_v52 = vrot.slane %v1981_v6, 4  ;;  %v1989_v3 = vrot.slane %v1988_v9, 4  ;;  %v1306_v32 = vcombine.high %v830_v42, %v830_v42 }
 0x19a   :  { %v1995_v37 = vsel %vm1553_vm5, %v1152_v57, -inf  ;;  %v1313_v58 = vrot.slane %v830_v42, %v9233_v31  ;;  %v1119_v62 = vcombine.high %v797_v63, %v797_v63  ;;  %v1126_v22 = vrot.slane %v797_v63, %v9233_v31  ;;  %v2794_v27 = vld [vmem:[#allocation2 + $0x70] sm:$0xff] }
 0x19b   :  { %v1977_v20 = vrot.slane %v1976_v61, 2  ;;  %v1983_v11 = vmax.f32 %v1981_v6, %v1982_v52  ;;  %v1990_v29 = vmax.f32 %v1988_v9, %v1989_v3  ;;  %v1996_v13 = vrot.slane %v1995_v37, 4  ;;  %7680 = vmatmul.mubr.msk.f32.gmra.mrb[26].mxu1 %vm752_vm4, %v2794_v27 }
 0x19c   :  { %v1320_v17 = vrot.slane %v1306_v32, %v9233_v31  ;;  %v1321_v33 = vcombine.high %v1313_v58, %v1313_v58  ;;  %v2254_v19 = vsel %vm1553_vm5, %v1313_v58, -inf  ;;  %v1133_v44 = vrot.slane %v1119_v62, %v9233_v31 }
 0x19d   :  { %v1978_v26 = vmax.f32 %v1976_v61, %v1977_v20  ;;  %v1984_v48 = vrot.slane %v1983_v11, 2  ;;  %v1991_v36 = vrot.slane %v1990_v29, 2  ;;  %v1997_v40 = vmax.f32 %v1995_v37, %v1996_v13 }
 0x19e   :  { %v1322_v30 = vcombine.high %v1320_v17, %v1320_v17  ;;  %v2255_v39 = vrot.slane %v2254_v19, 4  ;;  %v2261_v16 = vsel %vm1553_vm5, %v1321_v33, -inf  ;;  %v2268_v12 = vsel %vm1553_vm5, %v1320_v17, -inf }
 0x19f   :  { %v1979_v49 = vrot.slane %v1978_v26, 1  ;;  %v1985_v35 = vmax.f32 %v1983_v11, %v1984_v48  ;;  %v1992_v7 = vmax.f32 %v1990_v29, %v1991_v36  ;;  %v1998_v10 = vrot.slane %v1997_v40, 2 }
 0x1a0   :  { %v2256_v8 = vmax.f32 %v2254_v19, %v2255_v39  ;;  %v2262_v59 = vrot.slane %v2261_v16, 4  ;;  %v2269_v53 = vrot.slane %v2268_v12, 4  ;;  %v2275_v14 = vsel %vm1553_vm5, %v1322_v30, -inf }
 0x1a1   :  { %v9746_v46 = vmax.f32 %v1978_v26, %v1979_v49  ;;  %v1986_v34 = vrot.slane %v1985_v35, 1  ;;  %v1993_v54 = vrot.slane %v1992_v7, 1  ;;  %v1999_v23 = vmax.f32 %v1997_v40, %v1998_v10 }
 0x1a2   :  { %v2257_v42 = vrot.slane %v2256_v8, 2  ;;  %v2263_v63 = vmax.f32 %v2261_v16, %v2262_v59  ;;  %v2270_v47 = vmax.f32 %v2268_v12, %v2269_v53  ;;  %v2276_v57 = vrot.slane %v2275_v14, 4 }
 0x1a3   :  { %v9748_v6 = vmax.f32 %v1985_v35, %v1986_v34  ;;  %v9750_v9 = vmax.f32 %v1992_v7, %v1993_v54  ;;  %v2000_v61 = vrot.slane %v1999_v23, 1  ;;  %v1134_v52 = vcombine.high %v1126_v22, %v1126_v22  ;;  %v2795_v7 = vld [vmem:[#allocation2 + $0xa0] sm:$0xff] }
 0x1a4   :  { %v2258_v3 = vmax.f32 %v2256_v8, %v2257_v42  ;;  %v2264_v32 = vrot.slane %v2263_v63, 2  ;;  %v2271_v37 = vrot.slane %v2270_v47, 2  ;;  %v2277_v58 = vmax.f32 %v2275_v14, %v2276_v57  ;;  %7682 = vmatprep.mubr.msk.f32.mxu1 %vm752_vm4, %v2795_v7 }
 0x1a5   :  { %v9752_v62 = vmax.f32 %v1999_v23, %v2000_v61  ;;  %v1135_v27 = vcombine.high %v1133_v44, %v1133_v44  ;;  %v1946_v20 = vsel %vm1553_vm5, %v1126_v22, -inf  ;;  %v1953_v11 = vsel %vm1553_vm5, %v1134_v52, -inf }
 0x1a6   :  { %v2259_v29 = vrot.slane %v2258_v3, 1  ;;  %v2265_v13 = vmax.f32 %v2263_v63, %v2264_v32  ;;  %v2272_v17 = vmax.f32 %v2270_v47, %v2271_v37  ;;  %v2278_v33 = vrot.slane %v2277_v58, 2 }
 0x1a7   :  { %v1947_v19 = vrot.slane %v1946_v20, 4  ;;  %v1954_v26 = vrot.slane %v1953_v11, 4  ;;  %v1960_v48 = vsel %vm1553_vm5, %v1133_v44, -inf  ;;  %v1967_v36 = vsel %vm1553_vm5, %v1135_v27, -inf }
 0x1a8   :  { %v9758_v40 = vmax.f32 %v2258_v3, %v2259_v29  ;;  %v2266_v30 = vrot.slane %v2265_v13, 1  ;;  %v2273_v39 = vrot.slane %v2272_v17, 1  ;;  %v2279_v16 = vmax.f32 %v2277_v58, %v2278_v33 }
 0x1a9   :  { %v1948_v12 = vmax.f32 %v1946_v20, %v1947_v19  ;;  %v1955_v49 = vmax.f32 %v1953_v11, %v1954_v26  ;;  %v1961_v22 = vrot.slane %v1960_v48, 4  ;;  %v1968_v35 = vrot.slane %v1967_v36, 4 }
 0x1aa   :  { %v9760_v10 = vmax.f32 %v2265_v13, %v2266_v30  ;;  %v9762_v8 = vmax.f32 %v2272_v17, %v2273_v39  ;;  %v2280_v59 = vrot.slane %v2279_v16, 1  ;;  %v826_v44 = vsel %vm752_vm4, %v738_v45, -inf }
 0x1ab   :  { %v1949_v53 = vrot.slane %v1948_v12, 2  ;;  %v1956_v14 = vrot.slane %v1955_v49, 2  ;;  %v1962_v34 = vmax.f32 %v1960_v48, %v1961_v22  ;;  %v1969_v54 = vmax.f32 %v1967_v36, %v1968_v35 }
 0x1ac   :  { %v9768_v23 = vmax.f32 %v2279_v16, %v2280_v59  ;;  %v827_v42 = vmax.f32 %v9690_v21, %v826_v44  ;;  %v721_v63 = vmax.f32 %v9711_v41, 0.0  ;;  %v720_v47 = vmax.f32 %v9718_v51, 0.0 }
 0x1ad   :  { %v1950_v57 = vmax.f32 %v1948_v12, %v1949_v53  ;;  %v1957_v61 = vmax.f32 %v1955_v49, %v1956_v14  ;;  %v1963_v52 = vrot.slane %v1962_v34, 2  ;;  %v1970_v4 = vrot.slane %v1969_v54, 2 }
 0x1ae   :  { %v1289_v3 = vcombine.high %v827_v42, %v827_v42  ;;  %v1296_v45 = vrot.slane %v827_v42, %v9233_v31  ;;  %v804_v32 = vsel %vm752_vm4, %v721_v63, -inf  ;;  %v9776_v37 = vsel %vm752_vm4, %v720_v47, -inf }
 0x1af   :  { %v1951_v58 = vrot.slane %v1950_v57, 1  ;;  %v1958_v27 = vrot.slane %v1957_v61, 1  ;;  %v1964_v20 = vmax.f32 %v1962_v34, %v1963_v52  ;;  %v1971_v21 = vmax.f32 %v1969_v54, %v1970_v4 }
 0x1b0   :  { %v1303_v41 = vrot.slane %v1289_v3, %v9233_v31  ;;  %v1304_v11 = vcombine.high %v1296_v45, %v1296_v45  ;;  %v2226_v51 = vsel %vm1553_vm5, %v1296_v45, -inf  ;;  %v635_v29 = vadd.f32 %v9529_v28, %v9444_v0 }
 0x1b1   :  { %v1952_v13 = vmax.f32 %v1950_v57, %v1951_v58  ;;  %v1959_v17 = vmax.f32 %v1957_v61, %v1958_v27  ;;  %v1965_v33 = vrot.slane %v1964_v20, 1  ;;  %v1972_v19 = vrot.slane %v1971_v21, 1 }
 0x1b2   :  { %v1305_v26 = vcombine.high %v1303_v41, %v1303_v41  ;;  %v2227_v48 = vrot.slane %v2226_v51, 4  ;;  %v2233_v36 = vsel %vm1553_vm5, %v1304_v11, -inf  ;;  %v2240_v30 = vsel %vm1553_vm5, %v1303_v41, -inf }
 0x1b3   :  { %v1966_v39 = vmax.f32 %v1964_v20, %v1965_v33  ;;  %v1973_v16 = vmax.f32 %v1971_v21, %v1972_v19  ;;  %v2684_v12 = vsel %vm2628_vm7, %v1959_v17, %v1952_v13  ;;  %v2234_v49 = vrot.slane %v2233_v36, 4 }
 0x1b4   :  { %v2228_v22 = vmax.f32 %v2226_v51, %v2227_v48  ;;  %v2241_v35 = vrot.slane %v2240_v30, 4  ;;  %v2247_v7 = vsel %vm1553_vm5, %v1305_v26, -inf  ;;  %v741_v0 = vmax.f32 %v635_v29, 0.0 }
 0x1b5   :  { %v2685_v59 = vsel %vm2630_vm8, %v1966_v39, %v2684_v12  ;;  %v2235_v44 = vmax.f32 %v2233_v36, %v2234_v49  ;;  %v2248_v53 = vrot.slane %v2247_v7, 4  ;;  %v630_v14 = vadd.f32 %v9529_v28, %v9449_v56 }
 0x1b6   :  { %v2686_v34 = vsel %vm2632_vm9, %v1973_v16, %v2685_v59  ;;  %v2229_v54 = vrot.slane %v2228_v22, 2  ;;  %v2242_v42 = vmax.f32 %v2240_v30, %v2241_v35  ;;  %v834_v63 = vsel %vm752_vm4, %v741_v0, -inf }
 0x1b7   :  { %v2687_v47 = vsel %vm2634_vm10, %v9746_v46, %v2686_v34  ;;  %v2236_v57 = vrot.slane %v2235_v44, 2  ;;  %v2249_v61 = vmax.f32 %v2247_v7, %v2248_v53  ;;  %v740_v52 = vmax.f32 %v630_v14, 0.0 }
 0x1b8   :  { %v2688_v4 = vsel %vm2636_vm11, %v9748_v6, %v2687_v47  ;;  %v2230_v3 = vmax.f32 %v2228_v22, %v2229_v54  ;;  %v2243_v45 = vrot.slane %v2242_v42, 2  ;;  %v545_v56 = vadd.f32 %v9529_v28, %v9460_v5 }
 0x1b9   :  { %v2689_v58 = vsel %vm2638_vm12, %v9750_v9, %v2688_v4  ;;  %v2237_v27 = vmax.f32 %v2235_v44, %v2236_v57  ;;  %v2250_v20 = vrot.slane %v2249_v61, 2  ;;  %v9800_v21 = vsel %vm752_vm4, %v740_v52, -inf }
 0x1ba   :  { %v2690_v46 = vsel %vm2640_vm13, %v9752_v62, %v2689_v58  ;;  %v2231_v41 = vrot.slane %v2230_v3, 1  ;;  %v2244_v11 = vmax.f32 %v2242_v42, %v2243_v45  ;;  %v723_v51 = vmax.f32 %v545_v56, 0.0 }
 0x1bb   :  { %2771 = vst.msk [vmem:[#allocation2 + $0x81] sm:$0xff] %vm752_vm4, %v2690_v46  ;;  %v2238_v6 = vrot.slane %v2237_v27, 1  ;;  %v2251_v29 = vmax.f32 %v2249_v61, %v2250_v20  ;;  %v645_v5 = vadd.f32 %v9529_v28, %v9472_v2  ;;  %v540_v9 = vadd.f32 %v9529_v28, %v9477_v15 }
 0x1bc   :  { %v2232_v13 = vmax.f32 %v2230_v3, %v2231_v41  ;;  %v2245_v17 = vrot.slane %v2244_v11, 1  ;;  %v805_v33 = vsel %vm752_vm4, %v723_v51, -inf  ;;  %v640_v62 = vadd.f32 %v9529_v28, %v9516_v55 }
 0x1bd   :  { %v2239_v19 = vmax.f32 %v2237_v27, %v2238_v6  ;;  %v2252_v26 = vrot.slane %v2251_v29, 1  ;;  %v806_v48 = vmax.f32 %v804_v32, %v805_v33  ;;  %v743_v36 = vmax.f32 %v645_v5, 0.0 }
 0x1be   :  { %v2246_v30 = vmax.f32 %v2244_v11, %v2245_v17  ;;  %v722_v39 = vmax.f32 %v540_v9, 0.0  ;;  %v742_v16 = vmax.f32 %v640_v62, 0.0  ;;  %v9814_v2 = vadd.f32 %v9529_v28, %v9546_v18 }
 0x1bf   :  { %v2253_v12 = vmax.f32 %v2251_v29, %v2252_v26  ;;  %v2719_v15 = vsel %vm2628_vm7, %v2239_v19, %v2232_v13  ;;  %v1170_v49 = vcombine.high %v806_v48, %v806_v48  ;;  %v1177_v22 = vrot.slane %v806_v48, %v9233_v31 }
 0x1c0   :  { %v2720_v35 = vsel %vm2630_vm8, %v2246_v30, %v2719_v15  ;;  %v835_v55 = vsel %vm752_vm4, %v743_v36, -inf  ;;  %v802_v32 = vsel %vm752_vm4, %v722_v39, -inf  ;;  %v9822_v7 = vsel %vm752_vm4, %v742_v16, -inf }
 0x1c1   :  { %v2721_v0 = vsel %vm2632_vm9, %v2253_v12, %v2720_v35  ;;  %v1184_v28 = vrot.slane %v1170_v49, %v9233_v31  ;;  %v1185_v18 = vcombine.high %v1177_v22, %v1177_v22  ;;  %v2030_v59 = vsel %vm1553_vm5, %v1177_v22, -inf }
 0x1c2   :  { %v2722_v44 = vsel %vm2634_vm10, %v9758_v40, %v2721_v0  ;;  %v2031_v53 = vrot.slane %v2030_v59, 4  ;;  %v836_v14 = vmax.f32 %v834_v63, %v835_v55  ;;  %v803_v34 = vmax.f32 %v9776_v37, %v802_v32 }
 0x1c3   :  { %v2723_v54 = vsel %vm2636_vm11, %v9760_v10, %v2722_v44  ;;  %v1186_v42 = vcombine.high %v1184_v28, %v1184_v28  ;;  %v2037_v47 = vsel %vm1553_vm5, %v1185_v18, -inf  ;;  %v2044_v57 = vsel %vm1553_vm5, %v1184_v28, -inf }
 0x1c4   :  { %v2724_v61 = vsel %vm2638_vm12, %v9762_v8, %v2723_v54  ;;  %v2032_v52 = vmax.f32 %v2030_v59, %v2031_v53  ;;  %v2038_v4 = vrot.slane %v2037_v47, 4  ;;  %v2045_v3 = vrot.slane %v2044_v57, 4 }
 0x1c5   :  { %v2725_v40 = vsel %vm2640_vm13, %v9768_v23, %v2724_v61  ;;  %v2051_v63 = vsel %vm1553_vm5, %v1186_v42, -inf  ;;  %v1340_v37 = vcombine.high %v836_v14, %v836_v14  ;;  %v1347_v45 = vrot.slane %v836_v14, %v9233_v31 }
 0x1c6   :  { %2776 = vst.msk [vmem:[#allocation2 + $0xf1] sm:$0xff] %vm752_vm4, %v2725_v40  ;;  %v2033_v10 = vrot.slane %v2032_v52, 2  ;;  %v2039_v56 = vmax.f32 %v2037_v47, %v2038_v4  ;;  %v2046_v58 = vmax.f32 %v2044_v57, %v2045_v3  ;;  %v2052_v27 = vrot.slane %v2051_v63, 4 }
 0x1c7   :  { %v1354_v20 = vrot.slane %v1340_v37, %v9233_v31  ;;  %v1355_v8 = vcombine.high %v1347_v45, %v1347_v45  ;;  %v2310_v46 = vsel %vm1553_vm5, %v1347_v45, -inf  ;;  %v1153_v41 = vcombine.high %v803_v34, %v803_v34 }
 0x1c8   :  { %v2034_v11 = vmax.f32 %v2032_v52, %v2033_v10  ;;  %v2040_v51 = vrot.slane %v2039_v56, 2  ;;  %v2047_v23 = vrot.slane %v2046_v58, 2  ;;  %v2053_v6 = vmax.f32 %v2051_v63, %v2052_v27 }
 0x1c9   :  { %v1356_v29 = vcombine.high %v1354_v20, %v1354_v20  ;;  %v2311_v5 = vrot.slane %v2310_v46, 4  ;;  %v2317_v9 = vsel %vm1553_vm5, %v1355_v8, -inf  ;;  %v2324_v13 = vsel %vm1553_vm5, %v1354_v20, -inf }
 0x1ca   :  { %v2035_v17 = vrot.slane %v2034_v11, 1  ;;  %v2041_v33 = vmax.f32 %v2039_v56, %v2040_v51  ;;  %v2048_v62 = vmax.f32 %v2046_v58, %v2047_v23  ;;  %v2054_v19 = vrot.slane %v2053_v6, 2 }
 0x1cb   :  { %v2312_v26 = vmax.f32 %v2310_v46, %v2311_v5  ;;  %v2318_v48 = vrot.slane %v2317_v9, 4  ;;  %v2325_v36 = vrot.slane %v2324_v13, 4  ;;  %v2331_v30 = vsel %vm1553_vm5, %v1356_v29, -inf }
 0x1cc   :  { %v9846_v39 = vmax.f32 %v2034_v11, %v2035_v17  ;;  %v2042_v16 = vrot.slane %v2041_v33, 1  ;;  %v2049_v12 = vrot.slane %v2048_v62, 1  ;;  %v2055_v15 = vmax.f32 %v2053_v6, %v2054_v19 }
 0x1cd   :  { %v2313_v49 = vrot.slane %v2312_v26, 2  ;;  %v2319_v22 = vmax.f32 %v2317_v9, %v2318_v48  ;;  %v2326_v35 = vmax.f32 %v2324_v13, %v2325_v36  ;;  %v2332_v55 = vrot.slane %v2331_v30, 4 }
 0x1ce   :  { %v9848_v32 = vmax.f32 %v2041_v33, %v2042_v16  ;;  %v9850_v0 = vmax.f32 %v2048_v62, %v2049_v12  ;;  %v2056_v28 = vrot.slane %v2055_v15, 1  ;;  %v1160_v18 = vrot.slane %v803_v34, %v9233_v31  ;;  %v9874_v62 = vld [vmem:[%s11496_s2] ss:$0 sm:$0xff]  ;;  %s6766_s2 = sshll.u32 %s8801_s20, 4  ;;  %s6767_s2 = int_to_ptr.vmem [resolvable:$true] %s6766_s2 }
 0x1cf   :  { %v2314_v59 = vmax.f32 %v2312_v26, %v2313_v49  ;;  %v2320_v44 = vrot.slane %v2319_v22, 2  ;;  %v2327_v53 = vrot.slane %v2326_v35, 2  ;;  %v2333_v14 = vmax.f32 %v2331_v30, %v2332_v55  ;;  %p8777_p1 = scmp.lt.s32.totalorder %s6767_s2, %s6767_s2 }
 0x1d0   :  { %v9853_v54 = vmax.f32 %v2055_v15, %v2056_v28  ;;  %v1167_v42 = vrot.slane %v1153_v41, %v9233_v31  ;;  %v1168_v47 = vcombine.high %v1160_v18, %v1160_v18  ;;  %v2002_v57 = vsel %vm1553_vm5, %v1160_v18, -inf }
 0x1d1   :  { %v2315_v61 = vrot.slane %v2314_v59, 1  ;;  %v2321_v52 = vmax.f32 %v2319_v22, %v2320_v44  ;;  %v2328_v4 = vmax.f32 %v2326_v35, %v2327_v53  ;;  %v2334_v3 = vrot.slane %v2333_v14, 2 }
 0x1d2   :  { %v1169_v40 = vcombine.high %v1167_v42, %v1167_v42  ;;  %v2003_v63 = vrot.slane %v2002_v57, 4  ;;  %v2009_v37 = vsel %vm1553_vm5, %v1168_v47, -inf  ;;  %v2016_v34 = vsel %vm1553_vm5, %v1167_v42, -inf }
 0x1d3   :  { %v9859_v45 = vmax.f32 %v2314_v59, %v2315_v61  ;;  %v2322_v10 = vrot.slane %v2321_v52, 1  ;;  %v2329_v56 = vrot.slane %v2328_v4, 1  ;;  %v2335_v58 = vmax.f32 %v2333_v14, %v2334_v3 }
 0x1d4   :  { %v2004_v27 = vmax.f32 %v2002_v57, %v2003_v63  ;;  %v2010_v20 = vrot.slane %v2009_v37, 4  ;;  %v2017_v8 = vrot.slane %v2016_v34, 4  ;;  %v2023_v46 = vsel %vm1553_vm5, %v1169_v40, -inf }
 0x1d5   :  { %v9862_v41 = vmax.f32 %v2321_v52, %v2322_v10  ;;  %v9864_v11 = vmax.f32 %v2328_v4, %v2329_v56  ;;  %v2336_v51 = vrot.slane %v2335_v58, 1  ;;  %v2024_v23 = vrot.slane %v2023_v46, 4 }
 0x1d6   :  { %v2005_v6 = vrot.slane %v2004_v27, 2  ;;  %v2011_v29 = vmax.f32 %v2009_v37, %v2010_v20  ;;  %v2018_v5 = vmax.f32 %v2016_v34, %v2017_v8  ;;  %v833_v9 = vmax.f32 %v9800_v21, %v9822_v7 }
 0x1d7   :  { %v9868_v13 = vmax.f32 %v2335_v58, %v2336_v51  ;;  %v2025_v17 = vmax.f32 %v2023_v46, %v2024_v23  ;;  %v725_v33 = vmax.f32 %v9814_v2, 0.0  ;;  %v550_v19 = vadd.f32 %v9874_v62, %v9550_v1 }
 0x1d8   :  { %v2006_v26 = vmax.f32 %v2004_v27, %v2005_v6  ;;  %v2012_v48 = vrot.slane %v2011_v29, 2  ;;  %v2019_v36 = vrot.slane %v2018_v5, 2  ;;  %v1323_v30 = vcombine.high %v833_v9, %v833_v9 }
 0x1d9   :  { %v2026_v16 = vrot.slane %v2025_v17, 2  ;;  %v1330_v21 = vrot.slane %v833_v9, %v9233_v31  ;;  %v9880_v7 = vsel %vm752_vm4, %v725_v33, -inf  ;;  %v724_v12 = vmax.f32 %v550_v19, 0.0 }
 0x1da   :  { %v2007_v2 = vrot.slane %v2006_v26, 1  ;;  %v2013_v15 = vmax.f32 %v2011_v29, %v2012_v48  ;;  %v2020_v49 = vmax.f32 %v2018_v5, %v2019_v36  ;;  %v1337_v22 = vrot.slane %v1323_v30, %v9233_v31 }
 0x1db   :  { %v2027_v35 = vmax.f32 %v2025_v17, %v2026_v16  ;;  %v1338_v55 = vcombine.high %v1330_v21, %v1330_v21  ;;  %v2282_v1 = vsel %vm1553_vm5, %v1330_v21, -inf  ;;  %v9885_v28 = vsel %vm752_vm4, %v724_v12, -inf }
 0x1dc   :  { %v2008_v18 = vmax.f32 %v2006_v26, %v2007_v2  ;;  %v2014_v59 = vrot.slane %v2013_v15, 1  ;;  %v2021_v44 = vrot.slane %v2020_v49, 1  ;;  %v1339_v53 = vcombine.high %v1337_v22, %v1337_v22 }
 0x1dd   :  { %v2028_v14 = vrot.slane %v2027_v35, 1  ;;  %v2283_v42 = vrot.slane %v2282_v1, 4  ;;  %v2289_v47 = vsel %vm1553_vm5, %v1338_v55, -inf  ;;  %v2296_v57 = vsel %vm1553_vm5, %v1337_v22, -inf }
 0x1de   :  { %v2015_v61 = vmax.f32 %v2013_v15, %v2014_v59  ;;  %v2022_v52 = vmax.f32 %v2020_v49, %v2021_v44  ;;  %v2290_v4 = vrot.slane %v2289_v47, 4  ;;  %v2297_v3 = vrot.slane %v2296_v57, 4 }
 0x1df   :  { %v2029_v40 = vmax.f32 %v2027_v35, %v2028_v14  ;;  %v2284_v63 = vmax.f32 %v2282_v1, %v2283_v42  ;;  %v2303_v37 = vsel %vm1553_vm5, %v1339_v53, -inf  ;;  %v655_v34 = vadd.f32 %v9874_v62, %v9556_v38  ;;  %v9916_v35 = vpop.f32.mrb[16].mxu1  ;;  %v11517_v42 = vld [vmem:[#allocation7_spill] sm:$0xff] }
 0x1e0   :  { %v2691_v10 = vsel %vm2628_vm7, %v2015_v61, %v2008_v18  ;;  %v2291_v56 = vmax.f32 %v2289_v47, %v2290_v4  ;;  %v2298_v58 = vmax.f32 %v2296_v57, %v2297_v3  ;;  %v2304_v27 = vrot.slane %v2303_v37, 4  ;;  %v11516_v18 = vld [vmem:[#allocation6_spill] sm:$0xff]  ;;  %v9920_v59 = vpop.f32.mrb[17].mxu1 }
 0x1e1   :  { %v2692_v20 = vsel %vm2630_vm8, %v2022_v52, %v2691_v10  ;;  %v2285_v8 = vrot.slane %v2284_v63, 2  ;;  %v745_v46 = vmax.f32 %v655_v34, 0.0  ;;  %v650_v51 = vadd.f32 %v9874_v62, %v9561_v43  ;;  %v9925_v47 = vpop.f32.mrb[18].mxu1 }
 0x1e2   :  { %v2693_v23 = vsel %vm2632_vm9, %v2029_v40, %v2692_v20  ;;  %v2292_v6 = vrot.slane %v2291_v56, 2  ;;  %v2299_v29 = vrot.slane %v2298_v58, 2  ;;  %v2305_v5 = vmax.f32 %v2303_v37, %v2304_v27  ;;  %v9929_v4 = vpop.f32.mrb[19].mxu1 }
 0x1e3   :  { %v2694_v38 = vsel %vm2634_vm10, %v9846_v39, %v2693_v23  ;;  %v2286_v9 = vmax.f32 %v2284_v63, %v2285_v8  ;;  %v840_v17 = vsel %vm752_vm4, %v745_v46, -inf  ;;  %v744_v33 = vmax.f32 %v650_v51, 0.0 }
 0x1e4   :  { %v2695_v19 = vsel %vm2636_vm11, %v9848_v32, %v2694_v38  ;;  %v2293_v26 = vmax.f32 %v2291_v56, %v2292_v6  ;;  %v2300_v48 = vmax.f32 %v2298_v58, %v2299_v29  ;;  %v2306_v36 = vrot.slane %v2305_v5, 2 }
 0x1e5   :  { %v2696_v43 = vsel %vm2638_vm12, %v9850_v0, %v2695_v19  ;;  %v2287_v30 = vrot.slane %v2286_v9, 1  ;;  %v9905_v16 = vsel %vm752_vm4, %v744_v33, -inf  ;;  %v565_v39 = vadd.f32 %v9874_v62, %v9568_v24 }
 0x1e6   :  { %v2697_v21 = vsel %vm2640_vm13, %v9853_v54, %v2696_v43  ;;  %v2294_v12 = vrot.slane %v2293_v26, 1  ;;  %v2301_v2 = vrot.slane %v2300_v48, 1  ;;  %v2307_v15 = vmax.f32 %v2305_v5, %v2306_v36 }
 0x1e7   :  { %2772 = vst.msk [vmem:[#allocation2 + $0xb1] sm:$0xff] %vm752_vm4, %v2697_v21  ;;  %v2288_v32 = vmax.f32 %v2286_v9, %v2287_v30  ;;  %v727_v49 = vmax.f32 %v565_v39, 0.0  ;;  %v665_v0 = vadd.f32 %v9874_v62, %v9578_v50  ;;  %v560_v22 = vadd.f32 %v9874_v62, %v9582_v60 }
 0x1e8   :  { %v2295_v55 = vmax.f32 %v2293_v26, %v2294_v12  ;;  %v2302_v24 = vmax.f32 %v2300_v48, %v2301_v2  ;;  %v2308_v1 = vrot.slane %v2307_v15, 1  ;;  %v660_v54 = vadd.f32 %v9874_v62, %v11516_v18 }
 0x1e9   :  { %v811_v44 = vsel %vm752_vm4, %v727_v49, -inf  ;;  %v747_v53 = vmax.f32 %v665_v0, 0.0  ;;  %v726_v14 = vmax.f32 %v560_v22, 0.0  ;;  %v575_v50 = vadd.f32 %v9874_v62, %v11517_v42 }
 0x1ea   :  { %v2309_v60 = vmax.f32 %v2307_v15, %v2308_v1  ;;  %v2726_v57 = vsel %vm2628_vm7, %v2295_v55, %v2288_v32  ;;  %v812_v61 = vmax.f32 %v9880_v7, %v811_v44  ;;  %v746_v52 = vmax.f32 %v660_v54, 0.0 }
 0x1eb   :  { %v2727_v3 = vsel %vm2630_vm8, %v2302_v24, %v2726_v57  ;;  %v841_v40 = vsel %vm752_vm4, %v747_v53, -inf  ;;  %v808_v63 = vsel %vm752_vm4, %v726_v14, -inf  ;;  %v729_v37 = vmax.f32 %v575_v50, 0.0 }
 0x1ec   :  { %v2728_v34 = vsel %vm2632_vm9, %v2309_v60, %v2727_v3  ;;  %v1204_v10 = vcombine.high %v812_v61, %v812_v61  ;;  %v1211_v56 = vrot.slane %v812_v61, %v9233_v31  ;;  %v842_v58 = vmax.f32 %v840_v17, %v841_v40 }
 0x1ed   :  { %v2729_v27 = vsel %vm2634_vm10, %v9859_v45, %v2728_v34  ;;  %v9939_v7 = vmax.f32 %v9885_v28, %v808_v63  ;;  %v9942_v20 = vsel %vm752_vm4, %v746_v52, -inf  ;;  %v9945_v8 = vsel %vm752_vm4, %v729_v37, -inf }
 0x1ee   :  { %v2730_v46 = vsel %vm2636_vm11, %v9862_v41, %v2729_v27  ;;  %v1218_v51 = vrot.slane %v1204_v10, %v9233_v31  ;;  %v1219_v23 = vcombine.high %v1211_v56, %v1211_v56  ;;  %v2086_v6 = vsel %vm1553_vm5, %v1211_v56, -inf  ;;  %v9951_v29 = vld [vmem:[#allocation2 + $0xb0] sm:$0xff] }
 0x1ef   :  { %v2731_v45 = vsel %vm2638_vm12, %v9864_v11, %v2730_v46  ;;  %v2087_v28 = vrot.slane %v2086_v6, 4  ;;  %v1374_v5 = vcombine.high %v842_v58, %v842_v58  ;;  %v1381_v38 = vrot.slane %v842_v58, %v9233_v31  ;;  %7683 = vmatmul.mubr.msk.f32.gmra.mrb[28].mxu1 %vm752_vm4, %v9951_v29 }
 0x1f0   :  { %v2732_v41 = vsel %vm2640_vm13, %v9868_v13, %v2731_v45  ;;  %v1220_v9 = vcombine.high %v1218_v51, %v1218_v51  ;;  %v2093_v17 = vsel %vm1553_vm5, %v1219_v23, -inf  ;;  %v2100_v33 = vsel %vm1553_vm5, %v1218_v51, -inf }
 0x1f1   :  { %2777 = vst.msk [vmem:[#allocation2 + $0x101] sm:$0xff] %vm752_vm4, %v2732_v41  ;;  %v2088_v19 = vmax.f32 %v2086_v6, %v2087_v28  ;;  %v2094_v26 = vrot.slane %v2093_v17, 4  ;;  %v2101_v11 = vrot.slane %v2100_v33, 4  ;;  %v1388_v48 = vrot.slane %v1374_v5, %v9233_v31 }
 0x1f2   :  { %v2107_v36 = vsel %vm1553_vm5, %v1220_v9, -inf  ;;  %v1389_v43 = vcombine.high %v1381_v38, %v1381_v38  ;;  %v2366_v30 = vsel %vm1553_vm5, %v1381_v38, -inf  ;;  %v1187_v13 = vcombine.high %v9939_v7, %v9939_v7 }
 0x1f3   :  { %v2089_v39 = vrot.slane %v2088_v19, 2  ;;  %v2095_v21 = vmax.f32 %v2093_v17, %v2094_v26  ;;  %v2102_v12 = vmax.f32 %v2100_v33, %v2101_v11  ;;  %v2108_v2 = vrot.slane %v2107_v36, 4 }
 0x1f4   :  { %v1390_v15 = vcombine.high %v1388_v48, %v1388_v48  ;;  %v2367_v32 = vrot.slane %v2366_v30, 4  ;;  %v2373_v49 = vsel %vm1553_vm5, %v1389_v43, -inf  ;;  %v2380_v0 = vsel %vm1553_vm5, %v1388_v48, -inf }
 0x1f5   :  { %v2090_v22 = vmax.f32 %v2088_v19, %v2089_v39  ;;  %v2096_v55 = vrot.slane %v2095_v21, 2  ;;  %v2103_v24 = vrot.slane %v2102_v12, 2  ;;  %v2109_v1 = vmax.f32 %v2107_v36, %v2108_v2 }
 0x1f6   :  { %v2368_v18 = vmax.f32 %v2366_v30, %v2367_v32  ;;  %v2374_v54 = vrot.slane %v2373_v49, 4  ;;  %v2381_v44 = vrot.slane %v2380_v0, 4  ;;  %v2387_v53 = vsel %vm1553_vm5, %v1390_v15, -inf }
 0x1f7   :  { %v2091_v14 = vrot.slane %v2090_v22, 1  ;;  %v2097_v42 = vmax.f32 %v2095_v21, %v2096_v55  ;;  %v2104_v50 = vmax.f32 %v2102_v12, %v2103_v24  ;;  %v2110_v60 = vrot.slane %v2109_v1, 2  ;;  %v11518_v24 = vld [vmem:[#allocation8_spill] sm:$0xff] }
 0x1f8   :  { %v2369_v57 = vrot.slane %v2368_v18, 2  ;;  %v2375_v61 = vmax.f32 %v2373_v49, %v2374_v54  ;;  %v2382_v52 = vmax.f32 %v2380_v0, %v2381_v44  ;;  %v2388_v3 = vrot.slane %v2387_v53, 4 }
 0x1f9   :  { %v9971_v40 = vmax.f32 %v2090_v22, %v2091_v14  ;;  %v2098_v63 = vrot.slane %v2097_v42, 1  ;;  %v2105_v37 = vrot.slane %v2104_v50, 1  ;;  %v2111_v34 = vmax.f32 %v2109_v1, %v2110_v60  ;;  %v11519_v60 = vld [vmem:[#allocation9_spill] sm:$0xff] }
 0x1fa   :  { %v2370_v10 = vmax.f32 %v2368_v18, %v2369_v57  ;;  %v2376_v56 = vrot.slane %v2375_v61, 2  ;;  %v2383_v58 = vrot.slane %v2382_v52, 2  ;;  %v2389_v27 = vmax.f32 %v2387_v53, %v2388_v3 }
 0x1fb   :  { %v9973_v46 = vmax.f32 %v2097_v42, %v2098_v63  ;;  %v9975_v51 = vmax.f32 %v2104_v50, %v2105_v37  ;;  %v2112_v23 = vrot.slane %v2111_v34, 1  ;;  %v1194_v6 = vrot.slane %v9939_v7, %v9233_v31 }
 0x1fc   :  { %v2371_v45 = vrot.slane %v2370_v10, 1  ;;  %v2377_v28 = vmax.f32 %v2375_v61, %v2376_v56  ;;  %v2384_v5 = vmax.f32 %v2382_v52, %v2383_v58  ;;  %v2390_v38 = vrot.slane %v2389_v27, 2 }
 0x1fd   :  { %v9979_v41 = vmax.f32 %v2111_v34, %v2112_v23  ;;  %v1201_v9 = vrot.slane %v1187_v13, %v9233_v31  ;;  %v1202_v17 = vcombine.high %v1194_v6, %v1194_v6  ;;  %v2058_v33 = vsel %vm1553_vm5, %v1194_v6, -inf }
 0x1fe   :  { %v9983_v19 = vmax.f32 %v2370_v10, %v2371_v45  ;;  %v2378_v26 = vrot.slane %v2377_v28, 1  ;;  %v2385_v11 = vrot.slane %v2384_v5, 1  ;;  %v2391_v48 = vmax.f32 %v2389_v27, %v2390_v38 }
 0x1ff   :  { %v1203_v36 = vcombine.high %v1201_v9, %v1201_v9  ;;  %v2059_v43 = vrot.slane %v2058_v33, 4  ;;  %v2065_v7 = vsel %vm1553_vm5, %v1202_v17, -inf  ;;  %v2072_v30 = vsel %vm1553_vm5, %v1201_v9, -inf }
 0x200   :  { %v9987_v39 = vmax.f32 %v2377_v28, %v2378_v26  ;;  %v9989_v21 = vmax.f32 %v2384_v5, %v2385_v11  ;;  %v2392_v12 = vrot.slane %v2391_v48, 1  ;;  %v2066_v13 = vrot.slane %v2065_v7, 4 }
 0x201   :  { %v2060_v2 = vmax.f32 %v2058_v33, %v2059_v43  ;;  %v2073_v15 = vrot.slane %v2072_v30, 4  ;;  %v2079_v32 = vsel %vm1553_vm5, %v1203_v36, -inf  ;;  %v839_v49 = vmax.f32 %v9905_v16, %v9942_v20 }
 0x202   :  { %v9994_v0 = vmax.f32 %v2391_v48, %v2392_v12  ;;  %v2067_v22 = vmax.f32 %v2065_v7, %v2066_v13  ;;  %v2080_v55 = vrot.slane %v2079_v32, 4  ;;  %v570_v1 = vadd.f32 %v9874_v62, %v11518_v24 }
 0x203   :  { %v2061_v18 = vrot.slane %v2060_v2, 2  ;;  %v2074_v54 = vmax.f32 %v2072_v30, %v2073_v15  ;;  %v1357_v44 = vcombine.high %v839_v49, %v839_v49  ;;  %v1364_v53 = vrot.slane %v839_v49, %v9233_v31 }
 0x204   :  { %v2068_v14 = vrot.slane %v2067_v22, 2  ;;  %v2081_v42 = vmax.f32 %v2079_v32, %v2080_v55  ;;  %v728_v50 = vmax.f32 %v570_v1, 0.0  ;;  %v585_v57 = vadd.f32 %v9874_v62, %v11519_v60 }
 0x205   :  { %v2062_v61 = vmax.f32 %v2060_v2, %v2061_v18  ;;  %v2075_v16 = vrot.slane %v2074_v54, 2  ;;  %v1371_v20 = vrot.slane %v1357_v44, %v9233_v31  ;;  %v1372_v52 = vcombine.high %v1364_v53, %v1364_v53 }
 0x206   :  { %v2069_v3 = vmax.f32 %v2067_v22, %v2068_v14  ;;  %v2082_v63 = vrot.slane %v2081_v42, 2  ;;  %v2338_v37 = vsel %vm1553_vm5, %v1364_v53, -inf  ;;  %v10004_v34 = vsel %vm752_vm4, %v728_v50, -inf }
 0x207   :  { %v2063_v10 = vrot.slane %v2062_v61, 1  ;;  %v2076_v56 = vmax.f32 %v2074_v54, %v2075_v16  ;;  %v1373_v58 = vcombine.high %v1371_v20, %v1371_v20  ;;  %v2339_v27 = vrot.slane %v2338_v37, 4  ;;  %v6857_v16 = vld [vmem:[%s11497_s3 + $0x20] sm:$0xff] }
 0x208   :  { %v2070_v23 = vrot.slane %v2069_v3, 1  ;;  %v2083_v6 = vmax.f32 %v2081_v42, %v2082_v63  ;;  %v2345_v45 = vsel %vm1553_vm5, %v1372_v52, -inf  ;;  %v2352_v28 = vsel %vm1553_vm5, %v1371_v20, -inf }
 0x209   :  { %v2064_v5 = vmax.f32 %v2062_v61, %v2063_v10  ;;  %v2077_v38 = vrot.slane %v2076_v56, 1  ;;  %v2340_v9 = vmax.f32 %v2338_v37, %v2339_v27  ;;  %v2346_v17 = vrot.slane %v2345_v45, 4 }
 0x20a   :  { %v2071_v33 = vmax.f32 %v2069_v3, %v2070_v23  ;;  %v2084_v26 = vrot.slane %v2083_v6, 1  ;;  %v2353_v11 = vrot.slane %v2352_v28, 4  ;;  %v2359_v48 = vsel %vm1553_vm5, %v1373_v58, -inf }
 0x20b   :  { %v2078_v36 = vmax.f32 %v2076_v56, %v2077_v38  ;;  %v2341_v43 = vrot.slane %v2340_v9, 2  ;;  %v2347_v7 = vmax.f32 %v2345_v45, %v2346_v17  ;;  %v2360_v30 = vrot.slane %v2359_v48, 4 }
 0x20c   :  { %v2085_v12 = vmax.f32 %v2083_v6, %v2084_v26  ;;  %v2698_v13 = vsel %vm2628_vm7, %v2071_v33, %v2064_v5  ;;  %v2354_v2 = vmax.f32 %v2352_v28, %v2353_v11  ;;  %v731_v15 = vmax.f32 %v585_v57, 0.0 }
 0x20d   :  { %v2699_v32 = vsel %vm2630_vm8, %v2078_v36, %v2698_v13  ;;  %v2342_v49 = vmax.f32 %v2340_v9, %v2341_v43  ;;  %v2348_v22 = vrot.slane %v2347_v7, 2  ;;  %v2361_v55 = vmax.f32 %v2359_v48, %v2360_v30 }
 0x20e   :  { %v2700_v24 = vsel %vm2632_vm9, %v2085_v12, %v2699_v32  ;;  %v2355_v1 = vrot.slane %v2354_v2, 2  ;;  %v817_v18 = vsel %vm752_vm4, %v731_v15, -inf  ;;  %v580_v54 = vadd.f32 %v9874_v62, %v9680_v25  ;;  %v6858_v25 = vld [vmem:[%s11497_s3 + $0x28] sm:$0xff] }
 0x20f   :  { %v2701_v44 = vsel %vm2634_vm10, %v9971_v40, %v2700_v24  ;;  %v2343_v53 = vrot.slane %v2342_v49, 1  ;;  %v2349_v14 = vmax.f32 %v2347_v7, %v2348_v22  ;;  %v2362_v42 = vrot.slane %v2361_v55, 2 }
 0x210   :  { %v2702_v50 = vsel %vm2636_vm11, %v9973_v46, %v2701_v44  ;;  %v2356_v60 = vmax.f32 %v2354_v2, %v2355_v1  ;;  %v818_v57 = vmax.f32 %v9945_v8, %v817_v18  ;;  %v730_v61 = vmax.f32 %v580_v54, 0.0 }
 0x211   :  { %v2703_v40 = vsel %vm2638_vm12, %v9975_v51, %v2702_v50  ;;  %v2344_v20 = vmax.f32 %v2342_v49, %v2343_v53  ;;  %v2350_v52 = vrot.slane %v2349_v14, 1  ;;  %v2363_v3 = vmax.f32 %v2361_v55, %v2362_v42 }
 0x212   :  { %v2704_v46 = vsel %vm2640_vm13, %v9979_v41, %v2703_v40  ;;  %v2357_v63 = vrot.slane %v2356_v60, 1  ;;  %v1238_v8 = vcombine.high %v818_v57, %v818_v57  ;;  %v1245_v37 = vrot.slane %v818_v57, %v9233_v31  ;;  %v6859_v57 = vld [vmem:[%s11497_s3 + $0x30] sm:$0xff] }
 0x213   :  { %2773 = vst.msk [vmem:[#allocation2 + $0xc1] sm:$0xff] %vm752_vm4, %v2704_v46  ;;  %v2351_v10 = vmax.f32 %v2349_v14, %v2350_v52  ;;  %v2364_v56 = vrot.slane %v2363_v3, 1  ;;  %v814_v58 = vsel %vm752_vm4, %v730_v61, -inf  ;;  %v8303_v27 = vpack.c.bf16 %v6858_v25, %v6857_v16  ;;  %v6860_v61 = vld [vmem:[%s11497_s3 + $0x38] sm:$0xff] }
 0x214   :  { %v2358_v23 = vmax.f32 %v2356_v60, %v2357_v63  ;;  %v1252_v51 = vrot.slane %v1238_v8, %v9233_v31  ;;  %v1253_v6 = vcombine.high %v1245_v37, %v1245_v37  ;;  %v2142_v45 = vsel %vm1553_vm5, %v1245_v37, -inf  ;;  %v6877_v63 = vld [vmem:[%s11497_s3 + $0x40] sm:$0xff]  ;;  %v6878_v8 = vld [vmem:[%s11497_s3 + $0x48] sm:$0xff] }
 0x215   :  { %v2365_v28 = vmax.f32 %v2363_v3, %v2364_v56  ;;  %v2733_v41 = vsel %vm2628_vm7, %v2351_v10, %v2344_v20  ;;  %v2143_v5 = vrot.slane %v2142_v45, 4  ;;  %v815_v38 = vmax.f32 %v10004_v34, %v814_v58  ;;  %8304 = vmatprep.subr.bf16.mxu1 %v8303_v27 }
 0x216   :  { %v2734_v9 = vsel %vm2630_vm8, %v2358_v23, %v2733_v41  ;;  %v1254_v17 = vcombine.high %v1252_v51, %v1252_v51  ;;  %v2149_v33 = vsel %vm1553_vm5, %v1253_v6, -inf  ;;  %v2156_v26 = vsel %vm1553_vm5, %v1252_v51, -inf  ;;  %8306 = vmatpush3.bf16.msra.mxu1 %v8303_v27 }
 0x217   :  { %v2735_v11 = vsel %vm2632_vm9, %v2365_v28, %v2734_v9  ;;  %v2144_v48 = vmax.f32 %v2142_v45, %v2143_v5  ;;  %v2150_v36 = vrot.slane %v2149_v33, 4  ;;  %v2157_v43 = vrot.slane %v2156_v26, 4 }
 0x218   :  { %v2736_v7 = vsel %vm2634_vm10, %v9983_v19, %v2735_v11  ;;  %v2163_v30 = vsel %vm1553_vm5, %v1254_v17, -inf  ;;  %v1221_v34 = vcombine.high %v815_v38, %v815_v38  ;;  %v1228_v12 = vrot.slane %v815_v38, %v9233_v31 }
 0x219   :  { %v2737_v13 = vsel %vm2636_vm11, %v9987_v39, %v2736_v7  ;;  %v2145_v2 = vrot.slane %v2144_v48, 2  ;;  %v2151_v15 = vmax.f32 %v2149_v33, %v2150_v36  ;;  %v2158_v32 = vmax.f32 %v2156_v26, %v2157_v43 }
 0x21a   :  { %v2738_v49 = vsel %vm2638_vm12, %v9989_v21, %v2737_v13  ;;  %v2164_v22 = vrot.slane %v2163_v30, 4  ;;  %v1235_v55 = vrot.slane %v1221_v34, %v9233_v31  ;;  %v1236_v24 = vcombine.high %v1228_v12, %v1228_v12  ;;  %v10050_v1 = vld [vmem:[#allocation2 + $0xc0] sm:$0xff] }
 0x21b   :  { %v2739_v19 = vsel %vm2640_vm13, %v9994_v0, %v2738_v49  ;;  %v2152_v18 = vrot.slane %v2151_v15, 2  ;;  %v2159_v54 = vrot.slane %v2158_v32, 2  ;;  %7685 = vmatprep.mubr.msk.f32.mxu1 %vm752_vm4, %v10050_v1  ;;  %v2114_v21 = vsel %vm1553_vm5, %v1228_v12, -inf }
 0x21c   :  { %2778 = vst.msk [vmem:[#allocation2 + $0x111] sm:$0xff] %vm752_vm4, %v2739_v19  ;;  %v2165_v39 = vmax.f32 %v2163_v30, %v2164_v22  ;;  %v1237_v44 = vcombine.high %v1235_v55, %v1235_v55  ;;  %v2121_v53 = vsel %vm1553_vm5, %v1236_v24, -inf  ;;  %v2115_v14 = vrot.slane %v2114_v21, 4 }
 0x21d   :  { %v2146_v42 = vmax.f32 %v2144_v48, %v2145_v2  ;;  %v2122_v50 = vrot.slane %v2121_v53, 4  ;;  %v2128_v60 = vsel %vm1553_vm5, %v1235_v55, -inf  ;;  %v2153_v16 = vmax.f32 %v2151_v15, %v2152_v18 }
 0x21e   :  { %v2135_v0 = vsel %vm1553_vm5, %v1237_v44, -inf  ;;  %v2160_v25 = vmax.f32 %v2158_v32, %v2159_v54  ;;  %v2116_v40 = vmax.f32 %v2114_v21, %v2115_v14  ;;  %v2166_v20 = vrot.slane %v2165_v39, 2 }
 0x21f   :  { %v2123_v52 = vmax.f32 %v2121_v53, %v2122_v50  ;;  %v2129_v3 = vrot.slane %v2128_v60, 4  ;;  %v2136_v46 = vrot.slane %v2135_v0, 4  ;;  %v8307_v10 = vpack.c.bf16 %v6860_v61, %v6859_v57 }
 0x220   :  { %v2117_v37 = vrot.slane %v2116_v40, 2  ;;  %v2147_v56 = vrot.slane %v2146_v42, 1  ;;  %v2154_v51 = vrot.slane %v2153_v16, 1  ;;  %v2161_v6 = vrot.slane %v2160_v25, 1 }
 0x221   :  { %v2124_v58 = vrot.slane %v2123_v52, 2  ;;  %v2130_v27 = vmax.f32 %v2128_v60, %v2129_v3  ;;  %v2137_v23 = vmax.f32 %v2135_v0, %v2136_v46  ;;  %8308 = vmatprep.subr.bf16.mxu1 %v8307_v10  ;;  %v10073_v28 = vpack.c.bf16 %v6878_v8, %v6877_v63 }
 0x222   :  { %v2118_v45 = vmax.f32 %v2116_v40, %v2117_v37  ;;  %v2167_v41 = vmax.f32 %v2165_v39, %v2166_v20  ;;  %8310 = vmatpush3.bf16.msra.mxu1 %v8307_v10  ;;  %v675_v33 = vadd.f32 %v9874_v62, %v9916_v35  ;;  %v670_v26 = vadd.f32 %v9874_v62, %v9920_v59 }
 0x223   :  { %v2125_v5 = vmax.f32 %v2123_v52, %v2124_v58  ;;  %v2131_v38 = vrot.slane %v2130_v27, 2  ;;  %v2138_v9 = vrot.slane %v2137_v23, 2  ;;  %8312 = vmatprep.subr.bf16.mxu1 %v10073_v28  ;;  %v685_v11 = vadd.f32 %v9874_v62, %v9925_v47 }
 0x224   :  { %v2119_v17 = vrot.slane %v2118_v45, 1  ;;  %v680_v7 = vadd.f32 %v9874_v62, %v9929_v4  ;;  %v749_v34 = vmax.f32 %v675_v33, 0.0  ;;  %v748_v12 = vmax.f32 %v670_v26, 0.0 }
 0x225   :  { %v2126_v48 = vrot.slane %v2125_v5, 1  ;;  %v2132_v36 = vmax.f32 %v2130_v27, %v2131_v38  ;;  %v2139_v43 = vmax.f32 %v2137_v23, %v2138_v9  ;;  %v751_v13 = vmax.f32 %v685_v11, 0.0 }
 0x226   :  { %v2120_v30 = vmax.f32 %v2118_v45, %v2119_v17  ;;  %v750_v35 = vmax.f32 %v680_v7, 0.0  ;;  %v2168_v49 = vrot.slane %v2167_v41, 1  ;;  %v846_v59 = vsel %vm752_vm4, %v749_v34, -inf }
 0x227   :  { %v2127_v2 = vmax.f32 %v2125_v5, %v2126_v48  ;;  %v2133_v15 = vrot.slane %v2132_v36, 1  ;;  %v2140_v32 = vrot.slane %v2139_v43, 1  ;;  %v843_v22 = vsel %vm752_vm4, %v748_v12, -inf }
 0x228   :  { %v847_v47 = vsel %vm752_vm4, %v751_v13, -inf  ;;  %v2148_v4 = vmax.f32 %v2146_v42, %v2147_v56  ;;  %v844_v18 = vsel %vm752_vm4, %v750_v35, -inf  ;;  %v2155_v53 = vmax.f32 %v2153_v16, %v2154_v51 }
 0x229   :  { %v2134_v55 = vmax.f32 %v2132_v36, %v2133_v15  ;;  %v2141_v24 = vmax.f32 %v2139_v43, %v2140_v32  ;;  %v2705_v19 = vsel %vm2628_vm7, %v2127_v2, %v2120_v30  ;;  %v848_v62 = vmax.f32 %v846_v59, %v847_v47  ;;  %v10112_v59 = vld [vmem:[#allocation2 + $0xe0] sm:$0xff] }
 0x22a   :  { %v845_v21 = vmax.f32 %v843_v22, %v844_v18  ;;  %v2162_v14 = vmax.f32 %v2160_v25, %v2161_v6  ;;  %v2169_v50 = vmax.f32 %v2167_v41, %v2168_v49 }
 0x22b   :  { %v2706_v54 = vsel %vm2630_vm8, %v2134_v55, %v2705_v19  ;;  %v1408_v39 = vcombine.high %v848_v62, %v848_v62  ;;  %v1415_v44 = vrot.slane %v848_v62, %v9233_v31 }
 0x22c   :  { %v2707_v60 = vsel %vm2632_vm9, %v2141_v24, %v2706_v54  ;;  %v1391_v52 = vcombine.high %v845_v21, %v845_v21  ;;  %v1398_v3 = vrot.slane %v845_v21, %v9233_v31 }
 0x22d   :  { %v2708_v0 = vsel %vm2634_vm10, %v2148_v4, %v2707_v60  ;;  %v1422_v57 = vrot.slane %v1408_v39, %v9233_v31  ;;  %v1423_v61 = vcombine.high %v1415_v44, %v1415_v44  ;;  %v2422_v42 = vsel %vm1553_vm5, %v1415_v44, -inf  ;;  %v10116_v44 = vld [vmem:[#allocation2 + $0xf0] sm:$0xff] }
 0x22e   :  { %v2709_v40 = vsel %vm2636_vm11, %v2155_v53, %v2708_v0  ;;  %v2423_v20 = vrot.slane %v2422_v42, 4  ;;  %v1405_v27 = vrot.slane %v1391_v52, %v9233_v31  ;;  %v1406_v23 = vcombine.high %v1398_v3, %v1398_v3 }
 0x22f   :  { %v2710_v46 = vsel %vm2638_vm12, %v2162_v14, %v2709_v40  ;;  %v1424_v16 = vcombine.high %v1422_v57, %v1422_v57  ;;  %v2429_v25 = vsel %vm1553_vm5, %v1423_v61, -inf  ;;  %v2436_v63 = vsel %vm1553_vm5, %v1422_v57, -inf  ;;  %v10120_v14 = vld [vmem:[#allocation2 + $0x100] sm:$0xff] }
 0x230   :  { %v2711_v8 = vsel %vm2640_vm13, %v2169_v50, %v2710_v46  ;;  %v2424_v37 = vmax.f32 %v2422_v42, %v2423_v20  ;;  %v2430_v10 = vrot.slane %v2429_v25, 4  ;;  %v2437_v56 = vrot.slane %v2436_v63, 4  ;;  %v3016_v42 = vld [vmem:[#allocation2 + $0x1] sm:$0xff]  ;;  %v10124_v46 = vld [vmem:[#allocation2 + $0x110] sm:$0xff] }
 0x231   :  { %2774 = vst.msk [vmem:[#allocation2 + $0xd1] sm:$0xff] %vm752_vm4, %v2711_v8  ;;  %v2443_v58 = vsel %vm1553_vm5, %v1424_v16, -inf  ;;  %v2394_v51 = vsel %vm1553_vm5, %v1398_v3, -inf  ;;  %v1407_v5 = vcombine.high %v1405_v27, %v1405_v27  ;;  %v2401_v9 = vsel %vm1553_vm5, %v1406_v23, -inf  ;;  %v6879_v16 = vld [vmem:[%s11497_s3 + $0x50] sm:$0xff] }
 0x232   :  { %v2431_v6 = vmax.f32 %v2429_v25, %v2430_v10  ;;  %v2438_v45 = vmax.f32 %v2436_v63, %v2437_v56  ;;  %v2444_v41 = vrot.slane %v2443_v58, 4  ;;  %v2395_v38 = vrot.slane %v2394_v51, 4  ;;  %v6880_v25 = vld [vmem:[%s11497_s3 + $0x58] sm:$0xff] }
 0x233   :  { %v2408_v17 = vsel %vm1553_vm5, %v1405_v27, -inf  ;;  %v2425_v33 = vrot.slane %v2424_v37, 2  ;;  %v2402_v36 = vrot.slane %v2401_v9, 4  ;;  %v2415_v7 = vsel %vm1553_vm5, %v1407_v5, -inf }
 0x234   :  { %v2432_v26 = vrot.slane %v2431_v6, 2  ;;  %v2445_v11 = vmax.f32 %v2443_v58, %v2444_v41  ;;  %v2396_v48 = vmax.f32 %v2394_v51, %v2395_v38  ;;  %v2409_v43 = vrot.slane %v2408_v17, 4  ;;  %v6898_v41 = vld [vmem:[%s11497_s3 + $0x68] sm:$0xff] }
 0x235   :  { %v2439_v30 = vrot.slane %v2438_v45, 2  ;;  %v2403_v13 = vmax.f32 %v2401_v9, %v2402_v36  ;;  %v2416_v15 = vrot.slane %v2415_v7, 4  ;;  %v2426_v35 = vmax.f32 %v2424_v37, %v2425_v33  ;;  %v10149_v38 = vld [vmem:[#allocation2 + $0x21] sm:$0xff] }
 0x236   :  { %v2446_v34 = vrot.slane %v2445_v11, 2  ;;  %v2397_v12 = vrot.slane %v2396_v48, 2  ;;  %v2410_v2 = vmax.f32 %v2408_v17, %v2409_v43  ;;  %v2433_v49 = vmax.f32 %v2431_v6, %v2432_v26  ;;  %v10138_v6 = vld [vmem:[#allocation2 + $0x11] sm:$0xff]  ;;  %v10170_v36 = vld [vmem:[#allocation2 + $0x61] sm:$0xff] }
 0x237   :  { %v2404_v47 = vrot.slane %v2403_v13, 2  ;;  %v2417_v24 = vmax.f32 %v2415_v7, %v2416_v15  ;;  %v2440_v19 = vmax.f32 %v2438_v45, %v2439_v30  ;;  %v2427_v21 = vrot.slane %v2426_v35, 1  ;;  %v6897_v45 = vld [vmem:[%s11497_s3 + $0x60] sm:$0xff]  ;;  %v10174_v7 = vld [vmem:[#allocation2 + $0x71] sm:$0xff] }
 0x238   :  { %v10108_v32 = vld [vmem:[#allocation2 + $0xd0] sm:$0xff]  ;;  %v2398_v22 = vmax.f32 %v2396_v48, %v2397_v12  ;;  %v2411_v55 = vrot.slane %v2410_v2, 2  ;;  %v2447_v62 = vmax.f32 %v2445_v11, %v2446_v34  ;;  %v2434_v53 = vrot.slane %v2433_v49, 1  ;;  %v10162_v48 = vld [vmem:[#allocation2 + $0x41] sm:$0xff] }
 0x239   :  { %7686 = vmatmul.mubr.msk.f32.gmra.mrb[30].mxu1 %vm752_vm4, %v10108_v32  ;;  %v2405_v18 = vmax.f32 %v2403_v13, %v2404_v47  ;;  %v2418_v39 = vrot.slane %v2417_v24, 2  ;;  %v2441_v61 = vrot.slane %v2440_v19, 1  ;;  %v2428_v63 = vmax.f32 %v2426_v35, %v2427_v21  ;;  %v10157_v11 = vld [vmem:[#allocation2 + $0x31] sm:$0xff]  ;;  %v3024_v43 = vld [vmem:[#allocation2 + $0xa1] sm:$0xff] }
 0x23a   :  { %7688 = vmatprep.mubr.msk.f32.mxu1 %vm752_vm4, %v10112_v59  ;;  %v2399_v4 = vrot.slane %v2398_v22, 1  ;;  %v2412_v54 = vmax.f32 %v2410_v2, %v2411_v55  ;;  %v2448_v40 = vrot.slane %v2447_v62, 1  ;;  %v2435_v8 = vmax.f32 %v2433_v49, %v2434_v53  ;;  %v10179_v30 = vld [vmem:[#allocation2 + $0xb1] sm:$0xff]  ;;  %v10183_v34 = vld [vmem:[#allocation2 + $0xc1] sm:$0xff] }
 0x23b   :  { %v2406_v60 = vrot.slane %v2405_v18, 1  ;;  %v2419_v57 = vmax.f32 %v2417_v24, %v2418_v39  ;;  %v2442_v56 = vmax.f32 %v2440_v19, %v2441_v61  ;;  %v8315_v27 = vpack.c.bf16 %v6880_v25, %v6879_v16  ;;  %v10187_v12 = vld [vmem:[#allocation2 + $0xd1] sm:$0xff]  ;;  %v10191_v13 = vld [vmem:[#allocation2 + $0xe1] sm:$0xff] }
 0x23c   :  { %v2400_v50 = vmax.f32 %v2398_v22, %v2399_v4  ;;  %v2413_v0 = vrot.slane %v2412_v54, 1  ;;  %v2449_v23 = vmax.f32 %v2447_v62, %v2448_v40  ;;  %v8319_v33 = vpack.c.bf16 %v6898_v41, %v6897_v45  ;;  %v10195_v2 = vld [vmem:[#allocation2 + $0xf1] sm:$0xff]  ;;  %v10199_v15 = vld [vmem:[#allocation2 + $0x101] sm:$0xff] }
 0x23d   :  { %7689 = vmatmul.mubr.msk.f32.gmra.mrb[32].mxu1 %vm752_vm4, %v10116_v44  ;;  %v2407_v20 = vmax.f32 %v2405_v18, %v2406_v60  ;;  %v2420_v3 = vrot.slane %v2419_v57, 1  ;;  %v3246_v35 = vld [vmem:[#allocation2 + $0x2] sm:$0xff]  ;;  %v10203_v49 = vld [vmem:[#allocation2 + $0x111] sm:$0xff] }
 0x23e   :  { %7691 = vmatprep.mubr.msk.f32.mxu1 %vm752_vm4, %v10120_v14  ;;  %v2414_v52 = vmax.f32 %v2412_v54, %v2413_v0  ;;  %v6899_v22 = vld [vmem:[%s11497_s3 + $0x70] sm:$0xff]  ;;  %v6900_v47 = vld [vmem:[%s11497_s3 + $0x78] sm:$0xff]  ;;  %v6917_v19 = vld [vmem:[%s11497_s3 + $0x80] sm:$0xff] }
 0x23f   :  { %v2421_v37 = vmax.f32 %v2419_v57, %v2420_v3  ;;  %v2740_v10 = vsel %vm2628_vm7, %v2407_v20, %v2400_v50  ;;  %v8323_v55 = vpack.c.bf16 %v6900_v47, %v6899_v22  ;;  %v10214_v24 = vld [vmem:[#allocation2 + $0x12] sm:$0xff]  ;;  %v6918_v62 = vld [vmem:[%s11497_s3 + $0x88] sm:$0xff]  ;;  %v10311_v41 = vld [vmem:[#allocation2 + $0x80] sm:$0xff] }
 0x240   :  { %v2741_v58 = vsel %vm2630_vm8, %v2414_v52, %v2740_v10  ;;  %v10224_v4 = vld [vmem:[#allocation2 + $0x22] sm:$0xff]  ;;  %v8327_v18 = vpack.c.bf16 %v6918_v62, %v6917_v19  ;;  %v10228_v54 = vld [vmem:[#allocation2 + $0x32] sm:$0xff]  ;;  %v11506_v62 = vmov 0.0|0.0  }
 0x241   :  { %7692 = vmatmul.mubr.msk.f32.gmra.mrb[34].mxu1 %vm752_vm4, %v10124_v46  ;;  %v2742_v51 = vsel %vm2632_vm9, %v2421_v37, %v2741_v58  ;;  %v10232_v39 = vld [vmem:[#allocation2 + $0x42] sm:$0xff]  ;;  %v10236_v21 = vld [vmem:[#allocation2 + $0x52] sm:$0xff]  ;;  %8367 = vmatprep.subr.bf16.mxu0 %v11506_v62 }
 0x242   :  { %7702 = vmatprep.mubr.msk.f32.mxu1 %vm752_vm4, %v3016_v42  ;;  %v2743_v5 = vsel %vm2634_vm10, %v2428_v63, %v2742_v51  ;;  %v10240_v53 = vld [vmem:[#allocation2 + $0x62] sm:$0xff]  ;;  %v10244_v60 = vld [vmem:[#allocation2 + $0x72] sm:$0xff] }
 0x243   :  { %v2744_v9 = vsel %vm2636_vm11, %v2435_v8, %v2743_v5  ;;  %v3254_v50 = vld [vmem:[#allocation2 + $0xa2] sm:$0xff]  ;;  %v10249_v0 = vld [vmem:[#allocation2 + $0xb2] sm:$0xff] }
 0x244   :  { %v2745_v17 = vsel %vm2638_vm12, %v2442_v56, %v2744_v9  ;;  %v10253_v57 = vld [vmem:[#allocation2 + $0xc2] sm:$0xff]  ;;  %v10257_v61 = vld [vmem:[#allocation2 + $0xd2] sm:$0xff] }
 0x245   :  { %7703 = vmatmul.mubr.msk.f32.vlgmr.msra.gmra.mrb[20].mxu1 %vm752_vm4, %v10138_v6  ;;  %v2746_v26 = vsel %vm2640_vm13, %v2449_v23, %v2745_v17  ;;  %v10261_v42 = vld [vmem:[#allocation2 + $0xe2] sm:$0xff]  ;;  %v10265_v40 = vld [vmem:[#allocation2 + $0xf2] sm:$0xff] }
 0x246   :  { %8314 = vmatpush3.bf16.msra.mxu1 %v10073_v28  ;;  %7705 = vmatprep.mubr.msk.f32.mxu1 %vm752_vm4, %v10149_v38  ;;  %2779 = vst.msk [vmem:[#allocation2 + $0x121] sm:$0xff] %vm752_vm4, %v2746_v26  ;;  %v10166_v28 = vld [vmem:[#allocation2 + $0x51] sm:$0xff]  ;;  %v10269_v20 = vld [vmem:[#allocation2 + $0x102] sm:$0xff] }
 0x247   :  { %8316 = vmatprep.subr.bf16.mxu1 %v8315_v27  ;;  %v10273_v52 = vld [vmem:[#allocation2 + $0x112] sm:$0xff]  ;;  %v10284_v8 = vld [vmem:[#allocation2 + $0x20] sm:$0xff]  ;;  %v6938_v10 = vld [vmem:[%s11497_s3 + $0xa8] sm:$0xff] }
 0x248   :  { %v6919_v3 = vld [vmem:[%s11497_s3 + $0x90] sm:$0xff]  ;;  %v6920_v16 = vld [vmem:[%s11497_s3 + $0x98] sm:$0xff]  ;;  %v6937_v37 = vld [vmem:[%s11497_s3 + $0xa0] sm:$0xff] }
 0x249   :  { %7706 = vmatmul.mubr.msk.f32.gmra.mrb[22].mxu1 %vm752_vm4, %v10157_v11  ;;  %v3476_v25 = vld [vmem:[#allocation2 + $0x10] sm:$0xff]  ;;  %v8331_v63 = vpack.c.bf16 %v6920_v16, %v6919_v3  ;;  %v8335_v58 = vpack.c.bf16 %v6938_v10, %v6937_v37  ;;  %v10303_v51 = vld [vmem:[#allocation2 + $0x60] sm:$0xff]  ;;  %v6940_v9 = vld [vmem:[%s11497_s3 + $0xb8] sm:$0xff] }
 0x24a   :  { %7708 = vmatprep.mubr.msk.f32.mxu1 %vm752_vm4, %v10162_v48  ;;  %8318 = vmatpush3.bf16.msra.mxu1 %v8315_v27  ;;  %v10294_v56 = vld [vmem:[#allocation2 + $0x30] sm:$0xff]  ;;  %v8768_v27 = vld [vmem:[#allocation2 + $0x40] sm:$0xff]  ;;  %v6958_v26 = vld [vmem:[%s11497_s3 + $0xc8] sm:$0xff] }
 0x24b   :  { %8320 = vmatprep.subr.bf16.mxu1 %v8319_v33  ;;  %v10299_v23 = vld [vmem:[#allocation2 + $0x50] sm:$0xff]  ;;  %v6960_v22 = vld [vmem:[%s11497_s3 + $0xd8] sm:$0xff]  ;;  %v5306_v47 = vld [vmem:[%s11499_s5] sm:$0xff] }
 0x24c   :  { %v10307_v45 = vld [vmem:[#allocation2 + $0x70] sm:$0xff]  ;;  %v6977_v16 = vld [vmem:[%s11497_s3 + $0xe0] sm:$0xff]  ;;  %v5311_v37 = vld [vmem:[%s11499_s5 + $0x28] sm:$0xff] }
 0x24d   :  { %7709 = vmatmul.mubr.msk.f32.gmra.mrb[24].mxu1 %vm752_vm4, %v10166_v28  ;;  %v10329_v5 = vld [vmem:[#allocation2 + $0x120] sm:$0xff]  ;;  %v5308_v19 = vld [vmem:[%s11499_s5 + $0x10] sm:$0xff] }
 0x24e   :  { %7711 = vmatprep.mubr.msk.f32.mxu1 %vm752_vm4, %v10170_v36 }
 0x251   :  { %7712 = vmatmul.mubr.msk.f32.gmra.mrb[26].mxu1 %vm752_vm4, %v10174_v7 }
 0x252   :  { %7714 = vmatprep.mubr.msk.f32.mxu1 %vm752_vm4, %v3024_v43 }
 0x255   :  { %7715 = vmatmul.mubr.msk.f32.gmra.mrb[28].mxu1 %vm752_vm4, %v10179_v30 }
 0x256   :  { %7717 = vmatprep.mubr.msk.f32.mxu1 %vm752_vm4, %v10183_v34 }
 0x259   :  { %7718 = vmatmul.mubr.msk.f32.gmra.mrb[30].mxu1 %vm752_vm4, %v10187_v12 }
 0x25a   :  { %7720 = vmatprep.mubr.msk.f32.mxu1 %vm752_vm4, %v10191_v13 }
 0x25d   :  { %7721 = vmatmul.mubr.msk.f32.gmra.mrb[32].mxu1 %vm752_vm4, %v10195_v2 }
 0x25e   :  { %7723 = vmatprep.mubr.msk.f32.mxu1 %vm752_vm4, %v10199_v15 }
 0x261   :  { %7724 = vmatmul.mubr.msk.f32.gmra.mrb[34].mxu1 %vm752_vm4, %v10203_v49 }
 0x262   :  { %7734 = vmatprep.mubr.msk.f32.mxu1 %vm752_vm4, %v3246_v35  ;;  %v10377_v35 = vld [vmem:[#allocation2 + $0x121] sm:$0xff] }
 0x265   :  { %7735 = vmatmul.mubr.msk.f32.vlgmr.msra.gmra.mrb[20].mxu1 %vm752_vm4, %v10214_v24 }
 0x266   :  { %8322 = vmatpush3.bf16.msra.mxu1 %v8319_v33  ;;  %7737 = vmatprep.mubr.msk.f32.mxu1 %vm752_vm4, %v10224_v4  ;;  %v6957_v33 = vld [vmem:[%s11497_s3 + $0xc0] sm:$0xff] }
 0x267   :  { %8324 = vmatprep.subr.bf16.mxu1 %v8323_v55  ;;  %v8343_v43 = vpack.c.bf16 %v6958_v26, %v6957_v33  ;;  %v6997_v33 = vld [vmem:[%s11497_s3 + $0x100] sm:$0xff]  ;;  %v6998_v26 = vld [vmem:[%s11497_s3 + $0x108] sm:$0xff] }
 0x269   :  { %7738 = vmatmul.mubr.msk.f32.gmra.mrb[22].mxu1 %vm752_vm4, %v10228_v54 }
 0x26a   :  { %7740 = vmatprep.mubr.msk.f32.mxu1 %vm752_vm4, %v10232_v39  ;;  %8326 = vmatpush3.bf16.msra.mxu1 %v8323_v55  ;;  %v5307_v55 = vld [vmem:[%s11499_s5 + $0x8] sm:$0xff] }
 0x26b   :  { %8328 = vmatprep.subr.bf16.mxu1 %v8327_v18 }
 0x26d   :  { %7741 = vmatmul.mubr.msk.f32.gmra.mrb[24].mxu1 %vm752_vm4, %v10236_v21 }
 0x26e   :  { %7743 = vmatprep.mubr.msk.f32.mxu1 %vm752_vm4, %v10240_v53 }
 0x271   :  { %7744 = vmatmul.mubr.msk.f32.gmra.mrb[26].mxu1 %vm752_vm4, %v10244_v60 }
 0x272   :  { %7746 = vmatprep.mubr.msk.f32.mxu1 %vm752_vm4, %v3254_v50  ;;  %v5309_v50 = vld [vmem:[%s11499_s5 + $0x18] sm:$0xff] }
 0x275   :  { %7747 = vmatmul.mubr.msk.f32.gmra.mrb[28].mxu1 %vm752_vm4, %v10249_v0 }
 0x276   :  { %7749 = vmatprep.mubr.msk.f32.mxu1 %vm752_vm4, %v10253_v57 }
 0x279   :  { %7750 = vmatmul.mubr.msk.f32.gmra.mrb[30].mxu1 %vm752_vm4, %v10257_v61 }
 0x27a   :  { %7752 = vmatprep.mubr.msk.f32.mxu1 %vm752_vm4, %v10261_v42 }
 0x27d   :  { %7753 = vmatmul.mubr.msk.f32.gmra.mrb[32].mxu1 %vm752_vm4, %v10265_v40 }
 0x27e   :  { %7755 = vmatprep.mubr.msk.f32.mxu1 %vm752_vm4, %v10269_v20 }
 0x281   :  { %7756 = vmatmul.mubr.msk.f32.gmra.mrb[34].mxu1 %vm752_vm4, %v10273_v52 }
 0x282   :  { %7766 = vmatprep.mubr.msk.f32.mxu1 %vm752_vm4, %v3476_v25  ;;  %v6978_v25 = vld [vmem:[%s11497_s3 + $0xe8] sm:$0xff] }
 0x283   :  { %v8351_v10 = vpack.c.bf16 %v6978_v25, %v6977_v16  ;;  %v10600_v16 = vld [vmem:[%s11499_s5 + $0x50] sm:$0xff]  ;;  %v10605_v25 = vld [vmem:[%s11499_s5 + $0x58] sm:$0xff] }
 0x285   :  { %7767 = vmatmul.mubr.msk.f32.vlgmr.msra.gmra.mrb[20].mxu1 %vm752_vm4, %v10284_v8 }
 0x286   :  { %8330 = vmatpush3.bf16.msra.mxu1 %v8327_v18  ;;  %7769 = vmatprep.mubr.msk.f32.mxu1 %vm752_vm4, %v10294_v56  ;;  %v8368_v18 = vpack.c.bf16 %v5307_v55, %v5306_v47  ;;  %v10589_v55 = vld [vmem:[%s11499_s5 + $0x40] sm:$0xff] }
 0x287   :  { %8332 = vmatprep.subr.bf16.mxu1 %v8331_v63 }
 0x288   :  { %8369 = vmatpush3.bf16.msra.mxu0 %v8368_v18 }
 0x289   :  { %7770 = vmatmul.mubr.msk.f32.gmra.mrb[22].mxu1 %vm752_vm4, %v8768_v27  ;;  %8370 = vmatprep.subr.bf16.mxu0 %v11506_v62  ;;  %v10429_v27 = vld [vmem:[#allocation2 + $0x82] sm:$0xff] }
 0x28a   :  { %7772 = vmatprep.mubr.msk.f32.mxu1 %vm752_vm4, %v10299_v23  ;;  %8334 = vmatpush3.bf16.msra.mxu1 %v8331_v63  ;;  %v8371_v63 = vpack.c.bf16 %v5309_v50, %v5308_v19  ;;  %v10594_v19 = vld [vmem:[%s11499_s5 + $0x48] sm:$0xff] }
 0x28b   :  { %8336 = vmatprep.subr.bf16.mxu1 %v8335_v58 }
 0x28c   :  { %8372 = vmatpush3.bf16.msra.mxu0 %v8371_v63 }
 0x28d   :  { %7773 = vmatmul.mubr.msk.f32.gmra.mrb[24].mxu1 %vm752_vm4, %v10303_v51  ;;  %8373 = vmatprep.subr.bf16.mxu0 %v11506_v62 }
 0x28e   :  { %7775 = vmatprep.mubr.msk.f32.mxu1 %vm752_vm4, %v10307_v45 }
 0x291   :  { %7776 = vmatmul.mubr.msk.f32.gmra.mrb[26].mxu1 %vm752_vm4, %v10311_v41 }
 0x292   :  { %7778 = vmatprep.mubr.msk.f32.mxu1 %vm752_vm4, %v9951_v29  ;;  %v6939_v29 = vld [vmem:[%s11497_s3 + $0xb0] sm:$0xff] }
 0x293   :  { %v8339_v17 = vpack.c.bf16 %v6940_v9, %v6939_v29  ;;  %v10447_v29 = vld [vmem:[#allocation2 + $0x122] sm:$0xff]  ;;  %v6980_v9 = vld [vmem:[%s11497_s3 + $0xf8] sm:$0xff] }
 0x295   :  { %7779 = vmatmul.mubr.msk.f32.gmra.mrb[28].mxu1 %vm752_vm4, %v10050_v1 }
 0x296   :  { %7781 = vmatprep.mubr.msk.f32.mxu1 %vm752_vm4, %v10108_v32 }
 0x299   :  { %7782 = vmatmul.mubr.msk.f32.gmra.mrb[30].mxu1 %vm752_vm4, %v10112_v59 }
 0x29a   :  { %7784 = vmatprep.mubr.msk.f32.mxu1 %vm752_vm4, %v10116_v44 }
 0x29d   :  { %7785 = vmatmul.mubr.msk.f32.gmra.mrb[32].mxu1 %vm752_vm4, %v10120_v14 }
 0x29e   :  { %7787 = vmatprep.mubr.msk.f32.mxu1 %vm752_vm4, %v10124_v46 }
 0x2a1   :  { %7788 = vmatmul.mubr.msk.f32.gmra.mrb[34].mxu1 %vm752_vm4, %v10329_v5 }
 0x2a2   :  { %7798 = vmatprep.mubr.msk.f32.mxu1 %vm752_vm4, %v10138_v6  ;;  %v10359_v6 = vld [vmem:[#allocation2 + $0x81] sm:$0xff] }
 0x2a5   :  { %7799 = vmatmul.mubr.msk.f32.vlgmr.msra.gmra.mrb[20].mxu1 %vm752_vm4, %v10149_v38 }
 0x2a6   :  { %8338 = vmatpush3.bf16.msra.mxu1 %v8335_v58  ;;  %7801 = vmatprep.mubr.msk.f32.mxu1 %vm752_vm4, %v10157_v11 }
 0x2a7   :  { %8340 = vmatprep.subr.bf16.mxu1 %v8339_v17 }
 0x2a9   :  { %7802 = vmatmul.mubr.msk.f32.gmra.mrb[22].mxu1 %vm752_vm4, %v10162_v48 }
 0x2aa   :  { %7804 = vmatprep.mubr.msk.f32.mxu1 %vm752_vm4, %v10166_v28  ;;  %8342 = vmatpush3.bf16.msra.mxu1 %v8339_v17 }
 0x2ab   :  { %8344 = vmatprep.subr.bf16.mxu1 %v8343_v43 }
 0x2ad   :  { %7805 = vmatmul.mubr.msk.f32.gmra.mrb[24].mxu1 %vm752_vm4, %v10170_v36 }
 0x2ae   :  { %7807 = vmatprep.mubr.msk.f32.mxu1 %vm752_vm4, %v10174_v7 }
 0x2b1   :  { %7808 = vmatmul.mubr.msk.f32.gmra.mrb[26].mxu1 %vm752_vm4, %v10359_v6 }
 0x2b2   :  { %7810 = vmatprep.mubr.msk.f32.mxu1 %vm752_vm4, %v10179_v30  ;;  %v6959_v30 = vld [vmem:[%s11497_s3 + $0xd0] sm:$0xff] }
 0x2b3   :  { %v8347_v3 = vpack.c.bf16 %v6960_v22, %v6959_v30  ;;  %v8359_v30 = vpack.c.bf16 %v6998_v26, %v6997_v33  ;;  %v10640_v33 = vld [vmem:[%s11499_s5 + $0x88] sm:$0xff] }
 0x2b5   :  { %7811 = vmatmul.mubr.msk.f32.gmra.mrb[28].mxu1 %vm752_vm4, %v10183_v34 }
 0x2b6   :  { %7813 = vmatprep.mubr.msk.f32.mxu1 %vm752_vm4, %v10187_v12 }
 0x2b9   :  { %7814 = vmatmul.mubr.msk.f32.gmra.mrb[30].mxu1 %vm752_vm4, %v10191_v13 }
 0x2ba   :  { %7816 = vmatprep.mubr.msk.f32.mxu1 %vm752_vm4, %v10195_v2 }
 0x2bd   :  { %7817 = vmatmul.mubr.msk.f32.gmra.mrb[32].mxu1 %vm752_vm4, %v10199_v15 }
 0x2be   :  { %7819 = vmatprep.mubr.msk.f32.mxu1 %vm752_vm4, %v10203_v49 }
 0x2c1   :  { %7820 = vmatmul.mubr.msk.f32.gmra.mrb[34].mxu1 %vm752_vm4, %v10377_v35 }
 0x2c2   :  { %7830 = vmatprep.mubr.msk.f32.mxu1 %vm752_vm4, %v10214_v24  ;;  %v5310_v24 = vld [vmem:[%s11499_s5 + $0x20] sm:$0xff] }
 0x2c3   :  { %v8374_v58 = vpack.c.bf16 %v5311_v37, %v5310_v24  ;;  %v10611_v37 = vld [vmem:[%s11499_s5 + $0x60] sm:$0xff] }
 0x2c5   :  { %7831 = vmatmul.mubr.msk.f32.vlgmr.msra.gmra.mrb[20].mxu1 %vm752_vm4, %v10224_v4  ;;  %8375 = vmatpush3.bf16.msra.mxu0 %v8374_v58  ;;  %v10621_v58 = vld [vmem:[%s11499_s5 + $0x70] sm:$0xff] }
 0x2c6   :  { %8346 = vmatpush3.bf16.msra.mxu1 %v8343_v43  ;;  %7833 = vmatprep.mubr.msk.f32.mxu1 %vm752_vm4, %v10228_v54  ;;  %v4169_v43 = vld [vmem:[#allocation2 + $0x40] sm:$0xff] }
 0x2c7   :  { %8348 = vmatprep.subr.bf16.mxu1 %v8347_v3  ;;  %8376 = vmatprep.subr.bf16.mxu0 %v11506_v62 }
 0x2c9   :  { %7834 = vmatmul.mubr.msk.f32.gmra.mrb[22].mxu1 %vm752_vm4, %v10232_v39 }
 0x2ca   :  { %7836 = vmatprep.mubr.msk.f32.mxu1 %vm752_vm4, %v10236_v21  ;;  %8350 = vmatpush3.bf16.msra.mxu1 %v8347_v3 }
 0x2cb   :  { %8352 = vmatprep.subr.bf16.mxu1 %v8351_v10 }
 0x2cd   :  { %7837 = vmatmul.mubr.msk.f32.gmra.mrb[24].mxu1 %vm752_vm4, %v10240_v53 }
 0x2ce   :  { %7839 = vmatprep.mubr.msk.f32.mxu1 %vm752_vm4, %v10244_v60 }
 0x2d1   :  { %7840 = vmatmul.mubr.msk.f32.gmra.mrb[26].mxu1 %vm752_vm4, %v10429_v27 }
 0x2d2   :  { %7842 = vmatprep.mubr.msk.f32.mxu1 %vm752_vm4, %v10249_v0  ;;  %v6979_v0 = vld [vmem:[%s11497_s3 + $0xf0] sm:$0xff] }
 0x2d3   :  { %v8355_v17 = vpack.c.bf16 %v6980_v9, %v6979_v0  ;;  %v10630_v9 = vld [vmem:[%s11499_s5 + $0x78] sm:$0xff] }
 0x2d5   :  { %7843 = vmatmul.mubr.msk.f32.gmra.mrb[28].mxu1 %vm752_vm4, %v10253_v57 }
 0x2d6   :  { %7845 = vmatprep.mubr.msk.f32.mxu1 %vm752_vm4, %v10257_v61 }
 0x2d9   :  { %7846 = vmatmul.mubr.msk.f32.gmra.mrb[30].mxu1 %vm752_vm4, %v10261_v42 }
 0x2da   :  { %7848 = vmatprep.mubr.msk.f32.mxu1 %vm752_vm4, %v10265_v40 }
 0x2dd   :  { %7849 = vmatmul.mubr.msk.f32.gmra.mrb[32].mxu1 %vm752_vm4, %v10269_v20 }
 0x2de   :  { %7851 = vmatprep.mubr.msk.f32.mxu1 %vm752_vm4, %v10273_v52 }
 0x2e1   :  { %7852 = vmatmul.mubr.msk.f32.gmra.mrb[34].mxu1 %vm752_vm4, %v10447_v29 }
 0x2e2   :  { %7862 = vmatprep.mubr.msk.f32.mxu1 %vm752_vm4, %v10284_v8  ;;  %v4174_v8 = vld [vmem:[#allocation2 + $0x90] sm:$0xff] }
 0x2e5   :  { %7863 = vmatmul.mubr.msk.f32.vlgmr.msra.gmra.mrb[20].mxu1 %vm752_vm4, %v10294_v56  ;;  %v4182_v56 = vld [vmem:[#allocation2 + $0x130] sm:$0xff] }
 0x2e6   :  { %8354 = vmatpush3.bf16.msra.mxu1 %v8351_v10  ;;  %7865 = vmatprep.mubr.msk.f32.mxu1 %vm752_vm4, %v4169_v43  ;;  %v10616_v10 = vld [vmem:[%s11499_s5 + $0x68] sm:$0xff] }
 0x2e7   :  { %8356 = vmatprep.subr.bf16.mxu1 %v8355_v17 }
 0x2e9   :  { %7866 = vmatmul.mubr.msk.f32.gmra.mrb[22].mxu1 %vm752_vm4, %v10299_v23 }
 0x2ea   :  { %7868 = vmatprep.mubr.msk.f32.mxu1 %vm752_vm4, %v10303_v51  ;;  %8358 = vmatpush3.bf16.msra.mxu1 %v8355_v17  ;;  %v10635_v17 = vld [vmem:[%s11499_s5 + $0x80] sm:$0xff] }
 0x2eb   :  { %8360 = vmatprep.subr.bf16.mxu1 %v8359_v30 }
 0x2ed   :  { %7869 = vmatmul.mubr.msk.f32.gmra.mrb[24].mxu1 %vm752_vm4, %v10307_v45 }
 0x2ee   :  { %7871 = vmatprep.mubr.msk.f32.mxu1 %vm752_vm4, %v10311_v41 }
 0x2f1   :  { %7872 = vmatmul.mubr.msk.f32.gmra.mrb[26].mxu1 %vm752_vm4, %v4174_v8 }
 0x2f2   :  { %7874 = vmatprep.mubr.msk.f32.mxu1 %vm752_vm4, %v10050_v1  ;;  %v6999_v1 = vld [vmem:[%s11497_s3 + $0x110] sm:$0xff] }
 0x2f5   :  { %7875 = vmatmul.mubr.msk.f32.gmra.mrb[28].mxu1 %vm752_vm4, %v10108_v32  ;;  %v7000_v32 = vld [vmem:[%s11497_s3 + $0x118] sm:$0xff] }
 0x2f6   :  { %7877 = vmatprep.mubr.msk.f32.mxu1 %vm752_vm4, %v10112_v59  ;;  %v8363_v59 = vpack.c.bf16 %v7000_v32, %v6999_v1  ;;  %v10649_v1 = vld [vmem:[%s11499_s5 + $0x90] sm:$0xff]  ;;  %v10654_v32 = vld [vmem:[%s11499_s5 + $0x98] sm:$0xff] }
 0x2f9   :  { %7878 = vmatmul.mubr.msk.f32.gmra.mrb[30].mxu1 %vm752_vm4, %v10116_v44  ;;  %v4404_v44 = vld [vmem:[#allocation2 + $0x91] sm:$0xff] }
 0x2fa   :  { %7880 = vmatprep.mubr.msk.f32.mxu1 %vm752_vm4, %v10120_v14  ;;  %v4412_v14 = vld [vmem:[#allocation2 + $0x131] sm:$0xff] }
 0x2fd   :  { %7881 = vmatmul.mubr.msk.f32.gmra.mrb[32].mxu1 %vm752_vm4, %v10124_v46  ;;  %v4634_v46 = vld [vmem:[#allocation2 + $0x92] sm:$0xff] }
 0x2fe   :  { %7883 = vmatprep.mubr.msk.f32.mxu1 %vm752_vm4, %v10329_v5 }
 0x301   :  { %7884 = vmatmul.mubr.msk.f32.gmra.mrb[34].mxu1 %vm752_vm4, %v4182_v56 }
 0x302   :  { %7894 = vmatprep.mubr.msk.f32.mxu1 %vm752_vm4, %v10149_v38  ;;  %v4642_v38 = vld [vmem:[#allocation2 + $0x132] sm:$0xff] }
 0x305   :  { %7895 = vmatmul.mubr.msk.f32.vlgmr.msra.gmra.mrb[20].mxu1 %vm752_vm4, %v10157_v11  ;;  %v5312_v11 = vld [vmem:[%s11499_s5 + $0x30] sm:$0xff] }
 0x306   :  { %8362 = vmatpush3.bf16.msra.mxu1 %v8359_v30  ;;  %7897 = vmatprep.mubr.msk.f32.mxu1 %vm752_vm4, %v10162_v48  ;;  %v5313_v48 = vld [vmem:[%s11499_s5 + $0x38] sm:$0xff] }
 0x307   :  { %8364 = vmatprep.subr.bf16.mxu1 %v8363_v59 }
 0x309   :  { %7898 = vmatmul.mubr.msk.f32.gmra.mrb[22].mxu1 %vm752_vm4, %v10166_v28  ;;  %v8377_v28 = vpack.c.bf16 %v5313_v48, %v5312_v11  ;;  %v10663_v11 = vld [vmem:[%s11499_s5 + $0xa0] sm:$0xff]  ;;  %v10668_v48 = vld [vmem:[%s11499_s5 + $0xa8] sm:$0xff] }
 0x30a   :  { %7900 = vmatprep.mubr.msk.f32.mxu1 %vm752_vm4, %v10170_v36  ;;  %8366 = vmatpush3.bf16.msra.mxu1 %v8363_v59  ;;  %v11520_v36 = vmov 0.0  }
 0x30b   :  { %8559 = vmatprep.subr.bf16.mxu1 %v11506_v62  ;;  %8378 = vmatpush3.bf16.msra.mxu0 %v8377_v28 }
 0x30c   :  { %8379 = vmatprep.subr.bf16.mxu0 %v11506_v62  ;;  %7966 = vmatprep.mubr.msk.f32.mxu0 %vm8800_vm14, %v11520_v36 }
 0x30d   :  { %7901 = vmatmul.mubr.msk.f32.gmra.mrb[24].mxu1 %vm752_vm4, %v10174_v7  ;;  %v10573_v7 = vld [vmem:[%s11498_s4] ss:$0 sm:$0xff] }
 0x30e   :  { %7903 = vmatprep.mubr.msk.f32.mxu1 %vm752_vm4, %v10359_v6 }
 0x311   :  { %7904 = vmatmul.mubr.msk.f32.gmra.mrb[26].mxu1 %vm752_vm4, %v4404_v44 }
 0x312   :  { %7906 = vmatprep.mubr.msk.f32.mxu1 %vm752_vm4, %v10183_v34 }
 0x315   :  { %7907 = vmatmul.mubr.msk.f32.gmra.mrb[28].mxu1 %vm752_vm4, %v10187_v12 }
 0x316   :  { %7909 = vmatprep.mubr.msk.f32.mxu1 %vm752_vm4, %v10191_v13 }
 0x319   :  { %7910 = vmatmul.mubr.msk.f32.gmra.mrb[30].mxu1 %vm752_vm4, %v10195_v2 }
 0x31a   :  { %7912 = vmatprep.mubr.msk.f32.mxu1 %vm752_vm4, %v10199_v15 }
 0x31d   :  { %7913 = vmatmul.mubr.msk.f32.gmra.mrb[32].mxu1 %vm752_vm4, %v10203_v49 }
 0x31e   :  { %7915 = vmatprep.mubr.msk.f32.mxu1 %vm752_vm4, %v10377_v35 }
 0x321   :  { %7916 = vmatmul.mubr.msk.f32.gmra.mrb[34].mxu1 %vm752_vm4, %v4412_v14 }
 0x322   :  { %7926 = vmatprep.mubr.msk.f32.mxu1 %vm752_vm4, %v10224_v4 }
 0x325   :  { %7927 = vmatmul.mubr.msk.f32.vlgmr.msra.gmra.mrb[20].mxu1 %vm752_vm4, %v10228_v54 }
 0x326   :  { %7929 = vmatprep.mubr.msk.f32.mxu1 %vm752_vm4, %v10232_v39 }
 0x329   :  { %7930 = vmatmul.mubr.msk.f32.gmra.mrb[22].mxu1 %vm752_vm4, %v10236_v21 }
 0x32a   :  { %7932 = vmatprep.mubr.msk.f32.mxu1 %vm752_vm4, %v10240_v53 }
 0x32d   :  { %7933 = vmatmul.mubr.msk.f32.gmra.mrb[24].mxu1 %vm752_vm4, %v10244_v60 }
 0x32e   :  { %7935 = vmatprep.mubr.msk.f32.mxu1 %vm752_vm4, %v10429_v27 }
 0x331   :  { %7936 = vmatmul.mubr.msk.f32.gmra.mrb[26].mxu1 %vm752_vm4, %v4634_v46 }
 0x332   :  { %7938 = vmatprep.mubr.msk.f32.mxu1 %vm752_vm4, %v10253_v57 }
 0x335   :  { %7939 = vmatmul.mubr.msk.f32.gmra.mrb[28].mxu1 %vm752_vm4, %v10257_v61 }
 0x336   :  { %7941 = vmatprep.mubr.msk.f32.mxu1 %vm752_vm4, %v10261_v42 }
 0x339   :  { %7942 = vmatmul.mubr.msk.f32.gmra.mrb[30].mxu1 %vm752_vm4, %v10265_v40 }
 0x33a   :  { %7944 = vmatprep.mubr.msk.f32.mxu1 %vm752_vm4, %v10269_v20 }
 0x33d   :  { %7945 = vmatmul.mubr.msk.f32.gmra.mrb[32].mxu1 %vm752_vm4, %v10273_v52 }
 0x33e   :  { %7947 = vmatprep.mubr.msk.f32.mxu1 %vm752_vm4, %v10447_v29 }
 0x341   :  { %7948 = vmatmul.mubr.msk.f32.gmra.mrb[34].mxu1 %vm752_vm4, %v4642_v38 }
 0x342   :  { %8286 = vmatprep.mubr.msk.f32.mxu1 %vm8800_vm14, %v11520_v36 }
 0x3f8   :  { %v7928_v34 = vpop.f32.mrb[20].mxu1 }
 0x3f9   :  { %v8585_v12 = vadd.f32 %v7928_v34, %v10573_v7  ;;  %v4762_v13 = vpop.f32.mrb[21].mxu1 }
 0x3fa   :  { %v8586_v2 = vadd.f32 %v10573_v7, %v4762_v13 }
 0x3fb   :  { %v4858_v15 = vmax.f32 %v8585_v12, 0.0 }
 0x3fc   :  { %v4857_v49 = vmax.f32 %v8586_v2, 0.0  ;;  %v7931_v4 = vpop.f32.mrb[22].mxu1  ;;  %v10680_v2 = vld [vmem:[%s11499_s5 + $0xb0] sm:$0xff] }
 0x3fd   :  { %v4875_v54 = vsel %vm4873_vm15, %v4858_v15, -inf  ;;  %v8587_v39 = vadd.f32 %v7931_v4, %v10573_v7  ;;  %v4772_v21 = vpop.f32.mrb[23].mxu1  ;;  %v10685_v15 = vld [vmem:[%s11499_s5 + $0xb8] sm:$0xff] }
 0x3fe   :  { %v4874_v53 = vsel %vm4873_vm15, %v4857_v49, -inf  ;;  %v8588_v60 = vadd.f32 %v10573_v7, %v4772_v21  ;;  %v10690_v49 = vld [vmem:[%s11499_s5 + $0xc0] sm:$0xff] }
 0x3ff   :  { %v4876_v57 = vmax.f32 %v4874_v53, %v4875_v54  ;;  %v4860_v61 = vmax.f32 %v8587_v39, 0.0  ;;  %11521 = vst [vmem:[#allocation6_spill] sm:$0xff] %v10690_v49  ;;  %v10701_v53 = vld [vmem:[%s11499_s5 + $0xc8] sm:$0xff] }
 0x400   :  { %v4859_v42 = vmax.f32 %v8588_v60, 0.0  ;;  %v7934_v40 = vpop.f32.mrb[24].mxu1  ;;  %11522 = vst [vmem:[#allocation7_spill] sm:$0xff] %v10701_v53  ;;  %v10706_v60 = vld [vmem:[%s11499_s5 + $0xd0] sm:$0xff] }
 0x401   :  { %v4913_v20 = vrot.slane %v4876_v57, %v9233_v31  ;;  %v4878_v52 = vsel %vm4873_vm15, %v4860_v61, -inf  ;;  %v8589_v23 = vadd.f32 %v7934_v40, %v10573_v7  ;;  %v4782_v51 = vpop.f32.mrb[25].mxu1  ;;  %v4906_v5 = vcombine.high %v4876_v57, %v4876_v57  ;;  %11523 = vst [vmem:[#allocation8_spill] sm:$0xff] %v10706_v60  ;;  %v10711_v57 = vld [vmem:[%s11499_s5 + $0xd8] sm:$0xff] }
 0x402   :  { %v4877_v45 = vsel %vm4873_vm15, %v4859_v42, -inf  ;;  %v8590_v41 = vadd.f32 %v10573_v7, %v4782_v51  ;;  %11524 = vst [vmem:[#allocation9_spill] sm:$0xff] %v10711_v57 }
 0x403   :  { %v4879_v6 = vmax.f32 %v4877_v45, %v4878_v52  ;;  %v4862_v35 = vmax.f32 %v8589_v23, 0.0  ;;  %v5075_v18 = vsel %vm5074_vm0, %v4913_v20, -inf  ;;  %v4921_v63 = vcombine.high %v4913_v20, %v4913_v20 }
 0x404   :  { %v4861_v22 = vmax.f32 %v8590_v41, 0.0  ;;  %v7937_v47 = vpop.f32.mrb[26].mxu1  ;;  %v4920_v27 = vrot.slane %v4906_v5, %v9233_v31  ;;  %v5076_v26 = vrot.slane %v5075_v18, 4 }
 0x405   :  { %v4923_v50 = vcombine.high %v4879_v6, %v4879_v6  ;;  %v4792_v3 = vpop.f32.mrb[27].mxu1  ;;  %v4930_v24 = vrot.slane %v4879_v6, %v9233_v31  ;;  %v4881_v43 = vsel %vm4873_vm15, %v4862_v35, -inf  ;;  %v5082_v28 = vsel %vm5074_vm0, %v4921_v63, -inf }
 0x406   :  { %v4880_v30 = vsel %vm4873_vm15, %v4861_v22, -inf  ;;  %v4922_v4 = vcombine.high %v4920_v27, %v4920_v27  ;;  %v5077_v61 = vmax.f32 %v5075_v18, %v5076_v26  ;;  %v5089_v42 = vsel %vm5074_vm0, %v4920_v27, -inf }
 0x407   :  { %v4937_v29 = vrot.slane %v4923_v50, %v9233_v31  ;;  %v4938_v59 = vcombine.high %v4930_v24, %v4930_v24  ;;  %v5103_v14 = vsel %vm5074_vm0, %v4930_v24, -inf  ;;  %v4882_v40 = vmax.f32 %v4880_v30, %v4881_v43 }
 0x408   :  { %v7940_v8 = vpop.f32.mrb[28].mxu1  ;;  %v5083_v23 = vrot.slane %v5082_v28, 4  ;;  %v8591_v51 = vadd.f32 %v7937_v47, %v10573_v7  ;;  %v8592_v45 = vadd.f32 %v10573_v7, %v4792_v3  ;;  %v5090_v50 = vrot.slane %v5089_v42, 4 }
 0x409   :  { %v4939_v44 = vcombine.high %v4937_v29, %v4937_v29  ;;  %v10658_v46 = vsel %vm5074_vm0, %v4937_v29, -inf  ;;  %v4802_v38 = vpop.f32.mrb[29].mxu1  ;;  %v5110_v54 = vsel %vm5074_vm0, %v4938_v59, -inf  ;;  %v4940_v6 = vcombine.high %v4882_v40, %v4882_v40 }
 0x40a   :  { %v4947_v35 = vrot.slane %v4882_v40, %v9233_v31  ;;  %v5096_v63 = vsel %vm5074_vm0, %v4922_v4, -inf  ;;  %v4864_v24 = vmax.f32 %v8591_v51, 0.0  ;;  %v4863_v47 = vmax.f32 %v8592_v45, 0.0 }
 0x40b   :  { %v10694_v39 = vsel %vm5074_vm0, %v4939_v44, -inf  ;;  %v5078_v27 = vrot.slane %v5077_v61, 2  ;;  %v4954_v3 = vrot.slane %v4940_v6, %v9233_v31  ;;  %v10728_v30 = vmax.f32 %v5082_v28, %v5083_v23 }
 0x40c   :  { %v7943_v20 = vpop.f32.mrb[30].mxu1  ;;  %v4955_v29 = vcombine.high %v4947_v35, %v4947_v35  ;;  %v5131_v26 = vsel %vm5074_vm0, %v4947_v35, -inf  ;;  %v5104_v59 = vrot.slane %v5103_v14, 4  ;;  %v4884_v44 = vsel %vm4873_vm15, %v4864_v24, -inf }
 0x40d   :  { %v4812_v41 = vpop.f32.mrb[31].mxu1  ;;  %v4883_v40 = vsel %vm4873_vm15, %v4863_v47, -inf  ;;  %v4956_v22 = vcombine.high %v4954_v3, %v4954_v3  ;;  %v5145_v51 = vsel %vm5074_vm0, %v4954_v3, -inf  ;;  %v10734_v5 = vmax.f32 %v5089_v42, %v5090_v50 }
 0x40e   :  { %v5138_v4 = vsel %vm5074_vm0, %v4955_v29, -inf  ;;  %v4885_v45 = vmax.f32 %v4883_v40, %v4884_v44  ;;  %v5097_v6 = vrot.slane %v5096_v63, 4  ;;  %v5118_v35 = vrot.slane %v10658_v46, 4 }
 0x40f   :  { %v8593_v28 = vadd.f32 %v7940_v8, %v10573_v7  ;;  %v5111_v23 = vrot.slane %v5110_v54, 4  ;;  %v10739_v52 = vsel %vm5074_vm0, %v4956_v22, -inf  ;;  %v10742_v13 = vmax.f32 %v5077_v61, %v5078_v27 }
 0x410   :  { %v7946_v43 = vpop.f32.mrb[32].mxu1  ;;  %v4957_v24 = vcombine.high %v4885_v45, %v4885_v45  ;;  %v4964_v47 = vrot.slane %v4885_v45, %v9233_v31  ;;  %v5105_v29 = vmax.f32 %v5103_v14, %v5104_v59  ;;  %v5132_v3 = vrot.slane %v5131_v26, 4 }
 0x411   :  { %v4822_v18 = vpop.f32.mrb[33].mxu1  ;;  %v8594_v42 = vadd.f32 %v10573_v7, %v4802_v38  ;;  %v4866_v22 = vmax.f32 %v8593_v28, 0.0  ;;  %v10754_v61 = vmax.f32 %v10658_v46, %v5118_v35  ;;  %v5125_v14 = vrot.slane %v10694_v39, 4 }
 0x412   :  { %v4971_v44 = vrot.slane %v4957_v24, %v9233_v31  ;;  %v4972_v40 = vcombine.high %v4964_v47, %v4964_v47  ;;  %v10749_v8 = vsel %vm5074_vm0, %v4964_v47, -inf  ;;  %v10757_v27 = vmax.f32 %v5110_v54, %v5111_v23 }
 0x413   :  { %v5106_v47 = vrot.slane %v5105_v29, 2  ;;  %v5133_v28 = vmax.f32 %v5131_v26, %v5132_v3  ;;  %v4887_v34 = vsel %vm4873_vm15, %v4866_v22, -inf  ;;  %v4865_v56 = vmax.f32 %v8594_v42, 0.0 }
 0x414   :  { %v7949_v21 = vpop.f32.mrb[34].mxu1  ;;  %v4973_v38 = vcombine.high %v4971_v44, %v4971_v44  ;;  %v10760_v59 = vsel %vm5074_vm0, %v4972_v40, -inf  ;;  %v10763_v24 = vsel %vm5074_vm0, %v4971_v44, -inf  ;;  %v5139_v45 = vrot.slane %v5138_v4, 4 }
 0x415   :  { %v10745_v50 = vpop.f32.mrb[35].mxu1  ;;  %v8595_v35 = vadd.f32 %v7943_v20, %v10573_v7  ;;  %v8596_v54 = vadd.f32 %v10573_v7, %v4812_v41  ;;  %v10772_v40 = vmax.f32 %v5096_v63, %v5097_v6  ;;  %v10775_v44 = vmax.f32 %v10694_v39, %v5125_v14 }
 0x416   :  { %v10767_v46 = vsel %vm5074_vm0, %v4973_v38, -inf  ;;  %v4886_v26 = vsel %vm4873_vm15, %v4865_v56, -inf  ;;  %v5146_v3 = vrot.slane %v5145_v51, 4  ;;  %v10778_v12 = vmax.f32 %v5105_v29, %v5106_v47 }
 0x417   :  { %v4888_v22 = vmax.f32 %v4886_v26, %v4887_v34  ;;  %v4868_v42 = vmax.f32 %v8595_v35, 0.0  ;;  %v4867_v62 = vmax.f32 %v8596_v54, 0.0  ;;  %v8597_v41 = vadd.f32 %v7946_v43, %v10573_v7 }
 0x418   :  { %v5134_v0 = vrot.slane %v5133_v28, 2  ;;  %v10783_v63 = vmax.f32 %v5138_v4, %v5139_v45  ;;  %v8598_v14 = vadd.f32 %v10573_v7, %v4822_v18  ;;  %v8599_v29 = vadd.f32 %v7949_v21, %v10573_v7 }
 0x419   :  { %v4981_v39 = vrot.slane %v4888_v22, %v9233_v31  ;;  %v4890_v6 = vsel %vm4873_vm15, %v4868_v42, -inf  ;;  %v4974_v56 = vcombine.high %v4888_v22, %v4888_v22  ;;  %v4889_v34 = vsel %vm4873_vm15, %v4867_v62, -inf }
 0x41a   :  { %v10790_v47 = vmax.f32 %v5145_v51, %v5146_v3  ;;  %v4891_v43 = vmax.f32 %v4889_v34, %v4890_v6  ;;  %v5153_v4 = vrot.slane %v10739_v52, 4  ;;  %v4870_v26 = vmax.f32 %v8597_v41, 0.0 }
 0x41b   :  { %v4989_v35 = vcombine.high %v4981_v39, %v4981_v39  ;;  %v5187_v54 = vsel %vm5074_vm0, %v4981_v39, -inf  ;;  %v4869_v20 = vmax.f32 %v8598_v14, 0.0  ;;  %v10794_v38 = vmax.f32 %v5133_v28, %v5134_v0 }
 0x41c   :  { %v5188_v45 = vrot.slane %v5187_v54, 4  ;;  %v4991_v18 = vcombine.high %v4891_v43, %v4891_v43  ;;  %v5160_v21 = vrot.slane %v10749_v8, 4  ;;  %v4988_v51 = vrot.slane %v4974_v56, %v9233_v31 }
 0x41d   :  { %v5194_v62 = vsel %vm5074_vm0, %v4989_v35, -inf  ;;  %v4998_v42 = vrot.slane %v4891_v43, %v9233_v31  ;;  %v5167_v6 = vrot.slane %v10760_v59, 4  ;;  %v5174_v41 = vrot.slane %v10763_v24, 4 }
 0x41e   :  { %v5189_v3 = vmax.f32 %v5187_v54, %v5188_v45  ;;  %v5005_v0 = vrot.slane %v4991_v18, %v9233_v31  ;;  %v5195_v34 = vrot.slane %v5194_v62, 4  ;;  %v4893_v14 = vsel %vm4873_vm15, %v4870_v26, -inf }
 0x41f   :  { %v4892_v35 = vsel %vm4873_vm15, %v4869_v20, -inf  ;;  %v5006_v22 = vcombine.high %v4998_v42, %v4998_v42  ;;  %v5215_v56 = vsel %vm5074_vm0, %v4998_v42, -inf  ;;  %v10812_v43 = vmax.f32 %v10749_v8, %v5160_v21 }
 0x420   :  { %v5190_v28 = vrot.slane %v5189_v3, 2  ;;  %v5007_v23 = vcombine.high %v5005_v0, %v5005_v0  ;;  %v10809_v54 = vsel %vm5074_vm0, %v5005_v0, -inf  ;;  %v5201_v39 = vsel %vm5074_vm0, %v4988_v51, -inf }
 0x421   :  { %v4872_v18 = vmax.f32 %v8599_v29, 0.0  ;;  %v10816_v60 = vmax.f32 %v10739_v52, %v5153_v4  ;;  %v10819_v26 = vmax.f32 %v10760_v59, %v5167_v6  ;;  %v5222_v20 = vsel %vm5074_vm0, %v5006_v22, -inf }
 0x422   :  { %v5191_v45 = vmax.f32 %v5189_v3, %v5190_v28  ;;  %v10823_v42 = vsel %vm5074_vm0, %v5007_v23, -inf  ;;  %v10826_v0 = vmax.f32 %v10763_v24, %v5174_v41  ;;  %v4990_v8 = vcombine.high %v4988_v51, %v4988_v51 }
 0x423   :  { %v4894_v3 = vmax.f32 %v4892_v35, %v4893_v14  ;;  %v5181_v28 = vrot.slane %v10767_v46, 4  ;;  %v5196_v29 = vmax.f32 %v5194_v62, %v5195_v34  ;;  %v5202_v57 = vrot.slane %v5201_v39, 4 }
 0x424   :  { %v5192_v21 = vrot.slane %v5191_v45, 1  ;;  %v8600_v52 = vadd.f32 %v10573_v7, %v10745_v50  ;;  %v5162_v59 = vrot.slane %v10812_v43, 2  ;;  %v4896_v23 = vsel %vm4873_vm15, %v4872_v18, -inf }
 0x425   :  { %v5008_v4 = vcombine.high %v4894_v3, %v4894_v3  ;;  %v5015_v22 = vrot.slane %v4894_v3, %v9233_v31  ;;  %v5216_v6 = vrot.slane %v5215_v56, 4  ;;  %v11525_v51 = vrot.slane %v10742_v13, 1 }
 0x426   :  { %v4871_v24 = vmax.f32 %v8600_v52, 0.0  ;;  %v5193_v14 = vmax.f32 %v5191_v45, %v5192_v21  ;;  %v5208_v62 = vsel %vm5074_vm0, %v4990_v8, -inf  ;;  %v5197_v50 = vrot.slane %v5196_v29, 2 }
 0x427   :  { %v5081_v41 = vmax.f32 %v10742_v13, %v11525_v51  ;;  %v5022_v34 = vrot.slane %v5008_v4, %v9233_v31  ;;  %v5023_v35 = vcombine.high %v5015_v22, %v5015_v22  ;;  %v5243_v7 = vsel %vm5074_vm0, %v5015_v22, -inf }
 0x428   :  { %v5203_v49 = vmax.f32 %v5201_v39, %v5202_v57  ;;  %v4895_v3 = vsel %vm4873_vm15, %v4871_v24, -inf  ;;  %v5217_v4 = vmax.f32 %v5215_v56, %v5216_v6  ;;  %v11526_v57 = vpack.c.bf16 %v10594_v19, %v10589_v55 }
 0x429   :  { %v5316_v18 = vsel %vm2628_vm7, %v5193_v14, %v5081_v41  ;;  %v5024_v53 = vcombine.high %v5022_v34, %v5022_v34  ;;  %v10843_v52 = vsel %vm5074_vm0, %v5023_v35, -inf  ;;  %v10846_v13 = vsel %vm5074_vm0, %v5022_v34, -inf }
 0x42a   :  { %v4897_v45 = vmax.f32 %v4895_v3, %v4896_v23  ;;  %7967 = vmatmul.mubr.msk.f32.vlgmr.msra.gmra.mrb[44].mxu0 %vm4873_vm15, %v5316_v18  ;;  %v11527_v39 = vrot.slane %v10728_v30, 2  ;;  %v5223_v24 = vrot.slane %v5222_v20, 4  ;;  %v11528_v14 = vmov 0.0|0.0  }
 0x42b   :  { %8381 = vmatpush3.bf16.msra.mxu0 %v11526_v57  ;;  %7985 = vmatprep.mubr.msk.f32.mxu0 %vm8800_vm14, %v11520_v36  ;;  %v10860_v23 = vsel %vm5074_vm0, %v5024_v53, -inf  ;;  %v5204_v56 = vrot.slane %v5203_v49, 2  ;;  %v5209_v6 = vrot.slane %v5208_v62, 4  ;;  %v5230_v55 = vrot.slane %v10809_v54, 4 }
 0x42c   :  { %v5086_v22 = vmax.f32 %v10728_v30, %v11527_v39  ;;  %v5025_v51 = vcombine.high %v4897_v45, %v4897_v45  ;;  %v5032_v41 = vrot.slane %v4897_v45, %v9233_v31  ;;  %8382 = vmatprep.subr.bf16.mxu0 %v11528_v14  ;;  %v5198_v19 = vmax.f32 %v5196_v29, %v5197_v50 }
 0x42d   :  { %v5244_v34 = vrot.slane %v5243_v7, 4  ;;  %v10868_v18 = vmax.f32 %v10767_v46, %v5181_v28  ;;  %v5218_v53 = vrot.slane %v5217_v4, 2  ;;  %v5237_v57 = vrot.slane %v10823_v42, 4 }
 0x42e   :  { %v5039_v35 = vrot.slane %v5025_v51, %v9233_v31  ;;  %v5040_v3 = vcombine.high %v5032_v41, %v5032_v41  ;;  %v5271_v30 = vsel %vm5074_vm0, %v5032_v41, -inf  ;;  %v11529_v45 = vpack.c.bf16 %v10605_v25, %v10600_v16 }
 0x42f   :  { %v5087_v39 = vrot.slane %v5086_v22, 1  ;;  %v5224_v21 = vmax.f32 %v5222_v20, %v5223_v24  ;;  %v10882_v46 = vmax.f32 %v10812_v43, %v5162_v59  ;;  %v5210_v28 = vmax.f32 %v5208_v62, %v5209_v6 }
 0x430   :  { %8384 = vmatpush3.bf16.msra.mxu0 %v11529_v45  ;;  %v5041_v8 = vcombine.high %v5039_v35, %v5039_v35  ;;  %v10875_v29 = vsel %vm5074_vm0, %v5040_v3, -inf  ;;  %v10878_v31 = vsel %vm5074_vm0, %v5039_v35, -inf  ;;  %v5231_v50 = vmax.f32 %v10809_v54, %v5230_v55 }
 0x431   :  { %8385 = vmatprep.subr.bf16.mxu0 %v11528_v14  ;;  %v5199_v51 = vrot.slane %v5198_v19, 1  ;;  %v5245_v16 = vmax.f32 %v5243_v7, %v5244_v34  ;;  %v11530_v20 = vrot.slane %v10734_v5, 2  ;;  %v5205_v41 = vmax.f32 %v5203_v49, %v5204_v56 }
 0x432   :  { %v10886_v25 = vsel %vm5074_vm0, %v5041_v8, -inf  ;;  %v5219_v35 = vmax.f32 %v5217_v4, %v5218_v53  ;;  %v10892_v3 = vmax.f32 %v10823_v42, %v5237_v57  ;;  %v11531_v43 = vpack.c.bf16 %v10616_v10, %v10611_v37 }
 0x433   :  { %v5093_v24 = vmax.f32 %v10734_v5, %v11530_v20  ;;  %v5088_v59 = vmax.f32 %v5086_v22, %v5087_v39  ;;  %v5200_v54 = vmax.f32 %v5198_v19, %v5199_v51  ;;  %v5225_v62 = vrot.slane %v5224_v21, 2 }
 0x434   :  { %8387 = vmatpush3.bf16.msra.mxu0 %v11531_v43  ;;  %v5206_v8 = vrot.slane %v5205_v41, 1  ;;  %v5099_v6 = vrot.slane %v10772_v40, 2  ;;  %v5232_v55 = vrot.slane %v5231_v50, 2  ;;  %v5251_v49 = vrot.slane %v10843_v52, 4 }
 0x435   :  { %8388 = vmatprep.subr.bf16.mxu0 %v11528_v14  ;;  %v5094_v7 = vrot.slane %v5093_v24, 1  ;;  %v5258_v5 = vrot.slane %v10846_v13, 4  ;;  %v5401_v42 = vsel %vm2628_vm7, %v5200_v54, %v5088_v59  ;;  %v5246_v4 = vrot.slane %v5245_v16, 2 }
 0x436   :  { %v5207_v37 = vmax.f32 %v5205_v41, %v5206_v8  ;;  %v5100_v10 = vmax.f32 %v10772_v40, %v5099_v6  ;;  %v11532_v22 = vpack.c.bf16 %v10630_v9, %v10621_v58  ;;  %v5211_v19 = vrot.slane %v5210_v28, 2 }
 0x437   :  { %v5095_v56 = vmax.f32 %v5093_v24, %v5094_v7  ;;  %v5108_v34 = vrot.slane %v10778_v12, 1  ;;  %v5220_v53 = vrot.slane %v5219_v35, 1  ;;  %v11533_v57 = vrot.slane %v10757_v27, 2 }
 0x438   :  { %8390 = vmatpush3.bf16.msra.mxu0 %v11532_v22  ;;  %v5272_v39 = vrot.slane %v5271_v30, 4  ;;  %v5101_v20 = vrot.slane %v5100_v10, 1  ;;  %v5226_v40 = vmax.f32 %v5224_v21, %v5225_v62  ;;  %v5212_v24 = vmax.f32 %v5210_v28, %v5211_v19 }
 0x439   :  { %v5114_v45 = vmax.f32 %v10757_v27, %v11533_v57  ;;  %8391 = vmatprep.subr.bf16.mxu0 %v11528_v14  ;;  %v10912_v51 = vsel %vm2628_vm7, %v5207_v37, %v5095_v56  ;;  %v5109_v58 = vmax.f32 %v10778_v12, %v5108_v34  ;;  %v5221_v9 = vmax.f32 %v5219_v35, %v5220_v53 }
 0x43a   :  { %v5252_v43 = vmax.f32 %v10843_v52, %v5251_v49  ;;  %v5259_v59 = vmax.f32 %v10846_v13, %v5258_v5  ;;  %v5227_v27 = vrot.slane %v5226_v40, 1  ;;  %v11534_v54 = vrot.slane %v10754_v61, 2 }
 0x43b   :  { %v5115_v41 = vrot.slane %v5114_v45, 1  ;;  %7986 = vmatmul.mubr.msk.f32.vlgmr.msra.gmra.mrb[44].mxu0 %vm4873_vm15, %v5401_v42  ;;  %v5247_v8 = vmax.f32 %v5245_v16, %v5246_v4  ;;  %v11535_v21 = vpack.c.bf16 %v10640_v33, %v10635_v17  ;;  %v5213_v12 = vrot.slane %v5212_v24, 1 }
 0x43c   :  { %v5121_v7 = vmax.f32 %v10754_v61, %v11534_v54  ;;  %8004 = vmatprep.mubr.msk.f32.mxu0 %vm8800_vm14, %v11520_v36  ;;  %v10927_v52 = vsel %vm2628_vm7, %v5221_v9, %v5109_v58  ;;  %v5233_v13 = vmax.f32 %v5231_v50, %v5232_v55  ;;  %v5273_v28 = vmax.f32 %v5271_v30, %v5272_v39 }
 0x43d   :  { %8393 = vmatpush3.bf16.msra.mxu0 %v11535_v21  ;;  %v5116_v35 = vmax.f32 %v5114_v45, %v5115_v41  ;;  %v5228_v62 = vmax.f32 %v5226_v40, %v5227_v27  ;;  %v5279_v61 = vrot.slane %v10875_v29, 4  ;;  %v5102_v16 = vmax.f32 %v5100_v10, %v5101_v20 }
 0x43e   :  { %8394 = vmatprep.subr.bf16.mxu0 %v11528_v14  ;;  %v5122_v6 = vrot.slane %v5121_v7, 1  ;;  %v5214_v49 = vmax.f32 %v5212_v24, %v5213_v12  ;;  %v5234_v17 = vrot.slane %v5233_v13, 1  ;;  %v5286_v33 = vrot.slane %v10878_v31, 4 }
 0x43f   :  { %v10933_v5 = vsel %vm2628_vm7, %v5228_v62, %v5116_v35  ;;  %v5127_v42 = vrot.slane %v10775_v44, 2  ;;  %v5239_v50 = vrot.slane %v10892_v3, 2  ;;  %v5265_v30 = vrot.slane %v10860_v23, 4 }
 0x440   :  { %v11536_v55 = vpack.c.bf16 %v10654_v32, %v10649_v1  ;;  %v10942_v4 = vsel %vm2628_vm7, %v5214_v49, %v5102_v16  ;;  %v5123_v56 = vmax.f32 %v5121_v7, %v5122_v6  ;;  %v5235_v37 = vmax.f32 %v5233_v13, %v5234_v17 }
 0x441   :  { %v5253_v10 = vrot.slane %v5252_v43, 2  ;;  %v5274_v22 = vrot.slane %v5273_v28, 2  ;;  %v5128_v19 = vmax.f32 %v10775_v44, %v5127_v42  ;;  %v5240_v34 = vmax.f32 %v10892_v3, %v5239_v50 }
 0x442   :  { %8396 = vmatpush3.bf16.msra.mxu0 %v11536_v55  ;;  %v5280_v53 = vmax.f32 %v10875_v29, %v5279_v61  ;;  %v10949_v57 = vsel %vm2628_vm7, %v5235_v37, %v5123_v56  ;;  %v5136_v1 = vrot.slane %v10794_v38, 1  ;;  %v5248_v32 = vrot.slane %v5247_v8, 1  ;;  %v11542_v55 = vld [vmem:[#allocation7_spill] sm:$0xff]  ;;  %v11543_v56 = vld [vmem:[#allocation6_spill] sm:$0xff] }
 0x443   :  { %8397 = vmatprep.subr.bf16.mxu0 %v11528_v14  ;;  %v5260_v45 = vrot.slane %v5259_v59, 2  ;;  %v5287_v39 = vmax.f32 %v10878_v31, %v5286_v33  ;;  %v5129_v20 = vrot.slane %v5128_v19, 1  ;;  %v5241_v40 = vrot.slane %v5240_v34, 1 }
 0x444   :  { %v5266_v24 = vmax.f32 %v10860_v23, %v5265_v30  ;;  %v11537_v44 = vpack.c.bf16 %v10668_v48, %v10663_v11  ;;  %v5137_v3 = vmax.f32 %v10794_v38, %v5136_v1  ;;  %v5249_v29 = vmax.f32 %v5247_v8, %v5248_v32 }
 0x445   :  { %v11538_v58 = vrot.slane %v10783_v63, 2  ;;  %v5275_v41 = vmax.f32 %v5273_v28, %v5274_v22  ;;  %v5130_v27 = vmax.f32 %v5128_v19, %v5129_v20  ;;  %v5242_v31 = vmax.f32 %v5240_v34, %v5241_v40 }
 0x446   :  { %8399 = vmatpush3.bf16.msra.mxu0 %v11537_v44  ;;  %v5254_v54 = vmax.f32 %v5252_v43, %v5253_v10  ;;  %v5281_v7 = vrot.slane %v5280_v53, 2  ;;  %v5293_v23 = vrot.slane %v10886_v25, 4  ;;  %v10964_v21 = vsel %vm2628_vm7, %v5249_v29, %v5137_v3  ;;  %v11546_v29 = vld [vmem:[#allocation9_spill] sm:$0xff] }
 0x447   :  { %v5142_v9 = vmax.f32 %v10783_v63, %v11538_v58  ;;  %8400 = vmatprep.subr.bf16.mxu0 %v11528_v14  ;;  %v5288_v48 = vrot.slane %v5287_v39, 2  ;;  %v10967_v38 = vsel %vm2628_vm7, %v5242_v31, %v5130_v27  ;;  %v11539_v63 = vrot.slane %v10790_v47, 2  ;;  %v11547_v58 = vld [vmem:[#allocation8_spill] sm:$0xff] }
 0x448   :  { %v5255_v8 = vrot.slane %v5254_v54, 1  ;;  %v11540_v13 = vpack.c.bf16 %v10685_v15, %v10680_v2  ;;  %v5261_v28 = vmax.f32 %v5259_v59, %v5260_v45  ;;  %v5155_v35 = vrot.slane %v10816_v60, 2 }
 0x449   :  { %v5143_v11 = vrot.slane %v5142_v9, 1  ;;  %v5149_v12 = vmax.f32 %v10790_v47, %v11539_v63  ;;  %v5267_v62 = vrot.slane %v5266_v24, 2  ;;  %v5164_v16 = vrot.slane %v10882_v46, 1 }
 0x44a   :  { %8402 = vmatpush3.bf16.msra.mxu0 %v11540_v13  ;;  %v5256_v6 = vmax.f32 %v5254_v54, %v5255_v8  ;;  %v5276_v49 = vrot.slane %v5275_v41, 1  ;;  %v5262_v17 = vrot.slane %v5261_v28, 1  ;;  %v5156_v33 = vmax.f32 %v10816_v60, %v5155_v35  ;;  %v7046_v35 = vld [vmem:[%s11499_s5 + $0x100] sm:$0xff] }
 0x44b   :  { %v5144_v43 = vmax.f32 %v5142_v9, %v5143_v11  ;;  %8403 = vmatprep.subr.bf16.mxu0 %v11528_v14  ;;  %v5150_v61 = vrot.slane %v5149_v12, 1  ;;  %v5268_v47 = vmax.f32 %v5266_v24, %v5267_v62  ;;  %v11541_v42 = vrot.slane %v10819_v26, 2 }
 0x44c   :  { %v5294_v15 = vmax.f32 %v10886_v25, %v5293_v23  ;;  %v5165_v50 = vmax.f32 %v10882_v46, %v5164_v16  ;;  %v5277_v30 = vmax.f32 %v5275_v41, %v5276_v49  ;;  %v11544_v37 = vpack.c.bf16 %v11542_v55, %v11543_v56  ;;  %v7042_v46 = vld [vmem:[%s11499_s5 + $0xe8] sm:$0xff]  ;;  %v7055_v55 = vld [vmem:[%s11499_s5 + $0x140] sm:$0xff] }
 0x44d   :  { %v5170_v2 = vmax.f32 %v10819_v26, %v11541_v42  ;;  %8005 = vmatmul.mubr.msk.f32.vlgmr.msra.gmra.mrb[44].mxu0 %vm4873_vm15, %v10912_v51  ;;  %v10986_v59 = vsel %vm2628_vm7, %v5256_v6, %v5144_v43  ;;  %v5151_v60 = vmax.f32 %v5149_v12, %v5150_v61  ;;  %v5263_v26 = vmax.f32 %v5261_v28, %v5262_v17  ;;  %v7041_v51 = vld [vmem:[%s11499_s5 + $0xe0] sm:$0xff]  ;;  %v7048_v17 = vld [vmem:[%s11499_s5 + $0x110] sm:$0xff]  ;;  %v7056_v56 = vld [vmem:[%s11499_s5 + $0x148] sm:$0xff] }
 0x44e   :  { %8405 = vmatpush3.bf16.msra.mxu0 %v11544_v37  ;;  %8023 = vmatprep.mubr.msk.f32.mxu0 %vm8800_vm14, %v11520_v36  ;;  %v5157_v10 = vrot.slane %v5156_v33, 1  ;;  %v5269_v25 = vrot.slane %v5268_v47, 1  ;;  %v11002_v22 = vsel %vm2628_vm7, %v5277_v30, %v5165_v50  ;;  %v5282_v34 = vmax.f32 %v5280_v53, %v5281_v7  ;;  %v7050_v42 = vld [vmem:[%s11499_s5 + $0x120] sm:$0xff]  ;;  %v7053_v50 = vld [vmem:[%s11499_s5 + $0x138] sm:$0xff] }
 0x44f   :  { %8406 = vmatprep.subr.bf16.mxu0 %v11528_v14  ;;  %v5171_v19 = vrot.slane %v5170_v2, 1  ;;  %v11545_v1 = vrot.slane %v10826_v0, 2  ;;  %v11008_v45 = vsel %vm2628_vm7, %v5263_v26, %v5151_v60  ;;  %v5289_v3 = vmax.f32 %v5287_v39, %v5288_v48  ;;  %v7044_v39 = vld [vmem:[%s11499_s5 + $0xf8] sm:$0xff]  ;;  %v7057_v60 = vld [vmem:[%s11499_s5 + $0x150] sm:$0xff] }
 0x450   :  { %v5158_v20 = vmax.f32 %v5156_v33, %v5157_v10  ;;  %v5270_v40 = vmax.f32 %v5268_v47, %v5269_v25  ;;  %v5283_v24 = vrot.slane %v5282_v34, 1  ;;  %v11548_v9 = vpack.c.bf16 %v11546_v29, %v11547_v58  ;;  %v7049_v33 = vld [vmem:[%s11499_s5 + $0x118] sm:$0xff]  ;;  %v7059_v25 = vld [vmem:[%s11499_s5 + $0x160] sm:$0xff]  ;;  %v7069_v29 = vld [vmem:[%s11499_s5 + $0x1a8] sm:$0xff] }
 0x451   :  { %v5177_v32 = vmax.f32 %v10826_v0, %v11545_v1  ;;  %v8410_v41 = vpack.c.bf16 %v7042_v46, %v7041_v51  ;;  %v5183_v53 = vrot.slane %v10868_v18, 2  ;;  %v5295_v31 = vrot.slane %v5294_v15, 2  ;;  %v7043_v0 = vld [vmem:[%s11499_s5 + $0xf0] sm:$0xff]  ;;  %v7058_v26 = vld [vmem:[%s11499_s5 + $0x158] sm:$0xff]  ;;  %v7060_v51 = vld [vmem:[%s11499_s5 + $0x168] sm:$0xff] }
 0x452   :  { %8408 = vmatpush3.bf16.msra.mxu0 %v11548_v9  ;;  %v11014_v27 = vsel %vm2628_vm7, %v5270_v40, %v5158_v20  ;;  %v5172_v54 = vmax.f32 %v5170_v2, %v5171_v19  ;;  %v5284_v7 = vmax.f32 %v5282_v34, %v5283_v24  ;;  %v5290_v23 = vrot.slane %v5289_v3, 1  ;;  %v7051_v2 = vld [vmem:[%s11499_s5 + $0x128] sm:$0xff]  ;;  %v7062_v19 = vld [vmem:[%s11499_s5 + $0x178] sm:$0xff]  ;;  %v7064_v1 = vld [vmem:[%s11499_s5 + $0x180] sm:$0xff] }
 0x453   :  { %v5178_v44 = vrot.slane %v5177_v32, 1  ;;  %8409 = vmatprep.subr.bf16.mxu0 %v11528_v14  ;;  %v5184_v11 = vmax.f32 %v10868_v18, %v5183_v53  ;;  %v5296_v48 = vmax.f32 %v5294_v15, %v5295_v31  ;;  %v8413_v13 = vpack.c.bf16 %v7044_v39, %v7043_v0  ;;  %v7047_v18 = vld [vmem:[%s11499_s5 + $0x108] sm:$0xff]  ;;  %v7066_v40 = vld [vmem:[%s11499_s5 + $0x190] sm:$0xff]  ;;  %v7067_v24 = vld [vmem:[%s11499_s5 + $0x198] sm:$0xff] }
 0x454   :  { %v11026_v8 = vsel %vm2628_vm7, %v5284_v7, %v5172_v54  ;;  %v5291_v12 = vmax.f32 %v5289_v3, %v5290_v23  ;;  %v8416_v16 = vpack.c.bf16 %v7047_v18, %v7046_v35  ;;  %v8419_v47 = vpack.c.bf16 %v7049_v33, %v7048_v17  ;;  %v7068_v3 = vld [vmem:[%s11499_s5 + $0x1a0] sm:$0xff]  ;;  %v7071_v9 = vld [vmem:[%s11499_s5 + $0x1b8] sm:$0xff]  ;;  %v7074_v31 = vld [vmem:[%s11499_s5 + $0x1c8] sm:$0xff] }
 0x455   :  { %v5179_v63 = vmax.f32 %v5177_v32, %v5178_v44  ;;  %v5185_v43 = vrot.slane %v5184_v11, 1  ;;  %v5297_v28 = vrot.slane %v5296_v48, 1  ;;  %v8422_v15 = vpack.c.bf16 %v7051_v2, %v7050_v42  ;;  %v7065_v32 = vld [vmem:[%s11499_s5 + $0x188] sm:$0xff]  ;;  %v7073_v53 = vld [vmem:[%s11499_s5 + $0x1c0] sm:$0xff]  ;;  %v7075_v39 = vld [vmem:[%s11499_s5 + $0x1d0] sm:$0xff] }
 0x456   :  { %8411 = vmatpush3.bf16.msra.mxu0 %v8410_v41  ;;  %v8428_v37 = vpack.c.bf16 %v7056_v56, %v7055_v55  ;;  %v8431_v10 = vpack.c.bf16 %v7058_v26, %v7057_v60  ;;  %v8434_v46 = vpack.c.bf16 %v7060_v51, %v7059_v25  ;;  %v8440_v20 = vpack.c.bf16 %v7065_v32, %v7064_v1  ;;  %v7076_v54 = vld [vmem:[%s11499_s5 + $0x1d8] sm:$0xff]  ;;  %v7077_v23 = vld [vmem:[%s11499_s5 + $0x1e0] sm:$0xff]  ;;  %v7084_v35 = vld [vmem:[%s11499_s5 + $0x210] sm:$0xff] }
 0x457   :  { %8412 = vmatprep.subr.bf16.mxu0 %v11528_v14  ;;  %v11036_v62 = vsel %vm2628_vm7, %v5291_v12, %v5179_v63  ;;  %v5186_v6 = vmax.f32 %v5184_v11, %v5185_v43  ;;  %v5298_v61 = vmax.f32 %v5296_v48, %v5297_v28  ;;  %v8443_v44 = vpack.c.bf16 %v7067_v24, %v7066_v40  ;;  %v7078_v11 = vld [vmem:[%s11499_s5 + $0x1e8] sm:$0xff]  ;;  %v7080_v63 = vld [vmem:[%s11499_s5 + $0x1f8] sm:$0xff] }
 0x458   :  { %v8446_v58 = vpack.c.bf16 %v7069_v29, %v7068_v3  ;;  %v8452_v0 = vpack.c.bf16 %v7074_v31, %v7073_v53  ;;  %v8455_v7 = vpack.c.bf16 %v7076_v54, %v7075_v39  ;;  %v8458_v48 = vpack.c.bf16 %v7078_v11, %v7077_v23  ;;  %v7083_v43 = vld [vmem:[%s11499_s5 + $0x208] sm:$0xff]  ;;  %v7085_v18 = vld [vmem:[%s11499_s5 + $0x218] sm:$0xff]  ;;  %v6678_v29 = vld [vmem:[%s11501_s7 + $0x60] sm:$0xff] }
 0x459   :  { %v11039_v49 = vsel %vm2628_vm7, %v5298_v61, %v5186_v6  ;;  %v6666_v6 = vld [vmem:[%s11501_s7] sm:$0xff]  ;;  %v6667_v61 = vld [vmem:[%s11501_s7 + $0x8] sm:$0xff]  ;;  %v8467_v17 = vpack.c.bf16 %v7085_v18, %v7084_v35  ;;  %v7089_v55 = vld [vmem:[%s11499_s5 + $0x238] sm:$0xff] }
 0x45a   :  { %8414 = vmatpush3.bf16.msra.mxu0 %v8413_v13  ;;  %v7082_v13 = vld [vmem:[%s11499_s5 + $0x200] sm:$0xff]  ;;  %v8560_v33 = vpack.c.bf16 %v6667_v61, %v6666_v6  ;;  %v7087_v42 = vld [vmem:[%s11499_s5 + $0x228] sm:$0xff]  ;;  %v6673_v60 = vld [vmem:[%s11501_s7 + $0x38] sm:$0xff] }
 0x45b   :  { %8415 = vmatprep.subr.bf16.mxu0 %v11528_v14  ;;  %v8464_v28 = vpack.c.bf16 %v7083_v43, %v7082_v13  ;;  %v7092_v25 = vld [vmem:[%s11499_s5 + $0x248] sm:$0xff]  ;;  %v7094_v1 = vld [vmem:[%s11499_s5 + $0x258] sm:$0xff]  ;;  %v7109_v43 = vld [vmem:[%s11499_s5 + $0x2c0] sm:$0xff] }
 0x45c   :  { %8561 = vmatpush3.bf16.msra.mxu1 %v8560_v33  ;;  %v6677_v40 = vld [vmem:[%s11501_s7 + $0x58] sm:$0xff]  ;;  %v7101_v39 = vld [vmem:[%s11499_s5 + $0x288] sm:$0xff]  ;;  %v7111_v18 = vld [vmem:[%s11499_s5 + $0x2d0] sm:$0xff] }
 0x45d   :  { %8024 = vmatmul.mubr.msk.f32.vlgmr.msra.gmra.mrb[44].mxu0 %vm4873_vm15, %v10942_v4  ;;  %v7052_v4 = vld [vmem:[%s11499_s5 + $0x130] sm:$0xff]  ;;  %8562 = vmatprep.subr.bf16.mxu1 %v11528_v14  ;;  %v7103_v23 = vld [vmem:[%s11499_s5 + $0x298] sm:$0xff] }
 0x45e   :  { %8417 = vmatpush3.bf16.msra.mxu0 %v8416_v16  ;;  %8042 = vmatprep.mubr.msk.f32.mxu0 %vm8800_vm14, %v11520_v36  ;;  %v8425_v30 = vpack.c.bf16 %v7053_v50, %v7052_v4  ;;  %v6668_v16 = vld [vmem:[%s11501_s7 + $0x10] sm:$0xff]  ;;  %v6671_v4 = vld [vmem:[%s11501_s7 + $0x28] sm:$0xff]  ;;  %v7112_v6 = vld [vmem:[%s11499_s5 + $0x2d8] sm:$0xff] }
 0x45f   :  { %8418 = vmatprep.subr.bf16.mxu0 %v11528_v14  ;;  %v8503_v61 = vpack.c.bf16 %v7112_v6, %v7111_v18 }
 0x462   :  { %8420 = vmatpush3.bf16.msra.mxu0 %v8419_v47  ;;  %v7086_v47 = vld [vmem:[%s11499_s5 + $0x220] sm:$0xff] }
 0x463   :  { %8421 = vmatprep.subr.bf16.mxu0 %v11528_v14  ;;  %v8470_v50 = vpack.c.bf16 %v7087_v42, %v7086_v47  ;;  %v7118_v42 = vld [vmem:[%s11499_s5 + $0x300] sm:$0xff] }
 0x466   :  { %8423 = vmatpush3.bf16.msra.mxu0 %v8422_v15  ;;  %v6670_v15 = vld [vmem:[%s11501_s7 + $0x20] sm:$0xff] }
 0x467   :  { %8424 = vmatprep.subr.bf16.mxu0 %v11528_v14  ;;  %v8566_v56 = vpack.c.bf16 %v6671_v4, %v6670_v15  ;;  %v7120_v4 = vld [vmem:[%s11499_s5 + $0x310] sm:$0xff] }
 0x46a   :  { %8426 = vmatpush3.bf16.msra.mxu0 %v8425_v30  ;;  %v7088_v30 = vld [vmem:[%s11499_s5 + $0x230] sm:$0xff] }
 0x46b   :  { %8427 = vmatprep.subr.bf16.mxu0 %v11528_v14  ;;  %v8473_v26 = vpack.c.bf16 %v7089_v55, %v7088_v30  ;;  %v7122_v55 = vld [vmem:[%s11499_s5 + $0x320] sm:$0xff] }
 0x46d   :  { %8043 = vmatmul.mubr.msk.f32.vlgmr.msra.gmra.mrb[44].mxu0 %vm4873_vm15, %v10927_v52  ;;  %v7061_v52 = vld [vmem:[%s11499_s5 + $0x170] sm:$0xff] }
 0x46e   :  { %8429 = vmatpush3.bf16.msra.mxu0 %v8428_v37  ;;  %8061 = vmatprep.mubr.msk.f32.mxu0 %vm8800_vm14, %v11520_v36  ;;  %v8437_v34 = vpack.c.bf16 %v7062_v19, %v7061_v52  ;;  %v6672_v37 = vld [vmem:[%s11501_s7 + $0x30] sm:$0xff]  ;;  %v6675_v52 = vld [vmem:[%s11501_s7 + $0x48] sm:$0xff] }
 0x46f   :  { %8430 = vmatprep.subr.bf16.mxu0 %v11528_v14  ;;  %v8569_v51 = vpack.c.bf16 %v6673_v60, %v6672_v37  ;;  %v7125_v60 = vld [vmem:[%s11499_s5 + $0x338] sm:$0xff] }
 0x472   :  { %8432 = vmatpush3.bf16.msra.mxu0 %v8431_v10  ;;  %v7091_v10 = vld [vmem:[%s11499_s5 + $0x240] sm:$0xff] }
 0x473   :  { %8433 = vmatprep.subr.bf16.mxu0 %v11528_v14  ;;  %v8476_v19 = vpack.c.bf16 %v7092_v25, %v7091_v10  ;;  %v7127_v10 = vld [vmem:[%s11499_s5 + $0x340] sm:$0xff]  ;;  %v7128_v25 = vld [vmem:[%s11499_s5 + $0x348] sm:$0xff] }
 0x476   :  { %8435 = vmatpush3.bf16.msra.mxu0 %v8434_v46  ;;  %v6674_v46 = vld [vmem:[%s11501_s7 + $0x40] sm:$0xff] }
 0x477   :  { %8436 = vmatprep.subr.bf16.mxu0 %v11528_v14  ;;  %v8572_v32 = vpack.c.bf16 %v6675_v52, %v6674_v46  ;;  %v7129_v46 = vld [vmem:[%s11499_s5 + $0x350] sm:$0xff]  ;;  %v7130_v52 = vld [vmem:[%s11499_s5 + $0x358] sm:$0xff] }
 0x47a   :  { %8438 = vmatpush3.bf16.msra.mxu0 %v8437_v34  ;;  %v7093_v34 = vld [vmem:[%s11499_s5 + $0x250] sm:$0xff] }
 0x47b   :  { %8439 = vmatprep.subr.bf16.mxu0 %v11528_v14  ;;  %v8479_v24 = vpack.c.bf16 %v7094_v1, %v7093_v34  ;;  %v7131_v34 = vld [vmem:[%s11499_s5 + $0x360] sm:$0xff]  ;;  %v7132_v1 = vld [vmem:[%s11499_s5 + $0x368] sm:$0xff] }
 0x47d   :  { %8062 = vmatmul.mubr.msk.f32.vlgmr.msra.gmra.mrb[44].mxu0 %vm4873_vm15, %v10933_v5  ;;  %v7070_v5 = vld [vmem:[%s11499_s5 + $0x1b0] sm:$0xff] }
 0x47e   :  { %8441 = vmatpush3.bf16.msra.mxu0 %v8440_v20  ;;  %8080 = vmatprep.mubr.msk.f32.mxu0 %vm8800_vm14, %v11520_v36  ;;  %v8449_v41 = vpack.c.bf16 %v7071_v9, %v7070_v5  ;;  %v6676_v20 = vld [vmem:[%s11501_s7 + $0x50] sm:$0xff] }
 0x47f   :  { %8442 = vmatprep.subr.bf16.mxu0 %v11528_v14  ;;  %v8575_v3 = vpack.c.bf16 %v6677_v40, %v6676_v20  ;;  %v7097_v9 = vld [vmem:[%s11499_s5 + $0x270] sm:$0xff]  ;;  %v7134_v20 = vld [vmem:[%s11499_s5 + $0x378] sm:$0xff] }
 0x482   :  { %8444 = vmatpush3.bf16.msra.mxu0 %v8443_v44  ;;  %v7096_v44 = vld [vmem:[%s11499_s5 + $0x268] sm:$0xff] }
 0x483   :  { %8445 = vmatprep.subr.bf16.mxu0 %v11528_v14 }
 0x486   :  { %8447 = vmatpush3.bf16.msra.mxu0 %v8446_v58  ;;  %v6679_v58 = vld [vmem:[%s11501_s7 + $0x68] sm:$0xff] }
 0x487   :  { %8448 = vmatprep.subr.bf16.mxu0 %v11528_v14  ;;  %v8578_v53 = vpack.c.bf16 %v6679_v58, %v6678_v29  ;;  %v7139_v29 = vld [vmem:[%s11499_s5 + $0x398] sm:$0xff] }
 0x48a   :  { %8450 = vmatpush3.bf16.msra.mxu0 %v8449_v41  ;;  %v7098_v41 = vld [vmem:[%s11499_s5 + $0x278] sm:$0xff] }
 0x48b   :  { %8451 = vmatprep.subr.bf16.mxu0 %v11528_v14  ;;  %v8485_v31 = vpack.c.bf16 %v7098_v41, %v7097_v9  ;;  %v7141_v9 = vld [vmem:[%s11499_s5 + $0x3a8] sm:$0xff] }
 0x48d   :  { %8081 = vmatmul.mubr.msk.f32.vlgmr.msra.gmra.mrb[44].mxu0 %vm4873_vm15, %v10949_v57  ;;  %v7079_v57 = vld [vmem:[%s11499_s5 + $0x1f0] sm:$0xff] }
 0x48e   :  { %8453 = vmatpush3.bf16.msra.mxu0 %v8452_v0  ;;  %8099 = vmatprep.mubr.msk.f32.mxu0 %vm8800_vm14, %v11520_v36  ;;  %v8461_v12 = vpack.c.bf16 %v7080_v63, %v7079_v57  ;;  %v7100_v0 = vld [vmem:[%s11499_s5 + $0x280] sm:$0xff]  ;;  %v7105_v57 = vld [vmem:[%s11499_s5 + $0x2a8] sm:$0xff] }
 0x48f   :  { %8454 = vmatprep.subr.bf16.mxu0 %v11528_v14  ;;  %v8488_v54 = vpack.c.bf16 %v7101_v39, %v7100_v0  ;;  %v7145_v0 = vld [vmem:[%s11499_s5 + $0x3c0] sm:$0xff]  ;;  %v7146_v39 = vld [vmem:[%s11499_s5 + $0x3c8] sm:$0xff] }
 0x492   :  { %8456 = vmatpush3.bf16.msra.mxu0 %v8455_v7  ;;  %v7102_v7 = vld [vmem:[%s11499_s5 + $0x290] sm:$0xff] }
 0x493   :  { %8457 = vmatprep.subr.bf16.mxu0 %v11528_v14  ;;  %v8491_v11 = vpack.c.bf16 %v7103_v23, %v7102_v7  ;;  %v7147_v7 = vld [vmem:[%s11499_s5 + $0x3d0] sm:$0xff]  ;;  %v7148_v23 = vld [vmem:[%s11499_s5 + $0x3d8] sm:$0xff] }
 0x496   :  { %8459 = vmatpush3.bf16.msra.mxu0 %v8458_v48  ;;  %v7104_v48 = vld [vmem:[%s11499_s5 + $0x2a0] sm:$0xff] }
 0x497   :  { %8460 = vmatprep.subr.bf16.mxu0 %v11528_v14  ;;  %v8494_v63 = vpack.c.bf16 %v7105_v57, %v7104_v48  ;;  %v7149_v48 = vld [vmem:[%s11499_s5 + $0x3e0] sm:$0xff]  ;;  %v7150_v57 = vld [vmem:[%s11499_s5 + $0x3e8] sm:$0xff] }
 0x49a   :  { %8462 = vmatpush3.bf16.msra.mxu0 %v8461_v12  ;;  %v7107_v12 = vld [vmem:[%s11499_s5 + $0x2b8] sm:$0xff] }
 0x49b   :  { %8463 = vmatprep.subr.bf16.mxu0 %v11528_v14 }
 0x49d   :  { %8100 = vmatmul.mubr.msk.f32.vlgmr.msra.gmra.mrb[44].mxu0 %vm4873_vm15, %v10967_v38  ;;  %v6669_v38 = vld [vmem:[%s11501_s7 + $0x18] sm:$0xff] }
 0x49e   :  { %8465 = vmatpush3.bf16.msra.mxu0 %v8464_v28  ;;  %8118 = vmatprep.mubr.msk.f32.mxu0 %vm8800_vm14, %v11520_v36  ;;  %v8563_v2 = vpack.c.bf16 %v6669_v38, %v6668_v16  ;;  %v7110_v28 = vld [vmem:[%s11499_s5 + $0x2c8] sm:$0xff]  ;;  %v7113_v16 = vld [vmem:[%s11499_s5 + $0x2e0] sm:$0xff]  ;;  %v7116_v38 = vld [vmem:[%s11499_s5 + $0x2f8] sm:$0xff] }
 0x49f   :  { %8466 = vmatprep.subr.bf16.mxu0 %v11528_v14  ;;  %v8500_v35 = vpack.c.bf16 %v7110_v28, %v7109_v43  ;;  %v7017_v28 = vld [vmem:[%s11500_s6] ss:$0 sm:$0xff] }
 0x4a0   :  { %8564 = vmatpush3.bf16.msra.mxu1 %v8563_v2  ;;  %v7119_v2 = vld [vmem:[%s11499_s5 + $0x308] sm:$0xff] }
 0x4a1   :  { %8565 = vmatprep.subr.bf16.mxu1 %v11528_v14  ;;  %v8512_v15 = vpack.c.bf16 %v7119_v2, %v7118_v42 }
 0x4a2   :  { %8468 = vmatpush3.bf16.msra.mxu0 %v8467_v17  ;;  %v7114_v17 = vld [vmem:[%s11499_s5 + $0x2e8] sm:$0xff] }
 0x4a3   :  { %8469 = vmatprep.subr.bf16.mxu0 %v11528_v14  ;;  %v8506_v33 = vpack.c.bf16 %v7114_v17, %v7113_v16 }
 0x4a4   :  { %8567 = vmatpush3.bf16.msra.mxu1 %v8566_v56  ;;  %v7123_v56 = vld [vmem:[%s11499_s5 + $0x328] sm:$0xff] }
 0x4a5   :  { %8568 = vmatprep.subr.bf16.mxu1 %v11528_v14  ;;  %v8518_v37 = vpack.c.bf16 %v7123_v56, %v7122_v55 }
 0x4a6   :  { %8471 = vmatpush3.bf16.msra.mxu0 %v8470_v50  ;;  %v7121_v50 = vld [vmem:[%s11499_s5 + $0x318] sm:$0xff] }
 0x4a7   :  { %8472 = vmatprep.subr.bf16.mxu0 %v11528_v14  ;;  %v8515_v30 = vpack.c.bf16 %v7121_v50, %v7120_v4 }
 0x4a8   :  { %8570 = vmatpush3.bf16.msra.mxu1 %v8569_v51  ;;  %v8524_v51 = vpack.c.bf16 %v7128_v25, %v7127_v10 }
 0x4a9   :  { %8571 = vmatprep.subr.bf16.mxu1 %v11528_v14 }
 0x4aa   :  { %8474 = vmatpush3.bf16.msra.mxu0 %v8473_v26 }
 0x4ab   :  { %8475 = vmatprep.subr.bf16.mxu0 %v11528_v14 }
 0x4ac   :  { %8573 = vmatpush3.bf16.msra.mxu1 %v8572_v32  ;;  %v8530_v32 = vpack.c.bf16 %v7132_v1, %v7131_v34 }
 0x4ad   :  { %8119 = vmatmul.mubr.msk.f32.vlgmr.msra.gmra.mrb[44].mxu0 %vm4873_vm15, %v10964_v21  ;;  %v7095_v21 = vld [vmem:[%s11499_s5 + $0x260] sm:$0xff]  ;;  %8574 = vmatprep.subr.bf16.mxu1 %v11528_v14 }
 0x4ae   :  { %8477 = vmatpush3.bf16.msra.mxu0 %v8476_v19  ;;  %8137 = vmatprep.mubr.msk.f32.mxu0 %vm8800_vm14, %v11520_v36  ;;  %v8482_v5 = vpack.c.bf16 %v7096_v44, %v7095_v21  ;;  %v8527_v19 = vpack.c.bf16 %v7130_v52, %v7129_v46  ;;  %v7137_v21 = vld [vmem:[%s11499_s5 + $0x388] sm:$0xff] }
 0x4af   :  { %8478 = vmatprep.subr.bf16.mxu0 %v11528_v14 }
 0x4b0   :  { %8576 = vmatpush3.bf16.msra.mxu1 %v8575_v3  ;;  %v7138_v3 = vld [vmem:[%s11499_s5 + $0x390] sm:$0xff] }
 0x4b1   :  { %8577 = vmatprep.subr.bf16.mxu1 %v11528_v14  ;;  %v8539_v58 = vpack.c.bf16 %v7139_v29, %v7138_v3 }
 0x4b2   :  { %8480 = vmatpush3.bf16.msra.mxu0 %v8479_v24  ;;  %v7136_v24 = vld [vmem:[%s11499_s5 + $0x380] sm:$0xff] }
 0x4b3   :  { %8481 = vmatprep.subr.bf16.mxu0 %v11528_v14  ;;  %v8536_v44 = vpack.c.bf16 %v7137_v21, %v7136_v24 }
 0x4b4   :  { %8579 = vmatpush3.bf16.msra.mxu1 %v8578_v53  ;;  %v7143_v53 = vld [vmem:[%s11499_s5 + $0x3b8] sm:$0xff] }
 0x4b5   :  { %8580 = vmatprep.subr.bf16.mxu1 %v11528_v14 }
 0x4b6   :  { %8483 = vmatpush3.bf16.msra.mxu0 %v8482_v5  ;;  %v7140_v5 = vld [vmem:[%s11499_s5 + $0x3a0] sm:$0xff] }
 0x4b7   :  { %8484 = vmatprep.subr.bf16.mxu0 %v11528_v14  ;;  %v8542_v41 = vpack.c.bf16 %v7141_v9, %v7140_v5 }
 0x4ba   :  { %8486 = vmatpush3.bf16.msra.mxu0 %v8485_v31 }
 0x4bb   :  { %8487 = vmatprep.subr.bf16.mxu0 %v11528_v14 }
 0x4bd   :  { %8138 = vmatmul.mubr.msk.f32.vlgmr.msra.gmra.mrb[44].mxu0 %vm4873_vm15, %v10986_v59  ;;  %v7106_v59 = vld [vmem:[%s11499_s5 + $0x2b0] sm:$0xff] }
 0x4be   :  { %8489 = vmatpush3.bf16.msra.mxu0 %v8488_v54  ;;  %8156 = vmatprep.mubr.msk.f32.mxu0 %vm8800_vm14, %v11520_v36  ;;  %v8497_v13 = vpack.c.bf16 %v7107_v12, %v7106_v59  ;;  %v8548_v54 = vpack.c.bf16 %v7146_v39, %v7145_v0  ;;  %v6680_v12 = vld [vmem:[%s11501_s7 + $0x70] sm:$0xff] }
 0x4bf   :  { %8490 = vmatprep.subr.bf16.mxu0 %v11528_v14 }
 0x4c2   :  { %8492 = vmatpush3.bf16.msra.mxu0 %v8491_v11  ;;  %v8551_v11 = vpack.c.bf16 %v7148_v23, %v7147_v7 }
 0x4c3   :  { %8493 = vmatprep.subr.bf16.mxu0 %v11528_v14 }
 0x4c6   :  { %8495 = vmatpush3.bf16.msra.mxu0 %v8494_v63  ;;  %v8554_v63 = vpack.c.bf16 %v7150_v57, %v7149_v48 }
 0x4c7   :  { %8496 = vmatprep.subr.bf16.mxu0 %v11528_v14 }
 0x4ca   :  { %8498 = vmatpush3.bf16.msra.mxu0 %v8497_v13  ;;  %v6681_v13 = vld [vmem:[%s11501_s7 + $0x78] sm:$0xff]  ;;  %s8772_s7 = scalar_lea.vmem %s6767_s2, 32 }
 0x4cb   :  { %8499 = vmatprep.subr.bf16.mxu0 %v11528_v14  ;;  %v8581_v43 = vpack.c.bf16 %v6681_v13, %v6680_v12  ;;  %p8773_p0 = scmp.ne.s32.totalorder %s6767_s2, %s8772_s7  ;;  %p8778_p2 = scmp.lt.s32.totalorder %s8772_s7, %s8772_s7 }
 0x4cd   :  { %8157 = vmatmul.mubr.msk.f32.vlgmr.msra.gmra.mrb[44].mxu0 %vm4873_vm15, %v11008_v45  ;;  %v7115_v45 = vld [vmem:[%s11499_s5 + $0x2f0] sm:$0xff]  ;;  %8582 = vmatpush3.bf16.msra.mxu1 %v8581_v43  ;;  %p8779_p3 = por %p8778_p2, %p8777_p1 }
 0x4ce   :  { %8501 = vmatpush3.bf16.msra.mxu0 %v8500_v35  ;;  %8175 = vmatprep.mubr.msk.f32.mxu0 %vm8800_vm14, %v11520_v36  ;;  %v8509_v47 = vpack.c.bf16 %v7116_v38, %v7115_v45 }
 0x4cf   :  { %8502 = vmatprep.subr.bf16.mxu0 %v11528_v14  ;;  %p8780_p4 = pnand %p8779_p3, %p8773_p0 }
 0x4d2   :  { %8504 = vmatpush3.bf16.msra.mxu0 %v8503_v61 }
 0x4d3   :  { %8505 = vmatprep.subr.bf16.mxu0 %v11528_v14 }
 0x4d6   :  { %8507 = vmatpush3.bf16.msra.mxu0 %v8506_v33 }
 0x4d7   :  { %8508 = vmatprep.subr.bf16.mxu0 %v11528_v14 }
 0x4da   :  { %8510 = vmatpush3.bf16.msra.mxu0 %v8509_v47 }
 0x4db   :  { %8511 = vmatprep.subr.bf16.mxu0 %v11528_v14 }
 0x4dd   :  { %8176 = vmatmul.mubr.msk.f32.vlgmr.msra.gmra.mrb[44].mxu0 %vm4873_vm15, %v11014_v27  ;;  %v7124_v27 = vld [vmem:[%s11499_s5 + $0x330] sm:$0xff] }
 0x4de   :  { %8513 = vmatpush3.bf16.msra.mxu0 %v8512_v15  ;;  %8194 = vmatprep.mubr.msk.f32.mxu0 %vm8800_vm14, %v11520_v36  ;;  %v8521_v26 = vpack.c.bf16 %v7125_v60, %v7124_v27 }
 0x4df   :  { %8514 = vmatprep.subr.bf16.mxu0 %v11528_v14 }
 0x4e2   :  { %8516 = vmatpush3.bf16.msra.mxu0 %v8515_v30 }
 0x4e3   :  { %8517 = vmatprep.subr.bf16.mxu0 %v11528_v14 }
 0x4e6   :  { %8519 = vmatpush3.bf16.msra.mxu0 %v8518_v37 }
 0x4e7   :  { %8520 = vmatprep.subr.bf16.mxu0 %v11528_v14 }
 0x4ea   :  { %8522 = vmatpush3.bf16.msra.mxu0 %v8521_v26 }
 0x4eb   :  { %8523 = vmatprep.subr.bf16.mxu0 %v11528_v14 }
 0x4ed   :  { %8195 = vmatmul.mubr.msk.f32.vlgmr.msra.gmra.mrb[44].mxu0 %vm4873_vm15, %v11002_v22  ;;  %v7133_v22 = vld [vmem:[%s11499_s5 + $0x370] sm:$0xff] }
 0x4ee   :  { %8525 = vmatpush3.bf16.msra.mxu0 %v8524_v51  ;;  %8213 = vmatprep.mubr.msk.f32.mxu0 %vm8800_vm14, %v11520_v36  ;;  %v8533_v40 = vpack.c.bf16 %v7134_v20, %v7133_v22 }
 0x4ef   :  { %8526 = vmatprep.subr.bf16.mxu0 %v11528_v14 }
 0x4f2   :  { %8528 = vmatpush3.bf16.msra.mxu0 %v8527_v19 }
 0x4f3   :  { %8529 = vmatprep.subr.bf16.mxu0 %v11528_v14 }
 0x4f6   :  { %8531 = vmatpush3.bf16.msra.mxu0 %v8530_v32 }
 0x4f7   :  { %8532 = vmatprep.subr.bf16.mxu0 %v11528_v14 }
 0x4fa   :  { %8534 = vmatpush3.bf16.msra.mxu0 %v8533_v40 }
 0x4fb   :  { %8535 = vmatprep.subr.bf16.mxu0 %v11528_v14 }
 0x4fd   :  { %8214 = vmatmul.mubr.msk.f32.vlgmr.msra.gmra.mrb[44].mxu0 %vm4873_vm15, %v11026_v8  ;;  %v7142_v8 = vld [vmem:[%s11499_s5 + $0x3b0] sm:$0xff] }
 0x4fe   :  { %8537 = vmatpush3.bf16.msra.mxu0 %v8536_v44  ;;  %8232 = vmatprep.mubr.msk.f32.mxu0 %vm8800_vm14, %v11520_v36  ;;  %v8545_v31 = vpack.c.bf16 %v7143_v53, %v7142_v8 }
 0x4ff   :  { %8538 = vmatprep.subr.bf16.mxu0 %v11528_v14 }
 0x502   :  { %8540 = vmatpush3.bf16.msra.mxu0 %v8539_v58 }
 0x503   :  { %8541 = vmatprep.subr.bf16.mxu0 %v11528_v14 }
 0x506   :  { %8543 = vmatpush3.bf16.msra.mxu0 %v8542_v41 }
 0x507   :  { %8544 = vmatprep.subr.bf16.mxu0 %v11528_v14 }
 0x50a   :  { %8546 = vmatpush3.bf16.msra.mxu0 %v8545_v31 }
 0x50b   :  { %8547 = vmatprep.subr.bf16.mxu0 %v11528_v14 }
 0x50d   :  { %8233 = vmatmul.mubr.msk.f32.vlgmr.msra.gmra.mrb[44].mxu0 %vm4873_vm15, %v11036_v62  ;;  %v7151_v62 = vld [vmem:[%s11499_s5 + $0x3f0] sm:$0xff] }
 0x50e   :  { %8549 = vmatpush3.bf16.msra.mxu0 %v8548_v54  ;;  %8251 = vmatprep.mubr.msk.f32.mxu0 %vm8800_vm14, %v11520_v36  ;;  %v7152_v36 = vld [vmem:[%s11499_s5 + $0x3f8] sm:$0xff] }
 0x50f   :  { %8550 = vmatprep.subr.bf16.mxu0 %v11528_v14  ;;  %v8557_v59 = vpack.c.bf16 %v7152_v36, %v7151_v62 }
 0x512   :  { %8552 = vmatpush3.bf16.msra.mxu0 %v8551_v11 }
 0x513   :  { %8553 = vmatprep.subr.bf16.mxu0 %v11528_v14 }
 0x516   :  { %8555 = vmatpush3.bf16.msra.mxu0 %v8554_v63 }
 0x517   :  { %8556 = vmatprep.subr.bf16.mxu0 %v11528_v14 }
 0x51a   :  { %8558 = vmatpush3.bf16.msra.mxu0 %v8557_v59 }
 0x51d   :  { %8252 = vmatmul.mubr.msk.f32.vlgmr.msra.gmra.mrb[44].mxu0 %vm4873_vm15, %v11039_v49  ;;  %v7154_v49 = vld [vmem:[%s11502_s8] ss:$0 sm:$0xff] }
 0x5f0   :  { %v6660_v35 = vpop.f32.mrb[44].mxu0 }
 0x5f1   :  { %v8601_v14 = vadd.f32 %v7017_v28, %v6660_v35  ;;  %v8253_v18 = vpop.f32.mrb[45].mxu0 }
 0x5f3   :  { %v6665_v6 = vmax.f32 %v8601_v14, 0.0 }
 0x5f5   :  { %8287 = vmatmul.mubr.f32.vlgmr.msra.gmra.mrb[36].mxu1 %v6665_v6 }
 0x6c8   :  { %v6755_v61 = vpop.f32.mrb[36].mxu1 }
 0x6c9   :  { %v6756_v16 = vadd.f32 %v7154_v49, %v6755_v61  ;;  %v8288_v17 = vpop.f32.mrb[37].mxu1 }
 0x6cb   :  { %6759 = vst [vmem:[#allocation3] sm:$0x3] %v6756_v16 }
 0x6cc   :  { %8783 = shalt.err (!%p8780_p4)
}
 0x6cd   :  { %s8784_s22 = scalar_lea.hbm %s11503_s9, 32 }
 0x6ce   :  { %p8785_p5 = scmp.ne.s32.totalorder %s11503_s9, %s8784_s22  ;;  %p8788_p6 = scmp.lt.u32.totalorder %s8784_s22, %s11503_s9 }
 0x6d0   :  { %p8790_p7 = pnand %p8788_p6, %p8785_p5 }
 0x6d2   :  { %8793 = shalt.err (!%p8790_p7)
}
 0x6d3   :  { %6769 = dma.vmem_to_hbm [thread:$0]  %s6767_s2, 32, %s11503_s9, [#allocation4]  }
 0x6d4   :  { %8794 = dma.done.wait [#allocation4], 32  }
 0x6d5   :  { %8795 = vsyncadd [#allocation4], 4294967264 }
 0x6d6   :  { %6773 = vsyncpa [#allocation4], 1 }

</bundles_post_ra>
